<compile_context>
chip_gen: v6e
topology: v6e:2x2x1
jax: 0.10.0
libtpu: 0.0.40
codegen_flags: <defaults>
</compile_context>

<pallas_src>
import numpy as np
import jax
import jax.numpy as jnp
from jax import lax
from jax.experimental import pallas as pl
from jax.experimental.pallas import tpu as pltpu

BN_EPS = 1e-5

_VMEM = pl.BlockSpec(memory_space=pltpu.MemorySpace.VMEM)


# ---------------------------------------------------------------------------
# Fused Pallas kernel: (conv3x3 + BN(train) + maxpool2x2 + ReLU) * n_blocks + Linear
# ---------------------------------------------------------------------------
def _make_convnet_kernel(block_dims):
    """block_dims: tuple of (m_in, c_in, c_out, mout) per conv block (static)."""
    num_blocks = len(block_dims)

    def kernel(*refs):
        x_ref = refs[0]
        lw_ref = refs[1 + 4 * num_blocks]
        lb_ref = refs[2 + 4 * num_blocks]
        o_ref = refs[3 + 4 * num_blocks]

        a = x_ref[...]  # (M0, C0): NHWC-flattened input, rows ordered (n, h, w)
        for k, (_m_in, _c_in, _c_out, mout) in enumerate(block_dims):
            w_ref, gm_ref, bt_ref, g_ref = refs[1 + 4 * k: 5 + 4 * k]
            m4 = 4 * mout  # = N * H * W conv output positions of this block

            # --- Conv3x3 'same': y[(offset s, pooled pos p), :] = sum_t G_t @ (a @ W_t) ------
            y = None
            for t in range(9):  # t = 3*dy + dx
                zt = jnp.dot(a, w_ref[t], preferred_element_type=jnp.float32)   # (m_in, c_out)
                ct = jnp.dot(g_ref[t], zt, preferred_element_type=jnp.float32)  # (m4,   c_out)
                y = ct if y is None else y + ct
            # (conv bias intentionally omitted: exactly cancelled by train-mode BN mean subtraction)

            # --- BatchNorm2d (train-mode batch stats over all N*H*W rows), one pass,
            #     folded into scale/shift ---------------------------------------------------
            s1 = jnp.sum(y, axis=0, keepdims=True)
            s2 = jnp.sum(y * y, axis=0, keepdims=True)
            mean = s1 * (1.0 / m4)
            var = s2 * (1.0 / m4) - mean * mean          # biased variance
            scale = lax.rsqrt(var + BN_EPS) * gm_ref[...]
            shift = bt_ref[...] - mean * scale
            yn = y * scale + shift

            # --- MaxPool2d(2,2): max over the 4 pool-offset row groups, then ReLU -----------
            pooled = jnp.maximum(
                jnp.maximum(yn[0 * mout:1 * mout, :], yn[1 * mout:2 * mout, :]),
                jnp.maximum(yn[2 * mout:3 * mout, :], yn[3 * mout:4 * mout, :]),
            )
            a = jnp.maximum(pooled, 0.0)
            # TODO(synk): nn.Dropout(p=0.1) is stochastic in train mode; applied as identity
            # (eval-mode semantics) here.

        # --- Flatten (spatial is 1x1 after all poolings) + Linear ----------------------------
        o_ref[...] = jnp.dot(a, lw_ref[...], preferred_element_type=jnp.float32) + lb_ref[...]

    return kernel


# ---------------------------------------------------------------------------
# One-time parameter packing (hoisted out of the per-forward path)
# ---------------------------------------------------------------------------
def _gather_mats(n, h, w):
    """0/1 row-selection matrices G of shape (9, 4*Mout, n*h*w).

    For pool offset s = 2*a + b and pooled position p = (n_, i, j) (row-major), row s*Mout + p of
    G_t selects the input row at spatial (2*i + a + dy - 1, 2*j + b + dx - 1) for tap t = 3*dy+dx
    (all-zero row when that position falls into the 'same' zero padding).
    """
    ho, wo = h // 2, w // 2
    mout = n * ho * wo
    m_in = n * h * w
    g = np.zeros((9, 4 * mout, m_in), np.float32)
    for a in range(2):
        for b in range(2):
            s = 2 * a + b
            for nn in range(n):
                for i in range(ho):
                    for j in range(wo):
                        p = s * mout + (nn * ho + i) * wo + j
                        for dy in range(3):
                            for dx in range(3):
                                hh = 2 * i + a + dy - 1
                                ww = 2 * j + b + dx - 1
                                if 0 <= hh < h and 0 <= ww < w:
                                    g[3 * dy + dx, p, (nn * h + hh) * w + ww] = 1.0
    return jnp.asarray(g)


def pack_params(conv_params, linear_params, N, H, W, in_ch):
    """Relayout PyTorch-style params into kernel-ready operands (done once, not per forward)."""
    blocks = []
    h, w_sp, c = H, W, in_ch
    first = True
    for (wt, _bias, gamma, beta) in conv_params:   # conv bias is a no-op before train-mode BN
        cout = wt.shape[0]
        # (Cout, Cin, 3, 3) -> (dy, dx, cin, cout) -> (9, cin, cout); tap index t = 3*dy + dx
        w9 = jnp.transpose(wt, (2, 3, 1, 0)).reshape(9, c, cout).astype(jnp.float32)
        if first:
            c_pad = -(-c // 8) * 8                 # pad external-input channels up to mult. of 8
            if c_pad != c:
                w9 = jnp.pad(w9, ((0, 0), (0, c_pad - c), (0, 0)))
            first = False
        g = _gather_mats(N, h, w_sp)
        blocks.append((w9,
                       gamma.reshape(1, cout).astype(jnp.float32),
                       beta.reshape(1, cout).astype(jnp.float32),
                       g))
        h, w_sp, c = h // 2, w_sp // 2, cout
    assert h == 1 and w_sp == 1, (
        "nn.Linear(in_features=C_last) requires spatial 1x1 after all poolings")
    lw, lb = linear_params
    ncls = lw.shape[0]
    packed_linear = (jnp.transpose(lw).astype(jnp.float32),
                     lb.reshape(1, ncls).astype(jnp.float32))
    return blocks, packed_linear


# ---------------------------------------------------------------------------
# Forward: one pallas_call for the whole network
# ---------------------------------------------------------------------------
def _forward_impl(x_nchw, packed_blocks, packed_linear):
    N, Cin, H, W = x_nchw.shape
    x2d = jnp.transpose(x_nchw, (0, 2, 3, 1)).reshape(N * H * W, Cin).astype(jnp.float32)
    c0 = packed_blocks[0][0].shape[1]
    if c0 != Cin:  # match block-1's zero-padded contraction dim
        x2d = jnp.pad(x2d, ((0, 0), (0, c0 - Cin)))

    operands = [x2d]
    block_dims = []
    for (w9, gm, bt, g) in packed_blocks:
        _, c_in_k, c_out_k = w9.shape
        _, m4, m_in_k = g.shape
        block_dims.append((m_in_k, c_in_k, c_out_k, m4 // 4))
        operands += [w9, gm, bt, g]
    lw_t, lb = packed_linear
    operands += [lw_t, lb]
    ncls = lw_t.shape[1]

    kernel = _make_convnet_kernel(tuple(block_dims))
    return pl.pallas_call(
        kernel,
        out_shape=jax.ShapeDtypeStruct((N, ncls), jnp.float32),
        in_specs=[_VMEM] * len(operands),
        out_specs=_VMEM,
    )(*operands)


convnet_forward = jax.jit(_forward_impl)


# ---------------------------------------------------------------------------
# Parameter init mirroring PyTorch default shapes/init
# ---------------------------------------------------------------------------
def init_params(key, in_ch, hidden_layers, num_classes):
    conv_params = []
    prev = in_ch
    for hsz in hidden_layers:
        key, k1, k2 = jax.random.split(key, 3)
        fan_in = prev * 3 * 3
        bound = 1.0 / jnp.sqrt(fan_in)
        w = jax.random.uniform(k1, (hsz, prev, 3, 3), jnp.float32, -bound, bound)
        b = jax.random.uniform(k2, (hsz,), jnp.float32, -bound, bound)  # kept for shape parity
        gamma = jnp.ones((hsz,), jnp.float32)   # BatchNorm2d default init
        beta = jnp.zeros((hsz,), jnp.float32)
        conv_params.append((w, b, gamma, beta))
        prev = hsz
    key, k1, k2 = jax.random.split(key, 3)
    bound = 1.0 / jnp.sqrt(prev)
    lw = jax.random.uniform(k1, (num_classes, prev), jnp.float32, -bound, bound)
    lb = jax.random.uniform(k2, (num_classes,), jnp.float32, -bound, bound)
    return conv_params, (lw, lb)


if __name__ == "__main__":
    key = jax.random.PRNGKey(0)
    kx, kp = jax.random.split(key)

    input_size = 3          # channels (as in the reference script)
    num_classes = 10
    hidden_layers = [8, 16, 32]
    N, H, W = 2, 8, 8       # 3 pool stages: 8 -> 4 -> 2 -> 1, so Linear in_features == 32

    x = jax.random.normal(kx, (N, input_size, H, W), jnp.float32)  # NCHW like PyTorch
    conv_params, linear_params = init_params(kp, input_size, hidden_layers, num_classes)

    packed_blocks, packed_linear = pack_params(
        conv_params, linear_params, N, H, W, input_size)

    out = convnet_forward(x, packed_blocks, packed_linear)
    out = jax.block_until_ready(out)
    assert out.shape == (N, num_classes), out.shape
    print("KERNEL_OK")
</pallas_src>

<mosaic_0001>
module attributes {stable_mosaic.version = 11 : i64} {
  func.func @kernel(%arg0: memref<128x8xf32, #tpu.memory_space<vmem>>, %arg1: memref<9x8x8xf32, #tpu.memory_space<vmem>>, %arg2: memref<1x8xf32, #tpu.memory_space<vmem>>, %arg3: memref<1x8xf32, #tpu.memory_space<vmem>>, %arg4: memref<9x128x128xf32, #tpu.memory_space<vmem>>, %arg5: memref<9x8x16xf32, #tpu.memory_space<vmem>>, %arg6: memref<1x16xf32, #tpu.memory_space<vmem>>, %arg7: memref<1x16xf32, #tpu.memory_space<vmem>>, %arg8: memref<9x32x32xf32, #tpu.memory_space<vmem>>, %arg9: memref<9x16x32xf32, #tpu.memory_space<vmem>>, %arg10: memref<1x32xf32, #tpu.memory_space<vmem>>, %arg11: memref<1x32xf32, #tpu.memory_space<vmem>>, %arg12: memref<9x8x8xf32, #tpu.memory_space<vmem>>, %arg13: memref<32x10xf32, #tpu.memory_space<vmem>>, %arg14: memref<1x10xf32, #tpu.memory_space<vmem>>, %arg15: memref<2x10xf32, #tpu.memory_space<vmem>>) attributes {dimension_semantics = [], scalar_prefetch = 0 : i64, scratch_operands = 0 : i64, tpu.core_type = #tpu.core_type<tc>} {
    %c0 = arith.constant 0 : index
    %c0_0 = arith.constant 0 : index
    %0 = vector.load %arg0[%c0, %c0_0] : memref<128x8xf32, #tpu.memory_space<vmem>>, vector<128x8xf32>
    %c0_1 = arith.constant 0 : index
    %c0_2 = arith.constant 0 : index
    %c0_3 = arith.constant 0 : index
    %1 = vector.load %arg1[%c0_1, %c0_2, %c0_3] : memref<9x8x8xf32, #tpu.memory_space<vmem>>, vector<1x8x8xf32>
    %2 = vector.shape_cast %1 : vector<1x8x8xf32> to vector<8x8xf32>
    %cst = arith.constant dense<0.000000e+00> : vector<128x8xf32>
    %3 = tpu.matmul %0, %2, %cst {dimension_numbers = #tpu.dot_dimension_numbers<[1], [0], [0], [1], [0, 0, 1, 1], [], []>} : vector<128x8xf32>, vector<8x8xf32>, vector<128x8xf32> -> vector<128x8xf32>
    %c0_4 = arith.constant 0 : index
    %c0_5 = arith.constant 0 : index
    %c0_6 = arith.constant 0 : index
    %4 = vector.load %arg4[%c0_4, %c0_5, %c0_6] : memref<9x128x128xf32, #tpu.memory_space<vmem>>, vector<1x128x128xf32>
    %5 = vector.shape_cast %4 : vector<1x128x128xf32> to vector<128x128xf32>
    %cst_7 = arith.constant dense<0.000000e+00> : vector<128x8xf32>
    %6 = tpu.matmul %5, %3, %cst_7 {dimension_numbers = #tpu.dot_dimension_numbers<[1], [0], [0], [1], [0, 0, 1, 1], [], []>} : vector<128x128xf32>, vector<128x8xf32>, vector<128x8xf32> -> vector<128x8xf32>
    %c1 = arith.constant 1 : index
    %c0_8 = arith.constant 0 : index
    %c0_9 = arith.constant 0 : index
    %7 = vector.load %arg1[%c1, %c0_8, %c0_9] : memref<9x8x8xf32, #tpu.memory_space<vmem>>, vector<1x8x8xf32>
    %8 = vector.shape_cast %7 : vector<1x8x8xf32> to vector<8x8xf32>
    %cst_10 = arith.constant dense<0.000000e+00> : vector<128x8xf32>
    %9 = tpu.matmul %0, %8, %cst_10 {dimension_numbers = #tpu.dot_dimension_numbers<[1], [0], [0], [1], [0, 0, 1, 1], [], []>} : vector<128x8xf32>, vector<8x8xf32>, vector<128x8xf32> -> vector<128x8xf32>
    %c1_11 = arith.constant 1 : index
    %c0_12 = arith.constant 0 : index
    %c0_13 = arith.constant 0 : index
    %10 = vector.load %arg4[%c1_11, %c0_12, %c0_13] : memref<9x128x128xf32, #tpu.memory_space<vmem>>, vector<1x128x128xf32>
    %11 = vector.shape_cast %10 : vector<1x128x128xf32> to vector<128x128xf32>
    %cst_14 = arith.constant dense<0.000000e+00> : vector<128x8xf32>
    %12 = tpu.matmul %11, %9, %cst_14 {dimension_numbers = #tpu.dot_dimension_numbers<[1], [0], [0], [1], [0, 0, 1, 1], [], []>} : vector<128x128xf32>, vector<128x8xf32>, vector<128x8xf32> -> vector<128x8xf32>
    %13 = arith.addf %6, %12 : vector<128x8xf32>
    %c2 = arith.constant 2 : index
    %c0_15 = arith.constant 0 : index
    %c0_16 = arith.constant 0 : index
    %14 = vector.load %arg1[%c2, %c0_15, %c0_16] : memref<9x8x8xf32, #tpu.memory_space<vmem>>, vector<1x8x8xf32>
    %15 = vector.shape_cast %14 : vector<1x8x8xf32> to vector<8x8xf32>
    %cst_17 = arith.constant dense<0.000000e+00> : vector<128x8xf32>
    %16 = tpu.matmul %0, %15, %cst_17 {dimension_numbers = #tpu.dot_dimension_numbers<[1], [0], [0], [1], [0, 0, 1, 1], [], []>} : vector<128x8xf32>, vector<8x8xf32>, vector<128x8xf32> -> vector<128x8xf32>
    %c2_18 = arith.constant 2 : index
    %c0_19 = arith.constant 0 : index
    %c0_20 = arith.constant 0 : index
    %17 = vector.load %arg4[%c2_18, %c0_19, %c0_20] : memref<9x128x128xf32, #tpu.memory_space<vmem>>, vector<1x128x128xf32>
    %18 = vector.shape_cast %17 : vector<1x128x128xf32> to vector<128x128xf32>
    %cst_21 = arith.constant dense<0.000000e+00> : vector<128x8xf32>
    %19 = tpu.matmul %18, %16, %cst_21 {dimension_numbers = #tpu.dot_dimension_numbers<[1], [0], [0], [1], [0, 0, 1, 1], [], []>} : vector<128x128xf32>, vector<128x8xf32>, vector<128x8xf32> -> vector<128x8xf32>
    %20 = arith.addf %13, %19 : vector<128x8xf32>
    %c3 = arith.constant 3 : index
    %c0_22 = arith.constant 0 : index
    %c0_23 = arith.constant 0 : index
    %21 = vector.load %arg1[%c3, %c0_22, %c0_23] : memref<9x8x8xf32, #tpu.memory_space<vmem>>, vector<1x8x8xf32>
    %22 = vector.shape_cast %21 : vector<1x8x8xf32> to vector<8x8xf32>
    %cst_24 = arith.constant dense<0.000000e+00> : vector<128x8xf32>
    %23 = tpu.matmul %0, %22, %cst_24 {dimension_numbers = #tpu.dot_dimension_numbers<[1], [0], [0], [1], [0, 0, 1, 1], [], []>} : vector<128x8xf32>, vector<8x8xf32>, vector<128x8xf32> -> vector<128x8xf32>
    %c3_25 = arith.constant 3 : index
    %c0_26 = arith.constant 0 : index
    %c0_27 = arith.constant 0 : index
    %24 = vector.load %arg4[%c3_25, %c0_26, %c0_27] : memref<9x128x128xf32, #tpu.memory_space<vmem>>, vector<1x128x128xf32>
    %25 = vector.shape_cast %24 : vector<1x128x128xf32> to vector<128x128xf32>
    %cst_28 = arith.constant dense<0.000000e+00> : vector<128x8xf32>
    %26 = tpu.matmul %25, %23, %cst_28 {dimension_numbers = #tpu.dot_dimension_numbers<[1], [0], [0], [1], [0, 0, 1, 1], [], []>} : vector<128x128xf32>, vector<128x8xf32>, vector<128x8xf32> -> vector<128x8xf32>
    %27 = arith.addf %20, %26 : vector<128x8xf32>
    %c4 = arith.constant 4 : index
    %c0_29 = arith.constant 0 : index
    %c0_30 = arith.constant 0 : index
    %28 = vector.load %arg1[%c4, %c0_29, %c0_30] : memref<9x8x8xf32, #tpu.memory_space<vmem>>, vector<1x8x8xf32>
    %29 = vector.shape_cast %28 : vector<1x8x8xf32> to vector<8x8xf32>
    %cst_31 = arith.constant dense<0.000000e+00> : vector<128x8xf32>
    %30 = tpu.matmul %0, %29, %cst_31 {dimension_numbers = #tpu.dot_dimension_numbers<[1], [0], [0], [1], [0, 0, 1, 1], [], []>} : vector<128x8xf32>, vector<8x8xf32>, vector<128x8xf32> -> vector<128x8xf32>
    %c4_32 = arith.constant 4 : index
    %c0_33 = arith.constant 0 : index
    %c0_34 = arith.constant 0 : index
    %31 = vector.load %arg4[%c4_32, %c0_33, %c0_34] : memref<9x128x128xf32, #tpu.memory_space<vmem>>, vector<1x128x128xf32>
    %32 = vector.shape_cast %31 : vector<1x128x128xf32> to vector<128x128xf32>
    %cst_35 = arith.constant dense<0.000000e+00> : vector<128x8xf32>
    %33 = tpu.matmul %32, %30, %cst_35 {dimension_numbers = #tpu.dot_dimension_numbers<[1], [0], [0], [1], [0, 0, 1, 1], [], []>} : vector<128x128xf32>, vector<128x8xf32>, vector<128x8xf32> -> vector<128x8xf32>
    %34 = arith.addf %27, %33 : vector<128x8xf32>
    %c5 = arith.constant 5 : index
    %c0_36 = arith.constant 0 : index
    %c0_37 = arith.constant 0 : index
    %35 = vector.load %arg1[%c5, %c0_36, %c0_37] : memref<9x8x8xf32, #tpu.memory_space<vmem>>, vector<1x8x8xf32>
    %36 = vector.shape_cast %35 : vector<1x8x8xf32> to vector<8x8xf32>
    %cst_38 = arith.constant dense<0.000000e+00> : vector<128x8xf32>
    %37 = tpu.matmul %0, %36, %cst_38 {dimension_numbers = #tpu.dot_dimension_numbers<[1], [0], [0], [1], [0, 0, 1, 1], [], []>} : vector<128x8xf32>, vector<8x8xf32>, vector<128x8xf32> -> vector<128x8xf32>
    %c5_39 = arith.constant 5 : index
    %c0_40 = arith.constant 0 : index
    %c0_41 = arith.constant 0 : index
    %38 = vector.load %arg4[%c5_39, %c0_40, %c0_41] : memref<9x128x128xf32, #tpu.memory_space<vmem>>, vector<1x128x128xf32>
    %39 = vector.shape_cast %38 : vector<1x128x128xf32> to vector<128x128xf32>
    %cst_42 = arith.constant dense<0.000000e+00> : vector<128x8xf32>
    %40 = tpu.matmul %39, %37, %cst_42 {dimension_numbers = #tpu.dot_dimension_numbers<[1], [0], [0], [1], [0, 0, 1, 1], [], []>} : vector<128x128xf32>, vector<128x8xf32>, vector<128x8xf32> -> vector<128x8xf32>
    %41 = arith.addf %34, %40 : vector<128x8xf32>
    %c6 = arith.constant 6 : index
    %c0_43 = arith.constant 0 : index
    %c0_44 = arith.constant 0 : index
    %42 = vector.load %arg1[%c6, %c0_43, %c0_44] : memref<9x8x8xf32, #tpu.memory_space<vmem>>, vector<1x8x8xf32>
    %43 = vector.shape_cast %42 : vector<1x8x8xf32> to vector<8x8xf32>
    %cst_45 = arith.constant dense<0.000000e+00> : vector<128x8xf32>
    %44 = tpu.matmul %0, %43, %cst_45 {dimension_numbers = #tpu.dot_dimension_numbers<[1], [0], [0], [1], [0, 0, 1, 1], [], []>} : vector<128x8xf32>, vector<8x8xf32>, vector<128x8xf32> -> vector<128x8xf32>
    %c6_46 = arith.constant 6 : index
    %c0_47 = arith.constant 0 : index
    %c0_48 = arith.constant 0 : index
    %45 = vector.load %arg4[%c6_46, %c0_47, %c0_48] : memref<9x128x128xf32, #tpu.memory_space<vmem>>, vector<1x128x128xf32>
    %46 = vector.shape_cast %45 : vector<1x128x128xf32> to vector<128x128xf32>
    %cst_49 = arith.constant dense<0.000000e+00> : vector<128x8xf32>
    %47 = tpu.matmul %46, %44, %cst_49 {dimension_numbers = #tpu.dot_dimension_numbers<[1], [0], [0], [1], [0, 0, 1, 1], [], []>} : vector<128x128xf32>, vector<128x8xf32>, vector<128x8xf32> -> vector<128x8xf32>
    %48 = arith.addf %41, %47 : vector<128x8xf32>
    %c7 = arith.constant 7 : index
    %c0_50 = arith.constant 0 : index
    %c0_51 = arith.constant 0 : index
    %49 = vector.load %arg1[%c7, %c0_50, %c0_51] : memref<9x8x8xf32, #tpu.memory_space<vmem>>, vector<1x8x8xf32>
    %50 = vector.shape_cast %49 : vector<1x8x8xf32> to vector<8x8xf32>
    %cst_52 = arith.constant dense<0.000000e+00> : vector<128x8xf32>
    %51 = tpu.matmul %0, %50, %cst_52 {dimension_numbers = #tpu.dot_dimension_numbers<[1], [0], [0], [1], [0, 0, 1, 1], [], []>} : vector<128x8xf32>, vector<8x8xf32>, vector<128x8xf32> -> vector<128x8xf32>
    %c7_53 = arith.constant 7 : index
    %c0_54 = arith.constant 0 : index
    %c0_55 = arith.constant 0 : index
    %52 = vector.load %arg4[%c7_53, %c0_54, %c0_55] : memref<9x128x128xf32, #tpu.memory_space<vmem>>, vector<1x128x128xf32>
    %53 = vector.shape_cast %52 : vector<1x128x128xf32> to vector<128x128xf32>
    %cst_56 = arith.constant dense<0.000000e+00> : vector<128x8xf32>
    %54 = tpu.matmul %53, %51, %cst_56 {dimension_numbers = #tpu.dot_dimension_numbers<[1], [0], [0], [1], [0, 0, 1, 1], [], []>} : vector<128x128xf32>, vector<128x8xf32>, vector<128x8xf32> -> vector<128x8xf32>
    %55 = arith.addf %48, %54 : vector<128x8xf32>
    %c8 = arith.constant 8 : index
    %c0_57 = arith.constant 0 : index
    %c0_58 = arith.constant 0 : index
    %56 = vector.load %arg1[%c8, %c0_57, %c0_58] : memref<9x8x8xf32, #tpu.memory_space<vmem>>, vector<1x8x8xf32>
    %57 = vector.shape_cast %56 : vector<1x8x8xf32> to vector<8x8xf32>
    %cst_59 = arith.constant dense<0.000000e+00> : vector<128x8xf32>
    %58 = tpu.matmul %0, %57, %cst_59 {dimension_numbers = #tpu.dot_dimension_numbers<[1], [0], [0], [1], [0, 0, 1, 1], [], []>} : vector<128x8xf32>, vector<8x8xf32>, vector<128x8xf32> -> vector<128x8xf32>
    %c8_60 = arith.constant 8 : index
    %c0_61 = arith.constant 0 : index
    %c0_62 = arith.constant 0 : index
    %59 = vector.load %arg4[%c8_60, %c0_61, %c0_62] : memref<9x128x128xf32, #tpu.memory_space<vmem>>, vector<1x128x128xf32>
    %60 = vector.shape_cast %59 : vector<1x128x128xf32> to vector<128x128xf32>
    %cst_63 = arith.constant dense<0.000000e+00> : vector<128x8xf32>
    %61 = tpu.matmul %60, %58, %cst_63 {dimension_numbers = #tpu.dot_dimension_numbers<[1], [0], [0], [1], [0, 0, 1, 1], [], []>} : vector<128x128xf32>, vector<128x8xf32>, vector<128x8xf32> -> vector<128x8xf32>
    %62 = arith.addf %55, %61 : vector<128x8xf32>
    %cst_64 = arith.constant dense<0.000000e+00> : vector<8xf32>
    %63 = vector.multi_reduction <add>, %62, %cst_64 [0] : vector<128x8xf32> to vector<8xf32>
    %64 = vector.shape_cast %63 : vector<8xf32> to vector<1x8xf32>
    %65 = arith.mulf %62, %62 : vector<128x8xf32>
    %cst_65 = arith.constant dense<0.000000e+00> : vector<8xf32>
    %66 = vector.multi_reduction <add>, %65, %cst_65 [0] : vector<128x8xf32> to vector<8xf32>
    %67 = vector.shape_cast %66 : vector<8xf32> to vector<1x8xf32>
    %cst_66 = arith.constant 7.812500e-03 : f32
    %68 = vector.broadcast %cst_66 : f32 to vector<1x8xf32>
    %69 = arith.mulf %64, %68 : vector<1x8xf32>
    %cst_67 = arith.constant 7.812500e-03 : f32
    %70 = vector.broadcast %cst_67 : f32 to vector<1x8xf32>
    %71 = arith.mulf %67, %70 : vector<1x8xf32>
    %72 = arith.mulf %69, %69 : vector<1x8xf32>
    %73 = arith.subf %71, %72 : vector<1x8xf32>
    %cst_68 = arith.constant 9.99999974E-6 : f32
    %74 = vector.broadcast %cst_68 : f32 to vector<1x8xf32>
    %75 = arith.addf %73, %74 : vector<1x8xf32>
    %76 = math.rsqrt %75 : vector<1x8xf32>
    %c0_69 = arith.constant 0 : index
    %c0_70 = arith.constant 0 : index
    %77 = vector.load %arg2[%c0_69, %c0_70] : memref<1x8xf32, #tpu.memory_space<vmem>>, vector<1x8xf32>
    %78 = arith.mulf %76, %77 : vector<1x8xf32>
    %c0_71 = arith.constant 0 : index
    %c0_72 = arith.constant 0 : index
    %79 = vector.load %arg3[%c0_71, %c0_72] : memref<1x8xf32, #tpu.memory_space<vmem>>, vector<1x8xf32>
    %80 = arith.mulf %69, %78 : vector<1x8xf32>
    %81 = arith.subf %79, %80 : vector<1x8xf32>
    %82 = vector.broadcast %78 : vector<1x8xf32> to vector<128x8xf32>
    %83 = arith.mulf %62, %82 : vector<128x8xf32>
    %84 = vector.broadcast %81 : vector<1x8xf32> to vector<128x8xf32>
    %85 = arith.addf %83, %84 : vector<128x8xf32>
    %86 = vector.extract_strided_slice %85 {offsets = [0, 0], sizes = [32, 8], strides = [1, 1]} : vector<128x8xf32> to vector<32x8xf32>
    %87 = vector.extract_strided_slice %85 {offsets = [32, 0], sizes = [32, 8], strides = [1, 1]} : vector<128x8xf32> to vector<32x8xf32>
    %88 = arith.maximumf %86, %87 : vector<32x8xf32>
    %89 = vector.extract_strided_slice %85 {offsets = [64, 0], sizes = [32, 8], strides = [1, 1]} : vector<128x8xf32> to vector<32x8xf32>
    %90 = vector.extract_strided_slice %85 {offsets = [96, 0], sizes = [32, 8], strides = [1, 1]} : vector<128x8xf32> to vector<32x8xf32>
    %91 = arith.maximumf %89, %90 : vector<32x8xf32>
    %92 = arith.maximumf %88, %91 : vector<32x8xf32>
    %cst_73 = arith.constant 0.000000e+00 : f32
    %93 = vector.broadcast %cst_73 : f32 to vector<32x8xf32>
    %94 = arith.maximumf %92, %93 : vector<32x8xf32>
    %c0_74 = arith.constant 0 : index
    %c0_75 = arith.constant 0 : index
    %c0_76 = arith.constant 0 : index
    %95 = vector.load %arg5[%c0_74, %c0_75, %c0_76] : memref<9x8x16xf32, #tpu.memory_space<vmem>>, vector<1x8x16xf32>
    %96 = vector.shape_cast %95 : vector<1x8x16xf32> to vector<8x16xf32>
    %cst_77 = arith.constant dense<0.000000e+00> : vector<32x16xf32>
    %97 = tpu.matmul %94, %96, %cst_77 {dimension_numbers = #tpu.dot_dimension_numbers<[1], [0], [0], [1], [0, 0, 1, 1], [], []>} : vector<32x8xf32>, vector<8x16xf32>, vector<32x16xf32> -> vector<32x16xf32>
    %c0_78 = arith.constant 0 : index
    %c0_79 = arith.constant 0 : index
    %c0_80 = arith.constant 0 : index
    %98 = vector.load %arg8[%c0_78, %c0_79, %c0_80] : memref<9x32x32xf32, #tpu.memory_space<vmem>>, vector<1x32x32xf32>
    %99 = vector.shape_cast %98 : vector<1x32x32xf32> to vector<32x32xf32>
    %cst_81 = arith.constant dense<0.000000e+00> : vector<32x16xf32>
    %100 = tpu.matmul %99, %97, %cst_81 {dimension_numbers = #tpu.dot_dimension_numbers<[1], [0], [0], [1], [0, 0, 1, 1], [], []>} : vector<32x32xf32>, vector<32x16xf32>, vector<32x16xf32> -> vector<32x16xf32>
    %c1_82 = arith.constant 1 : index
    %c0_83 = arith.constant 0 : index
    %c0_84 = arith.constant 0 : index
    %101 = vector.load %arg5[%c1_82, %c0_83, %c0_84] : memref<9x8x16xf32, #tpu.memory_space<vmem>>, vector<1x8x16xf32>
    %102 = vector.shape_cast %101 : vector<1x8x16xf32> to vector<8x16xf32>
    %cst_85 = arith.constant dense<0.000000e+00> : vector<32x16xf32>
    %103 = tpu.matmul %94, %102, %cst_85 {dimension_numbers = #tpu.dot_dimension_numbers<[1], [0], [0], [1], [0, 0, 1, 1], [], []>} : vector<32x8xf32>, vector<8x16xf32>, vector<32x16xf32> -> vector<32x16xf32>
    %c1_86 = arith.constant 1 : index
    %c0_87 = arith.constant 0 : index
    %c0_88 = arith.constant 0 : index
    %104 = vector.load %arg8[%c1_86, %c0_87, %c0_88] : memref<9x32x32xf32, #tpu.memory_space<vmem>>, vector<1x32x32xf32>
    %105 = vector.shape_cast %104 : vector<1x32x32xf32> to vector<32x32xf32>
    %cst_89 = arith.constant dense<0.000000e+00> : vector<32x16xf32>
    %106 = tpu.matmul %105, %103, %cst_89 {dimension_numbers = #tpu.dot_dimension_numbers<[1], [0], [0], [1], [0, 0, 1, 1], [], []>} : vector<32x32xf32>, vector<32x16xf32>, vector<32x16xf32> -> vector<32x16xf32>
    %107 = arith.addf %100, %106 : vector<32x16xf32>
    %c2_90 = arith.constant 2 : index
    %c0_91 = arith.constant 0 : index
    %c0_92 = arith.constant 0 : index
    %108 = vector.load %arg5[%c2_90, %c0_91, %c0_92] : memref<9x8x16xf32, #tpu.memory_space<vmem>>, vector<1x8x16xf32>
    %109 = vector.shape_cast %108 : vector<1x8x16xf32> to vector<8x16xf32>
    %cst_93 = arith.constant dense<0.000000e+00> : vector<32x16xf32>
    %110 = tpu.matmul %94, %109, %cst_93 {dimension_numbers = #tpu.dot_dimension_numbers<[1], [0], [0], [1], [0, 0, 1, 1], [], []>} : vector<32x8xf32>, vector<8x16xf32>, vector<32x16xf32> -> vector<32x16xf32>
    %c2_94 = arith.constant 2 : index
    %c0_95 = arith.constant 0 : index
    %c0_96 = arith.constant 0 : index
    %111 = vector.load %arg8[%c2_94, %c0_95, %c0_96] : memref<9x32x32xf32, #tpu.memory_space<vmem>>, vector<1x32x32xf32>
    %112 = vector.shape_cast %111 : vector<1x32x32xf32> to vector<32x32xf32>
    %cst_97 = arith.constant dense<0.000000e+00> : vector<32x16xf32>
    %113 = tpu.matmul %112, %110, %cst_97 {dimension_numbers = #tpu.dot_dimension_numbers<[1], [0], [0], [1], [0, 0, 1, 1], [], []>} : vector<32x32xf32>, vector<32x16xf32>, vector<32x16xf32> -> vector<32x16xf32>
    %114 = arith.addf %107, %113 : vector<32x16xf32>
    %c3_98 = arith.constant 3 : index
    %c0_99 = arith.constant 0 : index
    %c0_100 = arith.constant 0 : index
    %115 = vector.load %arg5[%c3_98, %c0_99, %c0_100] : memref<9x8x16xf32, #tpu.memory_space<vmem>>, vector<1x8x16xf32>
    %116 = vector.shape_cast %115 : vector<1x8x16xf32> to vector<8x16xf32>
    %cst_101 = arith.constant dense<0.000000e+00> : vector<32x16xf32>
    %117 = tpu.matmul %94, %116, %cst_101 {dimension_numbers = #tpu.dot_dimension_numbers<[1], [0], [0], [1], [0, 0, 1, 1], [], []>} : vector<32x8xf32>, vector<8x16xf32>, vector<32x16xf32> -> vector<32x16xf32>
    %c3_102 = arith.constant 3 : index
    %c0_103 = arith.constant 0 : index
    %c0_104 = arith.constant 0 : index
    %118 = vector.load %arg8[%c3_102, %c0_103, %c0_104] : memref<9x32x32xf32, #tpu.memory_space<vmem>>, vector<1x32x32xf32>
    %119 = vector.shape_cast %118 : vector<1x32x32xf32> to vector<32x32xf32>
    %cst_105 = arith.constant dense<0.000000e+00> : vector<32x16xf32>
    %120 = tpu.matmul %119, %117, %cst_105 {dimension_numbers = #tpu.dot_dimension_numbers<[1], [0], [0], [1], [0, 0, 1, 1], [], []>} : vector<32x32xf32>, vector<32x16xf32>, vector<32x16xf32> -> vector<32x16xf32>
    %121 = arith.addf %114, %120 : vector<32x16xf32>
    %c4_106 = arith.constant 4 : index
    %c0_107 = arith.constant 0 : index
    %c0_108 = arith.constant 0 : index
    %122 = vector.load %arg5[%c4_106, %c0_107, %c0_108] : memref<9x8x16xf32, #tpu.memory_space<vmem>>, vector<1x8x16xf32>
    %123 = vector.shape_cast %122 : vector<1x8x16xf32> to vector<8x16xf32>
    %cst_109 = arith.constant dense<0.000000e+00> : vector<32x16xf32>
    %124 = tpu.matmul %94, %123, %cst_109 {dimension_numbers = #tpu.dot_dimension_numbers<[1], [0], [0], [1], [0, 0, 1, 1], [], []>} : vector<32x8xf32>, vector<8x16xf32>, vector<32x16xf32> -> vector<32x16xf32>
    %c4_110 = arith.constant 4 : index
    %c0_111 = arith.constant 0 : index
    %c0_112 = arith.constant 0 : index
    %125 = vector.load %arg8[%c4_110, %c0_111, %c0_112] : memref<9x32x32xf32, #tpu.memory_space<vmem>>, vector<1x32x32xf32>
    %126 = vector.shape_cast %125 : vector<1x32x32xf32> to vector<32x32xf32>
    %cst_113 = arith.constant dense<0.000000e+00> : vector<32x16xf32>
    %127 = tpu.matmul %126, %124, %cst_113 {dimension_numbers = #tpu.dot_dimension_numbers<[1], [0], [0], [1], [0, 0, 1, 1], [], []>} : vector<32x32xf32>, vector<32x16xf32>, vector<32x16xf32> -> vector<32x16xf32>
    %128 = arith.addf %121, %127 : vector<32x16xf32>
    %c5_114 = arith.constant 5 : index
    %c0_115 = arith.constant 0 : index
    %c0_116 = arith.constant 0 : index
    %129 = vector.load %arg5[%c5_114, %c0_115, %c0_116] : memref<9x8x16xf32, #tpu.memory_space<vmem>>, vector<1x8x16xf32>
    %130 = vector.shape_cast %129 : vector<1x8x16xf32> to vector<8x16xf32>
    %cst_117 = arith.constant dense<0.000000e+00> : vector<32x16xf32>
    %131 = tpu.matmul %94, %130, %cst_117 {dimension_numbers = #tpu.dot_dimension_numbers<[1], [0], [0], [1], [0, 0, 1, 1], [], []>} : vector<32x8xf32>, vector<8x16xf32>, vector<32x16xf32> -> vector<32x16xf32>
    %c5_118 = arith.constant 5 : index
    %c0_119 = arith.constant 0 : index
    %c0_120 = arith.constant 0 : index
    %132 = vector.load %arg8[%c5_118, %c0_119, %c0_120] : memref<9x32x32xf32, #tpu.memory_space<vmem>>, vector<1x32x32xf32>
    %133 = vector.shape_cast %132 : vector<1x32x32xf32> to vector<32x32xf32>
    %cst_121 = arith.constant dense<0.000000e+00> : vector<32x16xf32>
    %134 = tpu.matmul %133, %131, %cst_121 {dimension_numbers = #tpu.dot_dimension_numbers<[1], [0], [0], [1], [0, 0, 1, 1], [], []>} : vector<32x32xf32>, vector<32x16xf32>, vector<32x16xf32> -> vector<32x16xf32>
    %135 = arith.addf %128, %134 : vector<32x16xf32>
    %c6_122 = arith.constant 6 : index
    %c0_123 = arith.constant 0 : index
    %c0_124 = arith.constant 0 : index
    %136 = vector.load %arg5[%c6_122, %c0_123, %c0_124] : memref<9x8x16xf32, #tpu.memory_space<vmem>>, vector<1x8x16xf32>
    %137 = vector.shape_cast %136 : vector<1x8x16xf32> to vector<8x16xf32>
    %cst_125 = arith.constant dense<0.000000e+00> : vector<32x16xf32>
    %138 = tpu.matmul %94, %137, %cst_125 {dimension_numbers = #tpu.dot_dimension_numbers<[1], [0], [0], [1], [0, 0, 1, 1], [], []>} : vector<32x8xf32>, vector<8x16xf32>, vector<32x16xf32> -> vector<32x16xf32>
    %c6_126 = arith.constant 6 : index
    %c0_127 = arith.constant 0 : index
    %c0_128 = arith.constant 0 : index
    %139 = vector.load %arg8[%c6_126, %c0_127, %c0_128] : memref<9x32x32xf32, #tpu.memory_space<vmem>>, vector<1x32x32xf32>
    %140 = vector.shape_cast %139 : vector<1x32x32xf32> to vector<32x32xf32>
    %cst_129 = arith.constant dense<0.000000e+00> : vector<32x16xf32>
    %141 = tpu.matmul %140, %138, %cst_129 {dimension_numbers = #tpu.dot_dimension_numbers<[1], [0], [0], [1], [0, 0, 1, 1], [], []>} : vector<32x32xf32>, vector<32x16xf32>, vector<32x16xf32> -> vector<32x16xf32>
    %142 = arith.addf %135, %141 : vector<32x16xf32>
    %c7_130 = arith.constant 7 : index
    %c0_131 = arith.constant 0 : index
    %c0_132 = arith.constant 0 : index
    %143 = vector.load %arg5[%c7_130, %c0_131, %c0_132] : memref<9x8x16xf32, #tpu.memory_space<vmem>>, vector<1x8x16xf32>
    %144 = vector.shape_cast %143 : vector<1x8x16xf32> to vector<8x16xf32>
    %cst_133 = arith.constant dense<0.000000e+00> : vector<32x16xf32>
    %145 = tpu.matmul %94, %144, %cst_133 {dimension_numbers = #tpu.dot_dimension_numbers<[1], [0], [0], [1], [0, 0, 1, 1], [], []>} : vector<32x8xf32>, vector<8x16xf32>, vector<32x16xf32> -> vector<32x16xf32>
    %c7_134 = arith.constant 7 : index
    %c0_135 = arith.constant 0 : index
    %c0_136 = arith.constant 0 : index
    %146 = vector.load %arg8[%c7_134, %c0_135, %c0_136] : memref<9x32x32xf32, #tpu.memory_space<vmem>>, vector<1x32x32xf32>
    %147 = vector.shape_cast %146 : vector<1x32x32xf32> to vector<32x32xf32>
    %cst_137 = arith.constant dense<0.000000e+00> : vector<32x16xf32>
    %148 = tpu.matmul %147, %145, %cst_137 {dimension_numbers = #tpu.dot_dimension_numbers<[1], [0], [0], [1], [0, 0, 1, 1], [], []>} : vector<32x32xf32>, vector<32x16xf32>, vector<32x16xf32> -> vector<32x16xf32>
    %149 = arith.addf %142, %148 : vector<32x16xf32>
    %c8_138 = arith.constant 8 : index
    %c0_139 = arith.constant 0 : index
    %c0_140 = arith.constant 0 : index
    %150 = vector.load %arg5[%c8_138, %c0_139, %c0_140] : memref<9x8x16xf32, #tpu.memory_space<vmem>>, vector<1x8x16xf32>
    %151 = vector.shape_cast %150 : vector<1x8x16xf32> to vector<8x16xf32>
    %cst_141 = arith.constant dense<0.000000e+00> : vector<32x16xf32>
    %152 = tpu.matmul %94, %151, %cst_141 {dimension_numbers = #tpu.dot_dimension_numbers<[1], [0], [0], [1], [0, 0, 1, 1], [], []>} : vector<32x8xf32>, vector<8x16xf32>, vector<32x16xf32> -> vector<32x16xf32>
    %c8_142 = arith.constant 8 : index
    %c0_143 = arith.constant 0 : index
    %c0_144 = arith.constant 0 : index
    %153 = vector.load %arg8[%c8_142, %c0_143, %c0_144] : memref<9x32x32xf32, #tpu.memory_space<vmem>>, vector<1x32x32xf32>
    %154 = vector.shape_cast %153 : vector<1x32x32xf32> to vector<32x32xf32>
    %cst_145 = arith.constant dense<0.000000e+00> : vector<32x16xf32>
    %155 = tpu.matmul %154, %152, %cst_145 {dimension_numbers = #tpu.dot_dimension_numbers<[1], [0], [0], [1], [0, 0, 1, 1], [], []>} : vector<32x32xf32>, vector<32x16xf32>, vector<32x16xf32> -> vector<32x16xf32>
    %156 = arith.addf %149, %155 : vector<32x16xf32>
    %cst_146 = arith.constant dense<0.000000e+00> : vector<16xf32>
    %157 = vector.multi_reduction <add>, %156, %cst_146 [0] : vector<32x16xf32> to vector<16xf32>
    %158 = vector.shape_cast %157 : vector<16xf32> to vector<1x16xf32>
    %159 = arith.mulf %156, %156 : vector<32x16xf32>
    %cst_147 = arith.constant dense<0.000000e+00> : vector<16xf32>
    %160 = vector.multi_reduction <add>, %159, %cst_147 [0] : vector<32x16xf32> to vector<16xf32>
    %161 = vector.shape_cast %160 : vector<16xf32> to vector<1x16xf32>
    %cst_148 = arith.constant 3.125000e-02 : f32
    %162 = vector.broadcast %cst_148 : f32 to vector<1x16xf32>
    %163 = arith.mulf %158, %162 : vector<1x16xf32>
    %cst_149 = arith.constant 3.125000e-02 : f32
    %164 = vector.broadcast %cst_149 : f32 to vector<1x16xf32>
    %165 = arith.mulf %161, %164 : vector<1x16xf32>
    %166 = arith.mulf %163, %163 : vector<1x16xf32>
    %167 = arith.subf %165, %166 : vector<1x16xf32>
    %cst_150 = arith.constant 9.99999974E-6 : f32
    %168 = vector.broadcast %cst_150 : f32 to vector<1x16xf32>
    %169 = arith.addf %167, %168 : vector<1x16xf32>
    %170 = math.rsqrt %169 : vector<1x16xf32>
    %c0_151 = arith.constant 0 : index
    %c0_152 = arith.constant 0 : index
    %171 = vector.load %arg6[%c0_151, %c0_152] : memref<1x16xf32, #tpu.memory_space<vmem>>, vector<1x16xf32>
    %172 = arith.mulf %170, %171 : vector<1x16xf32>
    %c0_153 = arith.constant 0 : index
    %c0_154 = arith.constant 0 : index
    %173 = vector.load %arg7[%c0_153, %c0_154] : memref<1x16xf32, #tpu.memory_space<vmem>>, vector<1x16xf32>
    %174 = arith.mulf %163, %172 : vector<1x16xf32>
    %175 = arith.subf %173, %174 : vector<1x16xf32>
    %176 = vector.broadcast %172 : vector<1x16xf32> to vector<32x16xf32>
    %177 = arith.mulf %156, %176 : vector<32x16xf32>
    %178 = vector.broadcast %175 : vector<1x16xf32> to vector<32x16xf32>
    %179 = arith.addf %177, %178 : vector<32x16xf32>
    %180 = vector.extract_strided_slice %179 {offsets = [0, 0], sizes = [8, 16], strides = [1, 1]} : vector<32x16xf32> to vector<8x16xf32>
    %181 = vector.extract_strided_slice %179 {offsets = [8, 0], sizes = [8, 16], strides = [1, 1]} : vector<32x16xf32> to vector<8x16xf32>
    %182 = arith.maximumf %180, %181 : vector<8x16xf32>
    %183 = vector.extract_strided_slice %179 {offsets = [16, 0], sizes = [8, 16], strides = [1, 1]} : vector<32x16xf32> to vector<8x16xf32>
    %184 = vector.extract_strided_slice %179 {offsets = [24, 0], sizes = [8, 16], strides = [1, 1]} : vector<32x16xf32> to vector<8x16xf32>
    %185 = arith.maximumf %183, %184 : vector<8x16xf32>
    %186 = arith.maximumf %182, %185 : vector<8x16xf32>
    %cst_155 = arith.constant 0.000000e+00 : f32
    %187 = vector.broadcast %cst_155 : f32 to vector<8x16xf32>
    %188 = arith.maximumf %186, %187 : vector<8x16xf32>
    %c0_156 = arith.constant 0 : index
    %c0_157 = arith.constant 0 : index
    %c0_158 = arith.constant 0 : index
    %189 = vector.load %arg9[%c0_156, %c0_157, %c0_158] : memref<9x16x32xf32, #tpu.memory_space<vmem>>, vector<1x16x32xf32>
    %190 = vector.shape_cast %189 : vector<1x16x32xf32> to vector<16x32xf32>
    %cst_159 = arith.constant dense<0.000000e+00> : vector<8x32xf32>
    %191 = tpu.matmul %188, %190, %cst_159 {dimension_numbers = #tpu.dot_dimension_numbers<[1], [0], [0], [1], [0, 0, 1, 1], [], []>} : vector<8x16xf32>, vector<16x32xf32>, vector<8x32xf32> -> vector<8x32xf32>
    %c0_160 = arith.constant 0 : index
    %c0_161 = arith.constant 0 : index
    %c0_162 = arith.constant 0 : index
    %192 = vector.load %arg12[%c0_160, %c0_161, %c0_162] : memref<9x8x8xf32, #tpu.memory_space<vmem>>, vector<1x8x8xf32>
    %193 = vector.shape_cast %192 : vector<1x8x8xf32> to vector<8x8xf32>
    %cst_163 = arith.constant dense<0.000000e+00> : vector<8x32xf32>
    %194 = tpu.matmul %193, %191, %cst_163 {dimension_numbers = #tpu.dot_dimension_numbers<[1], [0], [0], [1], [0, 0, 1, 1], [], []>} : vector<8x8xf32>, vector<8x32xf32>, vector<8x32xf32> -> vector<8x32xf32>
    %c1_164 = arith.constant 1 : index
    %c0_165 = arith.constant 0 : index
    %c0_166 = arith.constant 0 : index
    %195 = vector.load %arg9[%c1_164, %c0_165, %c0_166] : memref<9x16x32xf32, #tpu.memory_space<vmem>>, vector<1x16x32xf32>
    %196 = vector.shape_cast %195 : vector<1x16x32xf32> to vector<16x32xf32>
    %cst_167 = arith.constant dense<0.000000e+00> : vector<8x32xf32>
    %197 = tpu.matmul %188, %196, %cst_167 {dimension_numbers = #tpu.dot_dimension_numbers<[1], [0], [0], [1], [0, 0, 1, 1], [], []>} : vector<8x16xf32>, vector<16x32xf32>, vector<8x32xf32> -> vector<8x32xf32>
    %c1_168 = arith.constant 1 : index
    %c0_169 = arith.constant 0 : index
    %c0_170 = arith.constant 0 : index
    %198 = vector.load %arg12[%c1_168, %c0_169, %c0_170] : memref<9x8x8xf32, #tpu.memory_space<vmem>>, vector<1x8x8xf32>
    %199 = vector.shape_cast %198 : vector<1x8x8xf32> to vector<8x8xf32>
    %cst_171 = arith.constant dense<0.000000e+00> : vector<8x32xf32>
    %200 = tpu.matmul %199, %197, %cst_171 {dimension_numbers = #tpu.dot_dimension_numbers<[1], [0], [0], [1], [0, 0, 1, 1], [], []>} : vector<8x8xf32>, vector<8x32xf32>, vector<8x32xf32> -> vector<8x32xf32>
    %201 = arith.addf %194, %200 : vector<8x32xf32>
    %c2_172 = arith.constant 2 : index
    %c0_173 = arith.constant 0 : index
    %c0_174 = arith.constant 0 : index
    %202 = vector.load %arg9[%c2_172, %c0_173, %c0_174] : memref<9x16x32xf32, #tpu.memory_space<vmem>>, vector<1x16x32xf32>
    %203 = vector.shape_cast %202 : vector<1x16x32xf32> to vector<16x32xf32>
    %cst_175 = arith.constant dense<0.000000e+00> : vector<8x32xf32>
    %204 = tpu.matmul %188, %203, %cst_175 {dimension_numbers = #tpu.dot_dimension_numbers<[1], [0], [0], [1], [0, 0, 1, 1], [], []>} : vector<8x16xf32>, vector<16x32xf32>, vector<8x32xf32> -> vector<8x32xf32>
    %c2_176 = arith.constant 2 : index
    %c0_177 = arith.constant 0 : index
    %c0_178 = arith.constant 0 : index
    %205 = vector.load %arg12[%c2_176, %c0_177, %c0_178] : memref<9x8x8xf32, #tpu.memory_space<vmem>>, vector<1x8x8xf32>
    %206 = vector.shape_cast %205 : vector<1x8x8xf32> to vector<8x8xf32>
    %cst_179 = arith.constant dense<0.000000e+00> : vector<8x32xf32>
    %207 = tpu.matmul %206, %204, %cst_179 {dimension_numbers = #tpu.dot_dimension_numbers<[1], [0], [0], [1], [0, 0, 1, 1], [], []>} : vector<8x8xf32>, vector<8x32xf32>, vector<8x32xf32> -> vector<8x32xf32>
    %208 = arith.addf %201, %207 : vector<8x32xf32>
    %c3_180 = arith.constant 3 : index
    %c0_181 = arith.constant 0 : index
    %c0_182 = arith.constant 0 : index
    %209 = vector.load %arg9[%c3_180, %c0_181, %c0_182] : memref<9x16x32xf32, #tpu.memory_space<vmem>>, vector<1x16x32xf32>
    %210 = vector.shape_cast %209 : vector<1x16x32xf32> to vector<16x32xf32>
    %cst_183 = arith.constant dense<0.000000e+00> : vector<8x32xf32>
    %211 = tpu.matmul %188, %210, %cst_183 {dimension_numbers = #tpu.dot_dimension_numbers<[1], [0], [0], [1], [0, 0, 1, 1], [], []>} : vector<8x16xf32>, vector<16x32xf32>, vector<8x32xf32> -> vector<8x32xf32>
    %c3_184 = arith.constant 3 : index
    %c0_185 = arith.constant 0 : index
    %c0_186 = arith.constant 0 : index
    %212 = vector.load %arg12[%c3_184, %c0_185, %c0_186] : memref<9x8x8xf32, #tpu.memory_space<vmem>>, vector<1x8x8xf32>
    %213 = vector.shape_cast %212 : vector<1x8x8xf32> to vector<8x8xf32>
    %cst_187 = arith.constant dense<0.000000e+00> : vector<8x32xf32>
    %214 = tpu.matmul %213, %211, %cst_187 {dimension_numbers = #tpu.dot_dimension_numbers<[1], [0], [0], [1], [0, 0, 1, 1], [], []>} : vector<8x8xf32>, vector<8x32xf32>, vector<8x32xf32> -> vector<8x32xf32>
    %215 = arith.addf %208, %214 : vector<8x32xf32>
    %c4_188 = arith.constant 4 : index
    %c0_189 = arith.constant 0 : index
    %c0_190 = arith.constant 0 : index
    %216 = vector.load %arg9[%c4_188, %c0_189, %c0_190] : memref<9x16x32xf32, #tpu.memory_space<vmem>>, vector<1x16x32xf32>
    %217 = vector.shape_cast %216 : vector<1x16x32xf32> to vector<16x32xf32>
    %cst_191 = arith.constant dense<0.000000e+00> : vector<8x32xf32>
    %218 = tpu.matmul %188, %217, %cst_191 {dimension_numbers = #tpu.dot_dimension_numbers<[1], [0], [0], [1], [0, 0, 1, 1], [], []>} : vector<8x16xf32>, vector<16x32xf32>, vector<8x32xf32> -> vector<8x32xf32>
    %c4_192 = arith.constant 4 : index
    %c0_193 = arith.constant 0 : index
    %c0_194 = arith.constant 0 : index
    %219 = vector.load %arg12[%c4_192, %c0_193, %c0_194] : memref<9x8x8xf32, #tpu.memory_space<vmem>>, vector<1x8x8xf32>
    %220 = vector.shape_cast %219 : vector<1x8x8xf32> to vector<8x8xf32>
    %cst_195 = arith.constant dense<0.000000e+00> : vector<8x32xf32>
    %221 = tpu.matmul %220, %218, %cst_195 {dimension_numbers = #tpu.dot_dimension_numbers<[1], [0], [0], [1], [0, 0, 1, 1], [], []>} : vector<8x8xf32>, vector<8x32xf32>, vector<8x32xf32> -> vector<8x32xf32>
    %222 = arith.addf %215, %221 : vector<8x32xf32>
    %c5_196 = arith.constant 5 : index
    %c0_197 = arith.constant 0 : index
    %c0_198 = arith.constant 0 : index
    %223 = vector.load %arg9[%c5_196, %c0_197, %c0_198] : memref<9x16x32xf32, #tpu.memory_space<vmem>>, vector<1x16x32xf32>
    %224 = vector.shape_cast %223 : vector<1x16x32xf32> to vector<16x32xf32>
    %cst_199 = arith.constant dense<0.000000e+00> : vector<8x32xf32>
    %225 = tpu.matmul %188, %224, %cst_199 {dimension_numbers = #tpu.dot_dimension_numbers<[1], [0], [0], [1], [0, 0, 1, 1], [], []>} : vector<8x16xf32>, vector<16x32xf32>, vector<8x32xf32> -> vector<8x32xf32>
    %c5_200 = arith.constant 5 : index
    %c0_201 = arith.constant 0 : index
    %c0_202 = arith.constant 0 : index
    %226 = vector.load %arg12[%c5_200, %c0_201, %c0_202] : memref<9x8x8xf32, #tpu.memory_space<vmem>>, vector<1x8x8xf32>
    %227 = vector.shape_cast %226 : vector<1x8x8xf32> to vector<8x8xf32>
    %cst_203 = arith.constant dense<0.000000e+00> : vector<8x32xf32>
    %228 = tpu.matmul %227, %225, %cst_203 {dimension_numbers = #tpu.dot_dimension_numbers<[1], [0], [0], [1], [0, 0, 1, 1], [], []>} : vector<8x8xf32>, vector<8x32xf32>, vector<8x32xf32> -> vector<8x32xf32>
    %229 = arith.addf %222, %228 : vector<8x32xf32>
    %c6_204 = arith.constant 6 : index
    %c0_205 = arith.constant 0 : index
    %c0_206 = arith.constant 0 : index
    %230 = vector.load %arg9[%c6_204, %c0_205, %c0_206] : memref<9x16x32xf32, #tpu.memory_space<vmem>>, vector<1x16x32xf32>
    %231 = vector.shape_cast %230 : vector<1x16x32xf32> to vector<16x32xf32>
    %cst_207 = arith.constant dense<0.000000e+00> : vector<8x32xf32>
    %232 = tpu.matmul %188, %231, %cst_207 {dimension_numbers = #tpu.dot_dimension_numbers<[1], [0], [0], [1], [0, 0, 1, 1], [], []>} : vector<8x16xf32>, vector<16x32xf32>, vector<8x32xf32> -> vector<8x32xf32>
    %c6_208 = arith.constant 6 : index
    %c0_209 = arith.constant 0 : index
    %c0_210 = arith.constant 0 : index
    %233 = vector.load %arg12[%c6_208, %c0_209, %c0_210] : memref<9x8x8xf32, #tpu.memory_space<vmem>>, vector<1x8x8xf32>
    %234 = vector.shape_cast %233 : vector<1x8x8xf32> to vector<8x8xf32>
    %cst_211 = arith.constant dense<0.000000e+00> : vector<8x32xf32>
    %235 = tpu.matmul %234, %232, %cst_211 {dimension_numbers = #tpu.dot_dimension_numbers<[1], [0], [0], [1], [0, 0, 1, 1], [], []>} : vector<8x8xf32>, vector<8x32xf32>, vector<8x32xf32> -> vector<8x32xf32>
    %236 = arith.addf %229, %235 : vector<8x32xf32>
    %c7_212 = arith.constant 7 : index
    %c0_213 = arith.constant 0 : index
    %c0_214 = arith.constant 0 : index
    %237 = vector.load %arg9[%c7_212, %c0_213, %c0_214] : memref<9x16x32xf32, #tpu.memory_space<vmem>>, vector<1x16x32xf32>
    %238 = vector.shape_cast %237 : vector<1x16x32xf32> to vector<16x32xf32>
    %cst_215 = arith.constant dense<0.000000e+00> : vector<8x32xf32>
    %239 = tpu.matmul %188, %238, %cst_215 {dimension_numbers = #tpu.dot_dimension_numbers<[1], [0], [0], [1], [0, 0, 1, 1], [], []>} : vector<8x16xf32>, vector<16x32xf32>, vector<8x32xf32> -> vector<8x32xf32>
    %c7_216 = arith.constant 7 : index
    %c0_217 = arith.constant 0 : index
    %c0_218 = arith.constant 0 : index
    %240 = vector.load %arg12[%c7_216, %c0_217, %c0_218] : memref<9x8x8xf32, #tpu.memory_space<vmem>>, vector<1x8x8xf32>
    %241 = vector.shape_cast %240 : vector<1x8x8xf32> to vector<8x8xf32>
    %cst_219 = arith.constant dense<0.000000e+00> : vector<8x32xf32>
    %242 = tpu.matmul %241, %239, %cst_219 {dimension_numbers = #tpu.dot_dimension_numbers<[1], [0], [0], [1], [0, 0, 1, 1], [], []>} : vector<8x8xf32>, vector<8x32xf32>, vector<8x32xf32> -> vector<8x32xf32>
    %243 = arith.addf %236, %242 : vector<8x32xf32>
    %c8_220 = arith.constant 8 : index
    %c0_221 = arith.constant 0 : index
    %c0_222 = arith.constant 0 : index
    %244 = vector.load %arg9[%c8_220, %c0_221, %c0_222] : memref<9x16x32xf32, #tpu.memory_space<vmem>>, vector<1x16x32xf32>
    %245 = vector.shape_cast %244 : vector<1x16x32xf32> to vector<16x32xf32>
    %cst_223 = arith.constant dense<0.000000e+00> : vector<8x32xf32>
    %246 = tpu.matmul %188, %245, %cst_223 {dimension_numbers = #tpu.dot_dimension_numbers<[1], [0], [0], [1], [0, 0, 1, 1], [], []>} : vector<8x16xf32>, vector<16x32xf32>, vector<8x32xf32> -> vector<8x32xf32>
    %c8_224 = arith.constant 8 : index
    %c0_225 = arith.constant 0 : index
    %c0_226 = arith.constant 0 : index
    %247 = vector.load %arg12[%c8_224, %c0_225, %c0_226] : memref<9x8x8xf32, #tpu.memory_space<vmem>>, vector<1x8x8xf32>
    %248 = vector.shape_cast %247 : vector<1x8x8xf32> to vector<8x8xf32>
    %cst_227 = arith.constant dense<0.000000e+00> : vector<8x32xf32>
    %249 = tpu.matmul %248, %246, %cst_227 {dimension_numbers = #tpu.dot_dimension_numbers<[1], [0], [0], [1], [0, 0, 1, 1], [], []>} : vector<8x8xf32>, vector<8x32xf32>, vector<8x32xf32> -> vector<8x32xf32>
    %250 = arith.addf %243, %249 : vector<8x32xf32>
    %cst_228 = arith.constant dense<0.000000e+00> : vector<32xf32>
    %251 = vector.multi_reduction <add>, %250, %cst_228 [0] : vector<8x32xf32> to vector<32xf32>
    %252 = vector.shape_cast %251 : vector<32xf32> to vector<1x32xf32>
    %253 = arith.mulf %250, %250 : vector<8x32xf32>
    %cst_229 = arith.constant dense<0.000000e+00> : vector<32xf32>
    %254 = vector.multi_reduction <add>, %253, %cst_229 [0] : vector<8x32xf32> to vector<32xf32>
    %255 = vector.shape_cast %254 : vector<32xf32> to vector<1x32xf32>
    %cst_230 = arith.constant 1.250000e-01 : f32
    %256 = vector.broadcast %cst_230 : f32 to vector<1x32xf32>
    %257 = arith.mulf %252, %256 : vector<1x32xf32>
    %cst_231 = arith.constant 1.250000e-01 : f32
    %258 = vector.broadcast %cst_231 : f32 to vector<1x32xf32>
    %259 = arith.mulf %255, %258 : vector<1x32xf32>
    %260 = arith.mulf %257, %257 : vector<1x32xf32>
    %261 = arith.subf %259, %260 : vector<1x32xf32>
    %cst_232 = arith.constant 9.99999974E-6 : f32
    %262 = vector.broadcast %cst_232 : f32 to vector<1x32xf32>
    %263 = arith.addf %261, %262 : vector<1x32xf32>
    %264 = math.rsqrt %263 : vector<1x32xf32>
    %c0_233 = arith.constant 0 : index
    %c0_234 = arith.constant 0 : index
    %265 = vector.load %arg10[%c0_233, %c0_234] : memref<1x32xf32, #tpu.memory_space<vmem>>, vector<1x32xf32>
    %266 = arith.mulf %264, %265 : vector<1x32xf32>
    %c0_235 = arith.constant 0 : index
    %c0_236 = arith.constant 0 : index
    %267 = vector.load %arg11[%c0_235, %c0_236] : memref<1x32xf32, #tpu.memory_space<vmem>>, vector<1x32xf32>
    %268 = arith.mulf %257, %266 : vector<1x32xf32>
    %269 = arith.subf %267, %268 : vector<1x32xf32>
    %270 = vector.broadcast %266 : vector<1x32xf32> to vector<8x32xf32>
    %271 = arith.mulf %250, %270 : vector<8x32xf32>
    %272 = vector.broadcast %269 : vector<1x32xf32> to vector<8x32xf32>
    %273 = arith.addf %271, %272 : vector<8x32xf32>
    %274 = vector.extract_strided_slice %273 {offsets = [0, 0], sizes = [2, 32], strides = [1, 1]} : vector<8x32xf32> to vector<2x32xf32>
    %275 = vector.extract_strided_slice %273 {offsets = [2, 0], sizes = [2, 32], strides = [1, 1]} : vector<8x32xf32> to vector<2x32xf32>
    %276 = arith.maximumf %274, %275 : vector<2x32xf32>
    %277 = vector.extract_strided_slice %273 {offsets = [4, 0], sizes = [2, 32], strides = [1, 1]} : vector<8x32xf32> to vector<2x32xf32>
    %278 = vector.extract_strided_slice %273 {offsets = [6, 0], sizes = [2, 32], strides = [1, 1]} : vector<8x32xf32> to vector<2x32xf32>
    %279 = arith.maximumf %277, %278 : vector<2x32xf32>
    %280 = arith.maximumf %276, %279 : vector<2x32xf32>
    %cst_237 = arith.constant 0.000000e+00 : f32
    %281 = vector.broadcast %cst_237 : f32 to vector<2x32xf32>
    %282 = arith.maximumf %280, %281 : vector<2x32xf32>
    %c0_238 = arith.constant 0 : index
    %c0_239 = arith.constant 0 : index
    %283 = vector.load %arg13[%c0_238, %c0_239] : memref<32x10xf32, #tpu.memory_space<vmem>>, vector<32x10xf32>
    %cst_240 = arith.constant dense<0.000000e+00> : vector<2x10xf32>
    %284 = tpu.matmul %282, %283, %cst_240 {dimension_numbers = #tpu.dot_dimension_numbers<[1], [0], [0], [1], [0, 0, 1, 1], [], []>} : vector<2x32xf32>, vector<32x10xf32>, vector<2x10xf32> -> vector<2x10xf32>
    %c0_241 = arith.constant 0 : index
    %c0_242 = arith.constant 0 : index
    %285 = vector.load %arg14[%c0_241, %c0_242] : memref<1x10xf32, #tpu.memory_space<vmem>>, vector<1x10xf32>
    %286 = vector.broadcast %285 : vector<1x10xf32> to vector<2x10xf32>
    %287 = arith.addf %284, %286 : vector<2x10xf32>
    %c0_243 = arith.constant 0 : index
    %c0_244 = arith.constant 0 : index
    %288 = vector.load %arg15[%c0_243, %c0_244] : memref<2x10xf32, #tpu.memory_space<vmem>>, vector<2x10xf32>
    tpu.vector_store %arg15[%c0_243, %c0_244], %287 {strides = array<i32>} : memref<2x10xf32, #tpu.memory_space<vmem>>, vector<2x10xf32>,
    return
  }
}

</mosaic_0001>

<bundles_post_ra>
// kernel: _forward_impl.1
= control target key start
LH: loop header
LB: loop body
LE: loop exit
PB: predicated region body
PF: predicated region fallthrough
CT: control target
= control target key end

     0   :  { %20 = vsyncpa [#allocation3], 0  ;;  %s10082_s0 = inlined_call_operand.vmem [shape: f32[128,8], index: 0, kind: input, shape index: {}]   ;;  %s10083_s1 = inlined_call_operand.vmem [shape: f32[9,8,8], index: 1, kind: input, shape index: {}]   ;;  %s10084_s2 = inlined_call_operand.vmem [shape: f32[1,8], index: 2, kind: input, shape index: {}]   ;;  %s10085_s3 = inlined_call_operand.vmem [shape: f32[1,8], index: 3, kind: input, shape index: {}]   ;;  %s10086_s4 = inlined_call_operand.hbm [shape: f32[9,128,128], index: 4, kind: input, shape index: {}]   ;;  %s10087_s5 = inlined_call_operand.vmem [shape: f32[9,8,16], index: 5, kind: input, shape index: {}]   ;;  %s10088_s6 = inlined_call_operand.vmem [shape: f32[1,16], index: 6, kind: input, shape index: {}]   ;;  %s10089_s7 = inlined_call_operand.vmem [shape: f32[1,16], index: 7, kind: input, shape index: {}]   ;;  %s10090_s8 = inlined_call_operand.vmem [shape: f32[9,32,32], index: 8, kind: input, shape index: {}]   ;;  %s10091_s9 = inlined_call_operand.vmem [shape: f32[9,16,32], index: 9, kind: input, shape index: {}]   ;;  %s10092_s10 = inlined_call_operand.vmem [shape: f32[1,32], index: 10, kind: input, shape index: {}]   ;;  %s10093_s11 = inlined_call_operand.vmem [shape: f32[1,32], index: 11, kind: input, shape index: {}]   ;;  %s10094_s12 = inlined_call_operand.vmem [shape: f32[9,8,8], index: 12, kind: input, shape index: {}]   ;;  %s10095_s13 = inlined_call_operand.vmem [shape: f32[32,10], index: 13, kind: input, shape index: {}]   ;;  %s10096_s14 = inlined_call_operand.vmem [shape: f32[1,10], index: 14, kind: input, shape index: {}]   ;;  %s10097_s15 = inlined_call_operand.hbm [shape: f32[2,10], index: 15, kind: output, shape index: {}]  }
   0x1   :  { %21 = vsyncpa [#allocation4], 0  ;;  %s8499_s18 = smov [#allocation2]  }
   0x2   :  { %s35_s19 = sshll.u32 %s8499_s18, 4  ;;  %s36_s19 = int_to_ptr.vmem [resolvable:$true] %s35_s19 }
   0x3   :  { %s8463_s20 = scalar_lea.vmem %s36_s19, 18432  ;;  %p8468_p1 = scmp.lt.s32.totalorder %s36_s19, %s36_s19 }
   0x4   :  { %p8464_p0 = scmp.ne.s32.totalorder %s36_s19, %s8463_s20  ;;  %p8469_p2 = scmp.lt.s32.totalorder %s8463_s20, %s8463_s20 }
   0x6   :  { %p8470_p3 = por %p8469_p2, %p8468_p1 }
   0x8   :  { %p8471_p4 = pnand %p8470_p3, %p8464_p0 }
   0xa   :  { %8474 = shalt.err (!%p8471_p4)
}
   0xb   :  { %s8500_s21 = smov 128   ;;  %s8501_s22 = smov 8  }
   0xc   :  { %41 = dma.hbm_to_vmem [thread:$0]  %s10086_s4, 18432, %s36_s19, [#allocation3], %s8500_s21, %s8500_s21, %s8501_s22  }
   0xd   :  { %8495 = dma.done.wait [#allocation3], 18432  }
   0xe   :  { %8496 = vsyncadd [#allocation3], 4294948864  ;;  %vm82_vm0 = vcmask 64512   ;;  %v81_v0 = vld [vmem:[%s10083_s1] sm:$0xff]  ;;  %v6488_v1 = vld [vmem:[%s10083_s1 + $0x8] sm:$0xff]  ;;  %vm3374_vm1 = vcmask 261120  }
   0xf   :  { %v8597_v2 = vld [vmem:[%s10082_s0] sm:$0xff]  ;;  %7388 = vmatprep.subr.mxu0 %v81_v0  ;;  %7414 = vmatprep.subr.mxu1 %v6488_v1  ;;  %v8602_v3 = vld [vmem:[%s10082_s0 + $0x8] sm:$0xff]  ;;  %v8609_v4 = vld [vmem:[%s10082_s0 + $0x10] sm:$0xff]  ;;  %vm8503_vm2 = vmmov 0   ;;  %vm4920_vm3 = vcmask 130048   ;;  %vm6455_vm4 = vcmask 74752  }
  0x10   :  { %7389 = vmatpush3.msra.mxu0 %v81_v0  ;;  %7390 = vmatprep.mubr.msk.f32.mxu0 %vm82_vm0, %v8597_v2  ;;  %v8624_v5 = vld [vmem:[%s10082_s0 + $0x18] sm:$0xff]  ;;  %v8629_v6 = vld [vmem:[%s10082_s0 + $0x20] sm:$0xff]  ;;  %v8642_v7 = vld [vmem:[%s10082_s0 + $0x28] sm:$0xff] }
  0x11   :  { %7415 = vmatpush3.msra.mxu1 %v6488_v1  ;;  %7416 = vmatprep.mubr.msk.f32.mxu1 %vm82_vm0, %v8597_v2  ;;  %v8647_v8 = vld [vmem:[%s10082_s0 + $0x30] sm:$0xff]  ;;  %v8660_v9 = vld [vmem:[%s10082_s0 + $0x38] sm:$0xff]  ;;  %v8665_v10 = vld [vmem:[%s10082_s0 + $0x40] sm:$0xff] }
  0x12   :  { %7391 = vmatmul.mubr.msk.f32.vlgmr.msra.gmra.mxu0 %vm82_vm0, %v8602_v3  ;;  %7417 = vmatmul.mubr.msk.f32.vlgmr.msra.gmra.mxu1 %vm82_vm0, %v8602_v3  ;;  %v8678_v11 = vld [vmem:[%s10082_s0 + $0x48] sm:$0xff]  ;;  %v8683_v12 = vld [vmem:[%s10082_s0 + $0x50] sm:$0xff]  ;;  %v8696_v13 = vld [vmem:[%s10082_s0 + $0x58] sm:$0xff] }
  0x13   :  { %7393 = vmatprep.mubr.msk.f32.mxu0 %vm82_vm0, %v8609_v4  ;;  %7419 = vmatprep.mubr.msk.f32.mxu1 %vm82_vm0, %v8609_v4  ;;  %v8701_v14 = vld [vmem:[%s10082_s0 + $0x60] sm:$0xff]  ;;  %v8714_v15 = vld [vmem:[%s10082_s0 + $0x68] sm:$0xff]  ;;  %v8719_v16 = vld [vmem:[%s10082_s0 + $0x70] sm:$0xff] }
  0x14   :  { %v8732_v17 = vld [vmem:[%s10082_s0 + $0x78] sm:$0xff]  ;;  %v440_v18 = vld [vmem:[#allocation2 + $0x80] sm:$0xff]  ;;  %v441_v52 = vld [vmem:[#allocation2 + $0x88] sm:$0xff] }
  0x15   :  { %v276_v19 = vld [vmem:[#allocation2] sm:$0xff]  ;;  %v277_v53 = vld [vmem:[#allocation2 + $0x8] sm:$0xff]  ;;  %v442_v54 = vld [vmem:[#allocation2 + $0x90] sm:$0xff] }
  0x16   :  { %7394 = vmatmul.mubr.msk.f32.gmra.mxu0 %vm82_vm0, %v8624_v5  ;;  %7420 = vmatmul.mubr.msk.f32.gmra.mxu1 %vm82_vm0, %v8624_v5  ;;  %v278_v55 = vld [vmem:[#allocation2 + $0x10] sm:$0xff]  ;;  %v443_v57 = vld [vmem:[#allocation2 + $0x98] sm:$0xff]  ;;  %v444_v59 = vld [vmem:[#allocation2 + $0xa0] sm:$0xff] }
  0x17   :  { %7396 = vmatprep.mubr.msk.f32.mxu0 %vm82_vm0, %v8629_v6  ;;  %7422 = vmatprep.mubr.msk.f32.mxu1 %vm82_vm0, %v8629_v6  ;;  %v6505_v56 = vld [vmem:[%s10083_s1 + $0x10] sm:$0xff]  ;;  %v279_v58 = vld [vmem:[#allocation2 + $0x18] sm:$0xff]  ;;  %v280_v60 = vld [vmem:[#allocation2 + $0x20] sm:$0xff] }
  0x18   :  { %v6522_v61 = vld [vmem:[%s10083_s1 + $0x18] sm:$0xff]  ;;  %v445_v62 = vld [vmem:[#allocation2 + $0xa8] sm:$0xff]  ;;  %v446_v0 = vld [vmem:[#allocation2 + $0xb0] sm:$0xff] }
  0x19   :  { %v281_v63 = vld [vmem:[#allocation2 + $0x28] sm:$0xff]  ;;  %v282_v1 = vld [vmem:[#allocation2 + $0x30] sm:$0xff] }
  0x1a   :  { %7397 = vmatmul.mubr.msk.f32.gmra.mxu0 %vm82_vm0, %v8642_v7  ;;  %7423 = vmatmul.mubr.msk.f32.gmra.mxu1 %vm82_vm0, %v8642_v7 }
  0x1b   :  { %7399 = vmatprep.mubr.msk.f32.mxu0 %vm82_vm0, %v8647_v8  ;;  %7425 = vmatprep.mubr.msk.f32.mxu1 %vm82_vm0, %v8647_v8 }
  0x1e   :  { %7400 = vmatmul.mubr.msk.f32.gmra.mxu0 %vm82_vm0, %v8660_v9  ;;  %7426 = vmatmul.mubr.msk.f32.gmra.mxu1 %vm82_vm0, %v8660_v9 }
  0x1f   :  { %7402 = vmatprep.mubr.msk.f32.mxu0 %vm82_vm0, %v8665_v10  ;;  %7428 = vmatprep.mubr.msk.f32.mxu1 %vm82_vm0, %v8665_v10 }
  0x22   :  { %7403 = vmatmul.mubr.msk.f32.gmra.mxu0 %vm82_vm0, %v8678_v11  ;;  %7429 = vmatmul.mubr.msk.f32.gmra.mxu1 %vm82_vm0, %v8678_v11 }
  0x23   :  { %7405 = vmatprep.mubr.msk.f32.mxu0 %vm82_vm0, %v8683_v12  ;;  %7431 = vmatprep.mubr.msk.f32.mxu1 %vm82_vm0, %v8683_v12 }
  0x26   :  { %7406 = vmatmul.mubr.msk.f32.gmra.mxu0 %vm82_vm0, %v8696_v13  ;;  %7432 = vmatmul.mubr.msk.f32.gmra.mxu1 %vm82_vm0, %v8696_v13 }
  0x27   :  { %7408 = vmatprep.mubr.msk.f32.mxu0 %vm82_vm0, %v8701_v14  ;;  %7434 = vmatprep.mubr.msk.f32.mxu1 %vm82_vm0, %v8701_v14 }
  0x2a   :  { %7409 = vmatmul.mubr.msk.f32.gmra.mxu0 %vm82_vm0, %v8714_v15  ;;  %7435 = vmatmul.mubr.msk.f32.gmra.mxu1 %vm82_vm0, %v8714_v15 }
  0x2b   :  { %7411 = vmatprep.mubr.msk.f32.mxu0 %vm82_vm0, %v8719_v16  ;;  %7437 = vmatprep.mubr.msk.f32.mxu1 %vm82_vm0, %v8719_v16 }
  0x2e   :  { %7412 = vmatmul.mubr.msk.f32.gmra.mxu0 %vm82_vm0, %v8732_v17  ;;  %7438 = vmatmul.mubr.msk.f32.gmra.mxu1 %vm82_vm0, %v8732_v17 }
  0x2f   :  { %7472 = vmatprep.mubr.f32.mxu0 %v440_v18  ;;  %7528 = vmatprep.mubr.f32.mxu1 %v276_v19  ;;  %v447_v18 = vld [vmem:[#allocation2 + $0xb8] sm:$0xff] }
  0x30   :  { %v283_v19 = vld [vmem:[#allocation2 + $0x38] sm:$0xff] }
  0xd2   :  { %v8738_v20 = vpop.f32.mrf.mxu0  ;;  %v8740_v21 = vpop.f32.mrf.mxu1 }
  0xd4   :  { %v8742_v22 = vpop.f32.mrf.mxu0  ;;  %v8744_v23 = vpop.f32.mrf.mxu1 }
  0xd6   :  { %v8746_v24 = vpop.f32.mrf.mxu0  ;;  %v8748_v25 = vpop.f32.mrf.mxu1 }
  0xd8   :  { %v8750_v26 = vpop.f32.mrf.mxu0  ;;  %v8752_v27 = vpop.f32.mrf.mxu1 }
  0xda   :  { %v8754_v28 = vpop.f32.mrf.mxu0  ;;  %v8756_v29 = vpop.f32.mrf.mxu1 }
  0xdc   :  { %v8758_v30 = vpop.f32.mrf.mxu0  ;;  %v8760_v31 = vpop.f32.mrf.mxu1 }
  0xde   :  { %v7401_v32 = vpop.f32.mrf.mxu0  ;;  %v7427_v33 = vpop.f32.mrf.mxu1 }
  0xe0   :  { %v227_v34 = vpop.f32.mrf.mxu0  ;;  %v390_v35 = vpop.f32.mrf.mxu1 }
  0xe2   :  { %v7404_v36 = vpop.f32.mrf.mxu0  ;;  %v7430_v37 = vpop.f32.mrf.mxu1 }
  0xe4   :  { %v237_v38 = vpop.f32.mrf.mxu0  ;;  %v400_v39 = vpop.f32.mrf.mxu1 }
  0xe6   :  { %v7407_v40 = vpop.f32.mrf.mxu0  ;;  %v7433_v41 = vpop.f32.mrf.mxu1 }
  0xe8   :  { %v247_v42 = vpop.f32.mrf.mxu0  ;;  %v410_v43 = vpop.f32.mrf.mxu1 }
  0xea   :  { %v7410_v44 = vpop.f32.mrf.mxu0  ;;  %v7436_v45 = vpop.f32.mrf.mxu1 }
  0xec   :  { %v257_v46 = vpop.f32.mrf.mxu0  ;;  %v420_v47 = vpop.f32.mrf.mxu1 }
  0xee   :  { %v7413_v48 = vpop.f32.mrf.mxu0  ;;  %v7439_v49 = vpop.f32.mrf.mxu1 }
  0xef   :  { %7440 = vmatprep.subr.mxu0 %v7439_v49  ;;  %7496 = vmatprep.subr.mxu1 %v7413_v48 }
  0xf0   :  { %v267_v50 = vpop.f32.mrf.mxu0  ;;  %v430_v51 = vpop.f32.mrf.mxu1  ;;  %7441 = vmatpush3.msra.mxu0 %v7439_v49  ;;  %7497 = vmatpush3.msra.mxu1 %v7413_v48 }
  0xf1   :  { %7442 = vmatprep.subr.mxu0 %v430_v51  ;;  %7498 = vmatprep.subr.mxu1 %v267_v50 }
  0xf2   :  { %7443 = vmatpush3.msra.mxu0 %v430_v51  ;;  %7499 = vmatpush3.msra.mxu1 %v267_v50 }
  0xf3   :  { %7444 = vmatprep.subr.mxu0 %v7436_v45  ;;  %7500 = vmatprep.subr.mxu1 %v7410_v44 }
  0xf4   :  { %7445 = vmatpush3.msra.mxu0 %v7436_v45  ;;  %7501 = vmatpush3.msra.mxu1 %v7410_v44 }
  0xf5   :  { %7446 = vmatprep.subr.mxu0 %v420_v47  ;;  %7502 = vmatprep.subr.mxu1 %v257_v46 }
  0xf6   :  { %7447 = vmatpush3.msra.mxu0 %v420_v47  ;;  %7503 = vmatpush3.msra.mxu1 %v257_v46 }
  0xf7   :  { %7448 = vmatprep.subr.mxu0 %v7433_v41  ;;  %7504 = vmatprep.subr.mxu1 %v7407_v40 }
  0xf8   :  { %7449 = vmatpush3.msra.mxu0 %v7433_v41  ;;  %7505 = vmatpush3.msra.mxu1 %v7407_v40  ;;  %v894_v40 = vld [vmem:[#allocation2 + $0x100] sm:$0xff] }
  0xf9   :  { %7450 = vmatprep.subr.mxu0 %v410_v43  ;;  %7506 = vmatprep.subr.mxu1 %v247_v42  ;;  %v6607_v41 = vld [vmem:[%s10083_s1 + $0x40] sm:$0xff] }
  0xfa   :  { %7451 = vmatpush3.msra.mxu0 %v410_v43  ;;  %7507 = vmatpush3.msra.mxu1 %v247_v42 }
  0xfb   :  { %7452 = vmatprep.subr.mxu0 %v7430_v37  ;;  %7508 = vmatprep.subr.mxu1 %v7404_v36 }
  0xfc   :  { %7453 = vmatpush3.msra.mxu0 %v7430_v37  ;;  %7509 = vmatpush3.msra.mxu1 %v7404_v36  ;;  %v6539_v36 = vld [vmem:[%s10083_s1 + $0x20] sm:$0xff]  ;;  %v6556_v37 = vld [vmem:[%s10083_s1 + $0x28] sm:$0xff] }
  0xfd   :  { %7454 = vmatprep.subr.mxu0 %v400_v39  ;;  %7510 = vmatprep.subr.mxu1 %v237_v38 }
  0xfe   :  { %7455 = vmatpush3.msra.mxu0 %v400_v39  ;;  %7511 = vmatpush3.msra.mxu1 %v237_v38  ;;  %v6573_v38 = vld [vmem:[%s10083_s1 + $0x30] sm:$0xff]  ;;  %v6590_v39 = vld [vmem:[%s10083_s1 + $0x38] sm:$0xff] }
  0xff   :  { %7456 = vmatprep.subr.mxu0 %v7427_v33  ;;  %7512 = vmatprep.subr.mxu1 %v7401_v32 }
 0x100   :  { %7457 = vmatpush3.msra.mxu0 %v7427_v33  ;;  %7513 = vmatpush3.msra.mxu1 %v7401_v32  ;;  %v454_v32 = vld [vmem:[#allocation2 + $0xf0] sm:$0xff] }
 0x101   :  { %7458 = vmatprep.subr.mxu0 %v390_v35  ;;  %7514 = vmatprep.subr.mxu1 %v227_v34  ;;  %v290_v33 = vld [vmem:[#allocation2 + $0x70] sm:$0xff] }
 0x102   :  { %7459 = vmatpush3.msra.mxu0 %v390_v35  ;;  %7515 = vmatpush3.msra.mxu1 %v227_v34  ;;  %v455_v34 = vld [vmem:[#allocation2 + $0xf8] sm:$0xff] }
 0x103   :  { %7460 = vmatprep.subr.mxu0 %v8756_v29  ;;  %7516 = vmatprep.subr.mxu1 %v8754_v28  ;;  %v291_v35 = vld [vmem:[#allocation2 + $0x78] sm:$0xff] }
 0x104   :  { %7461 = vmatpush3.msra.mxu0 %v8756_v29  ;;  %7517 = vmatpush3.msra.mxu1 %v8754_v28  ;;  %v452_v28 = vld [vmem:[#allocation2 + $0xe0] sm:$0xff] }
 0x105   :  { %7462 = vmatprep.subr.mxu0 %v8760_v31  ;;  %7518 = vmatprep.subr.mxu1 %v8758_v30  ;;  %v288_v29 = vld [vmem:[#allocation2 + $0x60] sm:$0xff] }
 0x106   :  { %7463 = vmatpush3.msra.mxu0 %v8760_v31  ;;  %7519 = vmatpush3.msra.mxu1 %v8758_v30  ;;  %v453_v30 = vld [vmem:[#allocation2 + $0xe8] sm:$0xff] }
 0x107   :  { %7464 = vmatprep.subr.mxu0 %v8748_v25  ;;  %7520 = vmatprep.subr.mxu1 %v8746_v24  ;;  %v289_v31 = vld [vmem:[#allocation2 + $0x68] sm:$0xff] }
 0x108   :  { %7465 = vmatpush3.msra.mxu0 %v8748_v25  ;;  %7521 = vmatpush3.msra.mxu1 %v8746_v24  ;;  %v450_v24 = vld [vmem:[#allocation2 + $0xd0] sm:$0xff] }
 0x109   :  { %7466 = vmatprep.subr.mxu0 %v8752_v27  ;;  %7522 = vmatprep.subr.mxu1 %v8750_v26  ;;  %v286_v25 = vld [vmem:[#allocation2 + $0x50] sm:$0xff] }
 0x10a   :  { %7467 = vmatpush3.msra.mxu0 %v8752_v27  ;;  %7523 = vmatpush3.msra.mxu1 %v8750_v26  ;;  %v451_v26 = vld [vmem:[#allocation2 + $0xd8] sm:$0xff] }
 0x10b   :  { %7468 = vmatprep.subr.mxu0 %v8740_v21  ;;  %7524 = vmatprep.subr.mxu1 %v8738_v20  ;;  %v287_v27 = vld [vmem:[#allocation2 + $0x58] sm:$0xff] }
 0x10c   :  { %7469 = vmatpush3.msra.mxu0 %v8740_v21  ;;  %7525 = vmatpush3.msra.mxu1 %v8738_v20  ;;  %v448_v20 = vld [vmem:[#allocation2 + $0xc0] sm:$0xff] }
 0x10d   :  { %7470 = vmatprep.subr.mxu0 %v8744_v23  ;;  %7526 = vmatprep.subr.mxu1 %v8742_v22  ;;  %v284_v21 = vld [vmem:[#allocation2 + $0x40] sm:$0xff] }
 0x10e   :  { %7471 = vmatpush3.msra.mxu0 %v8744_v23  ;;  %7527 = vmatpush3.msra.mxu1 %v8742_v22  ;;  %v449_v22 = vld [vmem:[#allocation2 + $0xc8] sm:$0xff] }
 0x10f   :  { %7473 = vmatmul.mubr.f32.vlgmr.msra.gmra.mxu0 %v441_v52  ;;  %7529 = vmatmul.mubr.f32.vlgmr.msra.gmra.mxu1 %v277_v53  ;;  %v285_v23 = vld [vmem:[#allocation2 + $0x48] sm:$0xff] }
 0x110   :  { %7475 = vmatprep.mubr.f32.mxu0 %v442_v54  ;;  %7531 = vmatprep.mubr.f32.mxu1 %v278_v55 }
 0x111   :  { %7552 = vmatprep.subr.mxu0 %v6505_v56 }
 0x112   :  { %7553 = vmatpush3.msra.mxu0 %v6505_v56 }
 0x113   :  { %7476 = vmatmul.mubr.f32.gmra.mxu0 %v443_v57  ;;  %7532 = vmatmul.mubr.f32.gmra.mxu1 %v279_v58 }
 0x114   :  { %7478 = vmatprep.mubr.f32.mxu0 %v444_v59  ;;  %7534 = vmatprep.mubr.f32.mxu1 %v280_v60 }
 0x115   :  { %7634 = vmatprep.subr.mxu0 %v6522_v61 }
 0x117   :  { %7479 = vmatmul.mubr.f32.gmra.mxu0 %v445_v62  ;;  %7535 = vmatmul.mubr.f32.gmra.mxu1 %v281_v63 }
 0x118   :  { %7481 = vmatprep.mubr.f32.mxu0 %v446_v0  ;;  %7537 = vmatprep.mubr.f32.mxu1 %v282_v1 }
 0x11b   :  { %7482 = vmatmul.mubr.f32.gmra.mxu0 %v447_v18  ;;  %7538 = vmatmul.mubr.f32.gmra.mxu1 %v283_v19 }
 0x11c   :  { %7484 = vmatprep.mubr.f32.mxu0 %v448_v20  ;;  %7540 = vmatprep.mubr.f32.mxu1 %v284_v21 }
 0x11f   :  { %7485 = vmatmul.mubr.f32.gmra.mxu0 %v449_v22  ;;  %7541 = vmatmul.mubr.f32.gmra.mxu1 %v285_v23 }
 0x120   :  { %7487 = vmatprep.mubr.f32.mxu0 %v450_v24  ;;  %7543 = vmatprep.mubr.f32.mxu1 %v286_v25 }
 0x123   :  { %7488 = vmatmul.mubr.f32.gmra.mxu0 %v451_v26  ;;  %7544 = vmatmul.mubr.f32.gmra.mxu1 %v287_v27 }
 0x124   :  { %7490 = vmatprep.mubr.f32.mxu0 %v452_v28  ;;  %7546 = vmatprep.mubr.f32.mxu1 %v288_v29 }
 0x127   :  { %7491 = vmatmul.mubr.f32.gmra.mxu0 %v453_v30  ;;  %7547 = vmatmul.mubr.f32.gmra.mxu1 %v289_v31 }
 0x128   :  { %7493 = vmatprep.mubr.f32.mxu0 %v454_v32  ;;  %7549 = vmatprep.mubr.f32.mxu1 %v290_v33 }
 0x12b   :  { %7494 = vmatmul.mubr.f32.gmra.mxu0 %v455_v34  ;;  %7550 = vmatmul.mubr.f32.gmra.mxu1 %v291_v35 }
 0x12c   :  { %7554 = vmatprep.mubr.msk.f32.mxu0 %vm82_vm0, %v8597_v2  ;;  %7610 = vmatprep.mubr.f32.mxu1 %v894_v40 }
 0x12f   :  { %7555 = vmatmul.mubr.msk.f32.vlgmr.msra.gmra.mxu0 %vm82_vm0, %v8602_v3 }
 0x130   :  { %7557 = vmatprep.mubr.msk.f32.mxu0 %vm82_vm0, %v8609_v4  ;;  %7635 = vmatpush3.msra.mxu0 %v6522_v61 }
 0x131   :  { %7716 = vmatprep.subr.mxu0 %v6539_v36 }
 0x133   :  { %7558 = vmatmul.mubr.msk.f32.gmra.mxu0 %vm82_vm0, %v8624_v5 }
 0x134   :  { %7560 = vmatprep.mubr.msk.f32.mxu0 %vm82_vm0, %v8629_v6 }
 0x137   :  { %7561 = vmatmul.mubr.msk.f32.gmra.mxu0 %vm82_vm0, %v8642_v7 }
 0x138   :  { %7563 = vmatprep.mubr.msk.f32.mxu0 %vm82_vm0, %v8647_v8 }
 0x13b   :  { %7564 = vmatmul.mubr.msk.f32.gmra.mxu0 %vm82_vm0, %v8660_v9 }
 0x13c   :  { %7566 = vmatprep.mubr.msk.f32.mxu0 %vm82_vm0, %v8665_v10 }
 0x13f   :  { %7567 = vmatmul.mubr.msk.f32.gmra.mxu0 %vm82_vm0, %v8678_v11 }
 0x140   :  { %7569 = vmatprep.mubr.msk.f32.mxu0 %vm82_vm0, %v8683_v12 }
 0x143   :  { %7570 = vmatmul.mubr.msk.f32.gmra.mxu0 %vm82_vm0, %v8696_v13 }
 0x144   :  { %7572 = vmatprep.mubr.msk.f32.mxu0 %vm82_vm0, %v8701_v14 }
 0x147   :  { %7573 = vmatmul.mubr.msk.f32.gmra.mxu0 %vm82_vm0, %v8714_v15 }
 0x148   :  { %7575 = vmatprep.mubr.msk.f32.mxu0 %vm82_vm0, %v8719_v16 }
 0x14b   :  { %7576 = vmatmul.mubr.msk.f32.gmra.mxu0 %vm82_vm0, %v8732_v17 }
 0x14c   :  { %7636 = vmatprep.mubr.msk.f32.mxu0 %vm82_vm0, %v8597_v2 }
 0x14f   :  { %7637 = vmatmul.mubr.msk.f32.vlgmr.msra.gmra.mxu0 %vm82_vm0, %v8602_v3 }
 0x150   :  { %7639 = vmatprep.mubr.msk.f32.mxu0 %vm82_vm0, %v8609_v4  ;;  %7717 = vmatpush3.msra.mxu0 %v6539_v36 }
 0x151   :  { %7798 = vmatprep.subr.mxu0 %v6556_v37 }
 0x153   :  { %7640 = vmatmul.mubr.msk.f32.gmra.mxu0 %vm82_vm0, %v8624_v5 }
 0x154   :  { %7642 = vmatprep.mubr.msk.f32.mxu0 %vm82_vm0, %v8629_v6 }
 0x157   :  { %7643 = vmatmul.mubr.msk.f32.gmra.mxu0 %vm82_vm0, %v8642_v7 }
 0x158   :  { %7645 = vmatprep.mubr.msk.f32.mxu0 %vm82_vm0, %v8647_v8 }
 0x15b   :  { %7646 = vmatmul.mubr.msk.f32.gmra.mxu0 %vm82_vm0, %v8660_v9 }
 0x15c   :  { %7648 = vmatprep.mubr.msk.f32.mxu0 %vm82_vm0, %v8665_v10 }
 0x15f   :  { %7649 = vmatmul.mubr.msk.f32.gmra.mxu0 %vm82_vm0, %v8678_v11 }
 0x160   :  { %7651 = vmatprep.mubr.msk.f32.mxu0 %vm82_vm0, %v8683_v12 }
 0x163   :  { %7652 = vmatmul.mubr.msk.f32.gmra.mxu0 %vm82_vm0, %v8696_v13 }
 0x164   :  { %7654 = vmatprep.mubr.msk.f32.mxu0 %vm82_vm0, %v8701_v14 }
 0x167   :  { %7655 = vmatmul.mubr.msk.f32.gmra.mxu0 %vm82_vm0, %v8714_v15 }
 0x168   :  { %7657 = vmatprep.mubr.msk.f32.mxu0 %vm82_vm0, %v8719_v16 }
 0x16b   :  { %7658 = vmatmul.mubr.msk.f32.gmra.mxu0 %vm82_vm0, %v8732_v17 }
 0x16c   :  { %7718 = vmatprep.mubr.msk.f32.mxu0 %vm82_vm0, %v8597_v2 }
 0x16f   :  { %7719 = vmatmul.mubr.msk.f32.vlgmr.msra.gmra.mxu0 %vm82_vm0, %v8602_v3 }
 0x170   :  { %7721 = vmatprep.mubr.msk.f32.mxu0 %vm82_vm0, %v8609_v4  ;;  %7799 = vmatpush3.msra.mxu0 %v6556_v37 }
 0x171   :  { %7880 = vmatprep.subr.mxu0 %v6573_v38 }
 0x173   :  { %7722 = vmatmul.mubr.msk.f32.gmra.mxu0 %vm82_vm0, %v8624_v5 }
 0x174   :  { %7724 = vmatprep.mubr.msk.f32.mxu0 %vm82_vm0, %v8629_v6 }
 0x177   :  { %7725 = vmatmul.mubr.msk.f32.gmra.mxu0 %vm82_vm0, %v8642_v7 }
 0x178   :  { %7727 = vmatprep.mubr.msk.f32.mxu0 %vm82_vm0, %v8647_v8 }
 0x17b   :  { %7728 = vmatmul.mubr.msk.f32.gmra.mxu0 %vm82_vm0, %v8660_v9 }
 0x17c   :  { %7730 = vmatprep.mubr.msk.f32.mxu0 %vm82_vm0, %v8665_v10 }
 0x17f   :  { %7731 = vmatmul.mubr.msk.f32.gmra.mxu0 %vm82_vm0, %v8678_v11 }
 0x180   :  { %7733 = vmatprep.mubr.msk.f32.mxu0 %vm82_vm0, %v8683_v12 }
 0x183   :  { %7734 = vmatmul.mubr.msk.f32.gmra.mxu0 %vm82_vm0, %v8696_v13 }
 0x184   :  { %7736 = vmatprep.mubr.msk.f32.mxu0 %vm82_vm0, %v8701_v14 }
 0x187   :  { %7737 = vmatmul.mubr.msk.f32.gmra.mxu0 %vm82_vm0, %v8714_v15 }
 0x188   :  { %7739 = vmatprep.mubr.msk.f32.mxu0 %vm82_vm0, %v8719_v16 }
 0x18b   :  { %7740 = vmatmul.mubr.msk.f32.gmra.mxu0 %vm82_vm0, %v8732_v17 }
 0x18c   :  { %7800 = vmatprep.mubr.msk.f32.mxu0 %vm82_vm0, %v8597_v2 }
 0x18f   :  { %7801 = vmatmul.mubr.msk.f32.vlgmr.msra.gmra.mxu0 %vm82_vm0, %v8602_v3 }
 0x190   :  { %7803 = vmatprep.mubr.msk.f32.mxu0 %vm82_vm0, %v8609_v4  ;;  %7881 = vmatpush3.msra.mxu0 %v6573_v38 }
 0x191   :  { %7962 = vmatprep.subr.mxu0 %v6590_v39 }
 0x193   :  { %7804 = vmatmul.mubr.msk.f32.gmra.mxu0 %vm82_vm0, %v8624_v5 }
 0x194   :  { %7806 = vmatprep.mubr.msk.f32.mxu0 %vm82_vm0, %v8629_v6 }
 0x197   :  { %7807 = vmatmul.mubr.msk.f32.gmra.mxu0 %vm82_vm0, %v8642_v7 }
 0x198   :  { %7809 = vmatprep.mubr.msk.f32.mxu0 %vm82_vm0, %v8647_v8 }
 0x19b   :  { %7810 = vmatmul.mubr.msk.f32.gmra.mxu0 %vm82_vm0, %v8660_v9 }
 0x19c   :  { %7812 = vmatprep.mubr.msk.f32.mxu0 %vm82_vm0, %v8665_v10 }
 0x19f   :  { %7813 = vmatmul.mubr.msk.f32.gmra.mxu0 %vm82_vm0, %v8678_v11 }
 0x1a0   :  { %7815 = vmatprep.mubr.msk.f32.mxu0 %vm82_vm0, %v8683_v12 }
 0x1a3   :  { %7816 = vmatmul.mubr.msk.f32.gmra.mxu0 %vm82_vm0, %v8696_v13 }
 0x1a4   :  { %7818 = vmatprep.mubr.msk.f32.mxu0 %vm82_vm0, %v8701_v14 }
 0x1a7   :  { %7819 = vmatmul.mubr.msk.f32.gmra.mxu0 %vm82_vm0, %v8714_v15 }
 0x1a8   :  { %7821 = vmatprep.mubr.msk.f32.mxu0 %vm82_vm0, %v8719_v16 }
 0x1ab   :  { %7822 = vmatmul.mubr.msk.f32.gmra.mxu0 %vm82_vm0, %v8732_v17 }
 0x1ac   :  { %7882 = vmatprep.mubr.msk.f32.mxu0 %vm82_vm0, %v8597_v2 }
 0x1af   :  { %7883 = vmatmul.mubr.msk.f32.vlgmr.msra.gmra.mxu0 %vm82_vm0, %v8602_v3 }
 0x1b0   :  { %7885 = vmatprep.mubr.msk.f32.mxu0 %vm82_vm0, %v8609_v4  ;;  %7963 = vmatpush3.msra.mxu0 %v6590_v39 }
 0x1b1   :  { %8044 = vmatprep.subr.mxu0 %v6607_v41 }
 0x1b3   :  { %7886 = vmatmul.mubr.msk.f32.gmra.mxu0 %vm82_vm0, %v8624_v5 }
 0x1b4   :  { %7888 = vmatprep.mubr.msk.f32.mxu0 %vm82_vm0, %v8629_v6 }
 0x1b7   :  { %7889 = vmatmul.mubr.msk.f32.gmra.mxu0 %vm82_vm0, %v8642_v7 }
 0x1b8   :  { %7891 = vmatprep.mubr.msk.f32.mxu0 %vm82_vm0, %v8647_v8 }
 0x1bb   :  { %7892 = vmatmul.mubr.msk.f32.gmra.mxu0 %vm82_vm0, %v8660_v9 }
 0x1bc   :  { %7894 = vmatprep.mubr.msk.f32.mxu0 %vm82_vm0, %v8665_v10 }
 0x1bf   :  { %7895 = vmatmul.mubr.msk.f32.gmra.mxu0 %vm82_vm0, %v8678_v11 }
 0x1c0   :  { %7897 = vmatprep.mubr.msk.f32.mxu0 %vm82_vm0, %v8683_v12 }
 0x1c3   :  { %7898 = vmatmul.mubr.msk.f32.gmra.mxu0 %vm82_vm0, %v8696_v13 }
 0x1c4   :  { %7900 = vmatprep.mubr.msk.f32.mxu0 %vm82_vm0, %v8701_v14 }
 0x1c7   :  { %7901 = vmatmul.mubr.msk.f32.gmra.mxu0 %vm82_vm0, %v8714_v15 }
 0x1c8   :  { %7903 = vmatprep.mubr.msk.f32.mxu0 %vm82_vm0, %v8719_v16 }
 0x1cb   :  { %7904 = vmatmul.mubr.msk.f32.gmra.mxu0 %vm82_vm0, %v8732_v17 }
 0x1cc   :  { %7964 = vmatprep.mubr.msk.f32.mxu0 %vm82_vm0, %v8597_v2 }
 0x1cf   :  { %v7474_v42 = vpop.f32.mrf.mxu0  ;;  %v7530_v43 = vpop.f32.mrf.mxu1  ;;  %7965 = vmatmul.mubr.msk.f32.vlgmr.msra.gmra.mxu0 %vm82_vm0, %v8602_v3 }
 0x1d0   :  { %v8971_v44 = vadd.f32 %v7530_v43, %v7474_v42  ;;  %7967 = vmatprep.mubr.msk.f32.mxu0 %vm82_vm0, %v8609_v4  ;;  %8045 = vmatpush3.msra.mxu0 %v6607_v41 }
 0x1d1   :  { %v8975_v45 = vpop.f32.mrf.mxu0  ;;  %v8977_v46 = vpop.f32.mrf.mxu1 }
 0x1d3   :  { %v7477_v47 = vpop.f32.mrf.mxu0  ;;  %v7533_v48 = vpop.f32.mrf.mxu1  ;;  %7968 = vmatmul.mubr.msk.f32.gmra.mxu0 %vm82_vm0, %v8624_v5 }
 0x1d4   :  { %v8981_v49 = vadd.f32 %v7533_v48, %v7477_v47  ;;  %7970 = vmatprep.mubr.msk.f32.mxu0 %vm82_vm0, %v8629_v6 }
 0x1d5   :  { %v8985_v50 = vpop.f32.mrf.mxu0  ;;  %v8987_v51 = vpop.f32.mrf.mxu1 }
 0x1d7   :  { %v7480_v52 = vpop.f32.mrf.mxu0  ;;  %v7536_v53 = vpop.f32.mrf.mxu1  ;;  %7971 = vmatmul.mubr.msk.f32.gmra.mxu0 %vm82_vm0, %v8642_v7 }
 0x1d8   :  { %v8991_v54 = vadd.f32 %v7536_v53, %v7480_v52  ;;  %7973 = vmatprep.mubr.msk.f32.mxu0 %vm82_vm0, %v8647_v8  ;;  %v895_v53 = vld [vmem:[#allocation2 + $0x108] sm:$0xff] }
 0x1d9   :  { %v8995_v55 = vpop.f32.mrf.mxu0  ;;  %v8997_v56 = vpop.f32.mrf.mxu1 }
 0x1db   :  { %v7483_v57 = vpop.f32.mrf.mxu0  ;;  %v7539_v58 = vpop.f32.mrf.mxu1  ;;  %7974 = vmatmul.mubr.msk.f32.gmra.mxu0 %vm82_vm0, %v8660_v9 }
 0x1dc   :  { %v9001_v59 = vadd.f32 %v7539_v58, %v7483_v57  ;;  %7976 = vmatprep.mubr.msk.f32.mxu0 %vm82_vm0, %v8665_v10  ;;  %v896_v57 = vld [vmem:[#allocation2 + $0x110] sm:$0xff] }
 0x1dd   :  { %v9005_v60 = vpop.f32.mrf.mxu0  ;;  %v9007_v61 = vpop.f32.mrf.mxu1 }
 0x1df   :  { %v7486_v62 = vpop.f32.mrf.mxu0  ;;  %v7542_v63 = vpop.f32.mrf.mxu1  ;;  %7977 = vmatmul.mubr.msk.f32.gmra.mxu0 %vm82_vm0, %v8678_v11 }
 0x1e0   :  { %v9011_v0 = vadd.f32 %v7542_v63, %v7486_v62  ;;  %7979 = vmatprep.mubr.msk.f32.mxu0 %vm82_vm0, %v8683_v12  ;;  %v897_v63 = vld [vmem:[#allocation2 + $0x118] sm:$0xff] }
 0x1e1   :  { %v9015_v1 = vpop.f32.mrf.mxu0  ;;  %v9017_v18 = vpop.f32.mrf.mxu1 }
 0x1e3   :  { %v7489_v19 = vpop.f32.mrf.mxu0  ;;  %v7545_v20 = vpop.f32.mrf.mxu1  ;;  %7980 = vmatmul.mubr.msk.f32.gmra.mxu0 %vm82_vm0, %v8696_v13 }
 0x1e4   :  { %v9021_v21 = vadd.f32 %v7545_v20, %v7489_v19  ;;  %7982 = vmatprep.mubr.msk.f32.mxu0 %vm82_vm0, %v8701_v14  ;;  %v898_v19 = vld [vmem:[#allocation2 + $0x120] sm:$0xff] }
 0x1e5   :  { %v9025_v22 = vpop.f32.mrf.mxu0  ;;  %v9027_v23 = vpop.f32.mrf.mxu1 }
 0x1e7   :  { %v7492_v24 = vpop.f32.mrf.mxu0  ;;  %v7548_v25 = vpop.f32.mrf.mxu1  ;;  %7983 = vmatmul.mubr.msk.f32.gmra.mxu0 %vm82_vm0, %v8714_v15 }
 0x1e8   :  { %v9031_v26 = vadd.f32 %v7548_v25, %v7492_v24  ;;  %7985 = vmatprep.mubr.msk.f32.mxu0 %vm82_vm0, %v8719_v16  ;;  %v899_v25 = vld [vmem:[#allocation2 + $0x128] sm:$0xff] }
 0x1e9   :  { %v9035_v27 = vpop.f32.mrf.mxu0  ;;  %v9037_v28 = vpop.f32.mrf.mxu1 }
 0x1eb   :  { %v7495_v29 = vpop.f32.mrf.mxu0  ;;  %v7551_v30 = vpop.f32.mrf.mxu1  ;;  %7986 = vmatmul.mubr.msk.f32.gmra.mxu0 %vm82_vm0, %v8732_v17 }
 0x1ec   :  { %v9041_v31 = vadd.f32 %v7551_v30, %v7495_v29  ;;  %8046 = vmatprep.mubr.msk.f32.mxu0 %vm82_vm0, %v8597_v2  ;;  %v900_v29 = vld [vmem:[#allocation2 + $0x130] sm:$0xff] }
 0x1ed   :  { %v9045_v32 = vpop.f32.mrf.mxu0 }
 0x1ef   :  { %v9047_v33 = vpop.f32.mrf.mxu0  ;;  %8047 = vmatmul.mubr.msk.f32.vlgmr.msra.gmra.mxu0 %vm82_vm0, %v8602_v3 }
 0x1f0   :  { %8049 = vmatprep.mubr.msk.f32.mxu0 %vm82_vm0, %v8609_v4 }
 0x1f1   :  { %v9053_v34 = vpop.f32.mrf.mxu0 }
 0x1f3   :  { %v7559_v35 = vpop.f32.mrf.mxu0  ;;  %8050 = vmatmul.mubr.msk.f32.gmra.mxu0 %vm82_vm0, %v8624_v5 }
 0x1f4   :  { %8052 = vmatprep.mubr.msk.f32.mxu0 %vm82_vm0, %v8629_v6 }
 0x1f5   :  { %v824_v2 = vpop.f32.mrf.mxu0 }
 0x1f7   :  { %v7562_v36 = vpop.f32.mrf.mxu0  ;;  %8053 = vmatmul.mubr.msk.f32.gmra.mxu0 %vm82_vm0, %v8642_v7 }
 0x1f8   :  { %8055 = vmatprep.mubr.msk.f32.mxu0 %vm82_vm0, %v8647_v8 }
 0x1f9   :  { %v834_v3 = vpop.f32.mrf.mxu0 }
 0x1fb   :  { %v7565_v37 = vpop.f32.mrf.mxu0  ;;  %8056 = vmatmul.mubr.msk.f32.gmra.mxu0 %vm82_vm0, %v8660_v9 }
 0x1fc   :  { %8058 = vmatprep.mubr.msk.f32.mxu0 %vm82_vm0, %v8665_v10 }
 0x1fd   :  { %v844_v4 = vpop.f32.mrf.mxu0 }
 0x1ff   :  { %v7568_v5 = vpop.f32.mrf.mxu0  ;;  %8059 = vmatmul.mubr.msk.f32.gmra.mxu0 %vm82_vm0, %v8678_v11 }
 0x200   :  { %8061 = vmatprep.mubr.msk.f32.mxu0 %vm82_vm0, %v8683_v12 }
 0x201   :  { %v854_v6 = vpop.f32.mrf.mxu0 }
 0x203   :  { %v7571_v7 = vpop.f32.mrf.mxu0  ;;  %8062 = vmatmul.mubr.msk.f32.gmra.mxu0 %vm82_vm0, %v8696_v13 }
 0x204   :  { %8064 = vmatprep.mubr.msk.f32.mxu0 %vm82_vm0, %v8701_v14 }
 0x205   :  { %v864_v8 = vpop.f32.mrf.mxu0 }
 0x207   :  { %v7574_v9 = vpop.f32.mrf.mxu0  ;;  %8065 = vmatmul.mubr.msk.f32.gmra.mxu0 %vm82_vm0, %v8714_v15 }
 0x208   :  { %8067 = vmatprep.mubr.msk.f32.mxu0 %vm82_vm0, %v8719_v16 }
 0x209   :  { %v874_v10 = vpop.f32.mrf.mxu0 }
 0x20b   :  { %v7577_v11 = vpop.f32.mrf.mxu0  ;;  %8068 = vmatmul.mubr.msk.f32.gmra.mxu0 %vm82_vm0, %v8732_v17 }
 0x20c   :  { %7578 = vmatprep.subr.mxu1 %v7577_v11 }
 0x20d   :  { %v884_v12 = vpop.f32.mrf.mxu0  ;;  %7579 = vmatpush3.msra.mxu1 %v7577_v11  ;;  %v908_v11 = vld [vmem:[#allocation2 + $0x170] sm:$0xff] }
 0x20e   :  { %7580 = vmatprep.subr.mxu1 %v884_v12 }
 0x20f   :  { %7581 = vmatpush3.msra.mxu1 %v884_v12  ;;  %v9081_v13 = vpop.f32.mrf.mxu0 }
 0x210   :  { %7582 = vmatprep.subr.mxu1 %v7574_v9 }
 0x211   :  { %7583 = vmatpush3.msra.mxu1 %v7574_v9  ;;  %v9083_v14 = vpop.f32.mrf.mxu0 }
 0x212   :  { %7584 = vmatprep.subr.mxu1 %v874_v10 }
 0x213   :  { %7585 = vmatpush3.msra.mxu1 %v874_v10  ;;  %v9085_v15 = vpop.f32.mrf.mxu0  ;;  %v907_v10 = vld [vmem:[#allocation2 + $0x168] sm:$0xff] }
 0x214   :  { %7586 = vmatprep.subr.mxu1 %v7571_v7 }
 0x215   :  { %7587 = vmatpush3.msra.mxu1 %v7571_v7  ;;  %v9087_v16 = vpop.f32.mrf.mxu0  ;;  %v906_v7 = vld [vmem:[#allocation2 + $0x160] sm:$0xff] }
 0x216   :  { %7588 = vmatprep.subr.mxu1 %v864_v8 }
 0x217   :  { %7589 = vmatpush3.msra.mxu1 %v864_v8  ;;  %v9089_v17 = vpop.f32.mrf.mxu0 }
 0x218   :  { %7590 = vmatprep.subr.mxu1 %v7568_v5 }
 0x219   :  { %7591 = vmatpush3.msra.mxu1 %v7568_v5  ;;  %v9091_v38 = vpop.f32.mrf.mxu0 }
 0x21a   :  { %7592 = vmatprep.subr.mxu1 %v854_v6 }
 0x21b   :  { %7593 = vmatpush3.msra.mxu1 %v854_v6  ;;  %v9093_v39 = vpop.f32.mrf.mxu0  ;;  %v905_v6 = vld [vmem:[#allocation2 + $0x158] sm:$0xff] }
 0x21c   :  { %7594 = vmatprep.subr.mxu1 %v7565_v37 }
 0x21d   :  { %7595 = vmatpush3.msra.mxu1 %v7565_v37  ;;  %v9095_v40 = vpop.f32.mrf.mxu0  ;;  %v904_v37 = vld [vmem:[#allocation2 + $0x150] sm:$0xff] }
 0x21e   :  { %7596 = vmatprep.subr.mxu1 %v844_v4 }
 0x21f   :  { %7597 = vmatpush3.msra.mxu1 %v844_v4  ;;  %v7650_v41 = vpop.f32.mrf.mxu0 }
 0x220   :  { %7598 = vmatprep.subr.mxu1 %v7562_v36 }
 0x221   :  { %7599 = vmatpush3.msra.mxu1 %v7562_v36  ;;  %v1179_v42 = vpop.f32.mrf.mxu0 }
 0x222   :  { %7600 = vmatprep.subr.mxu1 %v834_v3 }
 0x223   :  { %7601 = vmatpush3.msra.mxu1 %v834_v3  ;;  %v7653_v43 = vpop.f32.mrf.mxu0  ;;  %v903_v3 = vld [vmem:[#allocation2 + $0x148] sm:$0xff] }
 0x224   :  { %7602 = vmatprep.subr.mxu1 %v7559_v35 }
 0x225   :  { %7603 = vmatpush3.msra.mxu1 %v7559_v35  ;;  %v1189_v47 = vpop.f32.mrf.mxu0  ;;  %v902_v35 = vld [vmem:[#allocation2 + $0x140] sm:$0xff] }
 0x226   :  { %7604 = vmatprep.subr.mxu1 %v824_v2 }
 0x227   :  { %7605 = vmatpush3.msra.mxu1 %v824_v2  ;;  %v7656_v48 = vpop.f32.mrf.mxu0 }
 0x228   :  { %7606 = vmatprep.subr.mxu1 %v9047_v33 }
 0x229   :  { %7607 = vmatpush3.msra.mxu1 %v9047_v33  ;;  %v1199_v52 = vpop.f32.mrf.mxu0 }
 0x22a   :  { %7608 = vmatprep.subr.mxu1 %v9053_v34 }
 0x22b   :  { %7609 = vmatpush3.msra.mxu1 %v9053_v34  ;;  %v7659_v58 = vpop.f32.mrf.mxu0  ;;  %v901_v34 = vld [vmem:[#allocation2 + $0x138] sm:$0xff] }
 0x22c   :  { %7611 = vmatmul.mubr.f32.vlgmr.msra.gmra.mxu1 %v895_v53  ;;  %7660 = vmatprep.subr.mxu1 %v7659_v58  ;;  %v1224_v53 = vld [vmem:[#allocation2 + $0x1a8] sm:$0xff] }
 0x22d   :  { %v1209_v62 = vpop.f32.mrf.mxu0  ;;  %7661 = vmatpush3.msra.mxu1 %v7659_v58  ;;  %7613 = vmatprep.mubr.f32.mxu1 %v896_v57 }
 0x22e   :  { %7662 = vmatprep.subr.mxu1 %v1209_v62 }
 0x22f   :  { %7663 = vmatpush3.msra.mxu1 %v1209_v62  ;;  %v9101_v20 = vpop.f32.mrf.mxu0  ;;  %v1226_v62 = vld [vmem:[#allocation2 + $0x1b8] sm:$0xff] }
 0x230   :  { %7614 = vmatmul.mubr.f32.gmra.mxu1 %v897_v63  ;;  %7664 = vmatprep.subr.mxu1 %v7656_v48  ;;  %v1227_v63 = vld [vmem:[#allocation2 + $0x1c0] sm:$0xff] }
 0x231   :  { %7665 = vmatpush3.msra.mxu1 %v7656_v48  ;;  %v9103_v24 = vpop.f32.mrf.mxu0  ;;  %7616 = vmatprep.mubr.f32.mxu1 %v898_v19  ;;  %v1223_v48 = vld [vmem:[#allocation2 + $0x1a0] sm:$0xff] }
 0x232   :  { %7666 = vmatprep.subr.mxu1 %v1199_v52 }
 0x233   :  { %7667 = vmatpush3.msra.mxu1 %v1199_v52  ;;  %v9105_v30 = vpop.f32.mrf.mxu0 }
 0x234   :  { %7617 = vmatmul.mubr.f32.gmra.mxu1 %v899_v25  ;;  %7668 = vmatprep.subr.mxu1 %v7653_v43 }
 0x235   :  { %7669 = vmatpush3.msra.mxu1 %v7653_v43  ;;  %v9107_v33 = vpop.f32.mrf.mxu0  ;;  %7619 = vmatprep.mubr.f32.mxu1 %v900_v29  ;;  %v1228_v29 = vld [vmem:[#allocation2 + $0x1c8] sm:$0xff] }
 0x236   :  { %7670 = vmatprep.subr.mxu1 %v1189_v47 }
 0x237   :  { %7671 = vmatpush3.msra.mxu1 %v1189_v47  ;;  %v9109_v2 = vpop.f32.mrf.mxu0 }
 0x238   :  { %7620 = vmatmul.mubr.f32.gmra.mxu1 %v901_v34  ;;  %7672 = vmatprep.subr.mxu1 %v7650_v41  ;;  %v1229_v34 = vld [vmem:[#allocation2 + $0x1d0] sm:$0xff] }
 0x239   :  { %7673 = vmatpush3.msra.mxu1 %v7650_v41  ;;  %v9111_v36 = vpop.f32.mrf.mxu0  ;;  %7622 = vmatprep.mubr.f32.mxu1 %v902_v35 }
 0x23a   :  { %7674 = vmatprep.subr.mxu1 %v1179_v42 }
 0x23b   :  { %7675 = vmatpush3.msra.mxu1 %v1179_v42  ;;  %v9113_v4 = vpop.f32.mrf.mxu0  ;;  %v1220_v42 = vld [vmem:[#allocation2 + $0x188] sm:$0xff] }
 0x23c   :  { %7623 = vmatmul.mubr.f32.gmra.mxu1 %v903_v3  ;;  %7676 = vmatprep.subr.mxu1 %v9093_v39 }
 0x23d   :  { %7677 = vmatpush3.msra.mxu1 %v9093_v39  ;;  %v9117_v5 = vpop.f32.mrf.mxu0  ;;  %7625 = vmatprep.mubr.f32.mxu1 %v904_v37  ;;  %v1230_v37 = vld [vmem:[#allocation2 + $0x1d8] sm:$0xff] }
 0x23e   :  { %7678 = vmatprep.subr.mxu1 %v9095_v40 }
 0x23f   :  { %7679 = vmatpush3.msra.mxu1 %v9095_v40  ;;  %v7732_v8 = vpop.f32.mrf.mxu0  ;;  %v909_v40 = vld [vmem:[#allocation2 + $0x178] sm:$0xff] }
 0x240   :  { %7626 = vmatmul.mubr.f32.gmra.mxu1 %v905_v6  ;;  %7680 = vmatprep.subr.mxu1 %v9089_v17  ;;  %v1231_v6 = vld [vmem:[#allocation2 + $0x1e0] sm:$0xff] }
 0x241   :  { %7681 = vmatpush3.msra.mxu1 %v9089_v17  ;;  %v9123_v9 = vpop.f32.mrf.mxu0  ;;  %7628 = vmatprep.mubr.f32.mxu1 %v906_v7  ;;  %v1219_v17 = vld [vmem:[#allocation2 + $0x180] sm:$0xff] }
 0x242   :  { %7682 = vmatprep.subr.mxu1 %v9091_v38 }
 0x243   :  { %7683 = vmatpush3.msra.mxu1 %v9091_v38  ;;  %v7735_v12 = vpop.f32.mrf.mxu0 }
 0x244   :  { %7629 = vmatmul.mubr.f32.gmra.mxu1 %v907_v10  ;;  %7684 = vmatprep.subr.mxu1 %v9085_v15 }
 0x245   :  { %7685 = vmatpush3.msra.mxu1 %v9085_v15  ;;  %v1514_v39 = vpop.f32.mrf.mxu0  ;;  %7631 = vmatprep.mubr.f32.mxu1 %v908_v11  ;;  %v1221_v15 = vld [vmem:[#allocation2 + $0x190] sm:$0xff]  ;;  %v1234_v11 = vld [vmem:[#allocation2 + $0x1f8] sm:$0xff] }
 0x246   :  { %7686 = vmatprep.subr.mxu1 %v9087_v16 }
 0x247   :  { %7687 = vmatpush3.msra.mxu1 %v9087_v16  ;;  %v7738_v41 = vpop.f32.mrf.mxu0  ;;  %v1222_v16 = vld [vmem:[#allocation2 + $0x198] sm:$0xff] }
 0x248   :  { %7632 = vmatmul.mubr.f32.gmra.mxu1 %v909_v40  ;;  %7688 = vmatprep.subr.mxu1 %v9081_v13 }
 0x249   :  { %7689 = vmatpush3.msra.mxu1 %v9081_v13  ;;  %v1524_v38 = vpop.f32.mrf.mxu0  ;;  %7692 = vmatprep.mubr.f32.mxu1 %v1219_v17 }
 0x24a   :  { %7690 = vmatprep.subr.mxu1 %v9083_v14 }
 0x24b   :  { %7691 = vmatpush3.msra.mxu1 %v9083_v14  ;;  %v7741_v43 = vpop.f32.mrf.mxu0  ;;  %v1225_v14 = vld [vmem:[#allocation2 + $0x1b0] sm:$0xff] }
 0x24c   :  { %7693 = vmatmul.mubr.f32.vlgmr.msra.gmra.mxu1 %v1220_v42  ;;  %7742 = vmatprep.subr.mxu1 %v7741_v43  ;;  %v1549_v42 = vld [vmem:[#allocation2 + $0x228] sm:$0xff] }
 0x24d   :  { %v1534_v47 = vpop.f32.mrf.mxu0  ;;  %7743 = vmatpush3.msra.mxu1 %v7741_v43  ;;  %7695 = vmatprep.mubr.f32.mxu1 %v1221_v15 }
 0x24e   :  { %7744 = vmatprep.subr.mxu1 %v1534_v47 }
 0x24f   :  { %7745 = vmatpush3.msra.mxu1 %v1534_v47  ;;  %v9135_v52 = vpop.f32.mrf.mxu0  ;;  %v1551_v47 = vld [vmem:[#allocation2 + $0x238] sm:$0xff] }
 0x250   :  { %7696 = vmatmul.mubr.f32.gmra.mxu1 %v1222_v16  ;;  %7746 = vmatprep.subr.mxu1 %v7738_v41  ;;  %v1552_v16 = vld [vmem:[#allocation2 + $0x240] sm:$0xff] }
 0x251   :  { %7747 = vmatpush3.msra.mxu1 %v7738_v41  ;;  %v9137_v13 = vpop.f32.mrf.mxu0  ;;  %7698 = vmatprep.mubr.f32.mxu1 %v1223_v48  ;;  %v1548_v41 = vld [vmem:[#allocation2 + $0x220] sm:$0xff] }
 0x252   :  { %7748 = vmatprep.subr.mxu1 %v1524_v38 }
 0x253   :  { %7749 = vmatpush3.msra.mxu1 %v1524_v38  ;;  %v9139_v57 = vpop.f32.mrf.mxu0 }
 0x254   :  { %7699 = vmatmul.mubr.f32.gmra.mxu1 %v1224_v53  ;;  %7750 = vmatprep.subr.mxu1 %v7735_v12 }
 0x255   :  { %7751 = vmatpush3.msra.mxu1 %v7735_v12  ;;  %v9141_v58 = vpop.f32.mrf.mxu0  ;;  %7701 = vmatprep.mubr.f32.mxu1 %v1225_v14  ;;  %v1553_v14 = vld [vmem:[#allocation2 + $0x248] sm:$0xff] }
 0x256   :  { %7752 = vmatprep.subr.mxu1 %v1514_v39 }
 0x257   :  { %7753 = vmatpush3.msra.mxu1 %v1514_v39  ;;  %v9143_v19 = vpop.f32.mrf.mxu0  ;;  %v1545_v39 = vld [vmem:[#allocation2 + $0x208] sm:$0xff] }
 0x258   :  { %7702 = vmatmul.mubr.f32.gmra.mxu1 %v1226_v62  ;;  %7754 = vmatprep.subr.mxu1 %v7732_v8  ;;  %v1554_v62 = vld [vmem:[#allocation2 + $0x250] sm:$0xff] }
 0x259   :  { %7755 = vmatpush3.msra.mxu1 %v7732_v8  ;;  %v9145_v25 = vpop.f32.mrf.mxu0  ;;  %7704 = vmatprep.mubr.f32.mxu1 %v1227_v63 }
 0x25a   :  { %7756 = vmatprep.subr.mxu1 %v9123_v9 }
 0x25b   :  { %7757 = vmatpush3.msra.mxu1 %v9123_v9  ;;  %v9149_v35 = vpop.f32.mrf.mxu0  ;;  %v1232_v9 = vld [vmem:[#allocation2 + $0x1e8] sm:$0xff] }
 0x25c   :  { %7705 = vmatmul.mubr.f32.gmra.mxu1 %v1228_v29  ;;  %7758 = vmatprep.subr.mxu1 %v9113_v4 }
 0x25d   :  { %7759 = vmatpush3.msra.mxu1 %v9113_v4  ;;  %v9153_v3 = vpop.f32.mrf.mxu0  ;;  %7707 = vmatprep.mubr.f32.mxu1 %v1229_v34  ;;  %v1233_v4 = vld [vmem:[#allocation2 + $0x1f0] sm:$0xff]  ;;  %v1555_v34 = vld [vmem:[#allocation2 + $0x258] sm:$0xff] }
 0x25e   :  { %7760 = vmatprep.subr.mxu1 %v9117_v5 }
 0x25f   :  { %7761 = vmatpush3.msra.mxu1 %v9117_v5  ;;  %v7814_v7 = vpop.f32.mrf.mxu0 }
 0x260   :  { %7708 = vmatmul.mubr.f32.gmra.mxu1 %v1230_v37  ;;  %7762 = vmatprep.subr.mxu1 %v9109_v2  ;;  %v1556_v37 = vld [vmem:[#allocation2 + $0x260] sm:$0xff] }
 0x261   :  { %7763 = vmatpush3.msra.mxu1 %v9109_v2  ;;  %v9159_v8 = vpop.f32.mrf.mxu0  ;;  %7710 = vmatprep.mubr.f32.mxu1 %v1231_v6  ;;  %v1544_v2 = vld [vmem:[#allocation2 + $0x200] sm:$0xff] }
 0x262   :  { %7764 = vmatprep.subr.mxu1 %v9111_v36 }
 0x263   :  { %7765 = vmatpush3.msra.mxu1 %v9111_v36  ;;  %v7817_v10 = vpop.f32.mrf.mxu0 }
 0x264   :  { %7711 = vmatmul.mubr.f32.gmra.mxu1 %v1232_v9  ;;  %7766 = vmatprep.subr.mxu1 %v9105_v30 }
 0x265   :  { %7767 = vmatpush3.msra.mxu1 %v9105_v30  ;;  %v1839_v5 = vpop.f32.mrf.mxu0  ;;  %7713 = vmatprep.mubr.f32.mxu1 %v1233_v4  ;;  %v1546_v30 = vld [vmem:[#allocation2 + $0x210] sm:$0xff]  ;;  %v1559_v4 = vld [vmem:[#allocation2 + $0x278] sm:$0xff] }
 0x266   :  { %7768 = vmatprep.subr.mxu1 %v9107_v33 }
 0x267   :  { %7769 = vmatpush3.msra.mxu1 %v9107_v33  ;;  %v7820_v12 = vpop.f32.mrf.mxu0  ;;  %v1547_v33 = vld [vmem:[#allocation2 + $0x218] sm:$0xff] }
 0x268   :  { %7714 = vmatmul.mubr.f32.gmra.mxu1 %v1234_v11  ;;  %7770 = vmatprep.subr.mxu1 %v9101_v20 }
 0x269   :  { %7771 = vmatpush3.msra.mxu1 %v9101_v20  ;;  %v1849_v36 = vpop.f32.mrf.mxu0  ;;  %7774 = vmatprep.mubr.f32.mxu1 %v1544_v2 }
 0x26a   :  { %7772 = vmatprep.subr.mxu1 %v9103_v24 }
 0x26b   :  { %7773 = vmatpush3.msra.mxu1 %v9103_v24  ;;  %v7823_v40 = vpop.f32.mrf.mxu0  ;;  %v1550_v24 = vld [vmem:[#allocation2 + $0x230] sm:$0xff] }
 0x26c   :  { %7775 = vmatmul.mubr.f32.vlgmr.msra.gmra.mxu1 %v1545_v39  ;;  %7824 = vmatprep.subr.mxu1 %v7823_v40  ;;  %v1874_v39 = vld [vmem:[#allocation2 + $0x2a8] sm:$0xff] }
 0x26d   :  { %v1859_v17 = vpop.f32.mrf.mxu0  ;;  %7825 = vmatpush3.msra.mxu1 %v7823_v40  ;;  %7777 = vmatprep.mubr.f32.mxu1 %v1546_v30 }
 0x26e   :  { %7826 = vmatprep.subr.mxu1 %v1859_v17 }
 0x26f   :  { %7827 = vmatpush3.msra.mxu1 %v1859_v17  ;;  %v9171_v38 = vpop.f32.mrf.mxu0  ;;  %v1876_v17 = vld [vmem:[#allocation2 + $0x2b8] sm:$0xff] }
 0x270   :  { %7778 = vmatmul.mubr.f32.gmra.mxu1 %v1547_v33  ;;  %7828 = vmatprep.subr.mxu1 %v7820_v12  ;;  %v1877_v33 = vld [vmem:[#allocation2 + $0x2c0] sm:$0xff] }
 0x271   :  { %7829 = vmatpush3.msra.mxu1 %v7820_v12  ;;  %v9173_v20 = vpop.f32.mrf.mxu0  ;;  %7780 = vmatprep.mubr.f32.mxu1 %v1548_v41  ;;  %v1873_v12 = vld [vmem:[#allocation2 + $0x2a0] sm:$0xff] }
 0x272   :  { %7830 = vmatprep.subr.mxu1 %v1849_v36 }
 0x273   :  { %7831 = vmatpush3.msra.mxu1 %v1849_v36  ;;  %v9175_v15 = vpop.f32.mrf.mxu0 }
 0x274   :  { %7781 = vmatmul.mubr.f32.gmra.mxu1 %v1549_v42  ;;  %7832 = vmatprep.subr.mxu1 %v7817_v10 }
 0x275   :  { %7833 = vmatpush3.msra.mxu1 %v7817_v10  ;;  %v9177_v43 = vpop.f32.mrf.mxu0  ;;  %7783 = vmatprep.mubr.f32.mxu1 %v1550_v24  ;;  %v1878_v24 = vld [vmem:[#allocation2 + $0x2c8] sm:$0xff] }
 0x276   :  { %7834 = vmatprep.subr.mxu1 %v1839_v5 }
 0x277   :  { %7835 = vmatpush3.msra.mxu1 %v1839_v5  ;;  %v9179_v48 = vpop.f32.mrf.mxu0  ;;  %v1870_v5 = vld [vmem:[#allocation2 + $0x288] sm:$0xff] }
 0x278   :  { %7784 = vmatmul.mubr.f32.gmra.mxu1 %v1551_v47  ;;  %7836 = vmatprep.subr.mxu1 %v7814_v7  ;;  %v1879_v47 = vld [vmem:[#allocation2 + $0x2d0] sm:$0xff] }
 0x279   :  { %7837 = vmatpush3.msra.mxu1 %v7814_v7  ;;  %v9181_v53 = vpop.f32.mrf.mxu0  ;;  %7786 = vmatprep.mubr.f32.mxu1 %v1552_v16 }
 0x27a   :  { %7838 = vmatprep.subr.mxu1 %v9159_v8 }
 0x27b   :  { %7839 = vmatpush3.msra.mxu1 %v9159_v8  ;;  %v9185_v63 = vpop.f32.mrf.mxu0  ;;  %v1557_v8 = vld [vmem:[#allocation2 + $0x268] sm:$0xff] }
 0x27c   :  { %7787 = vmatmul.mubr.f32.gmra.mxu1 %v1553_v14  ;;  %7840 = vmatprep.subr.mxu1 %v9149_v35 }
 0x27d   :  { %7841 = vmatpush3.msra.mxu1 %v9149_v35  ;;  %v9189_v29 = vpop.f32.mrf.mxu0  ;;  %7789 = vmatprep.mubr.f32.mxu1 %v1554_v62  ;;  %v1558_v35 = vld [vmem:[#allocation2 + $0x270] sm:$0xff]  ;;  %v1880_v62 = vld [vmem:[#allocation2 + $0x2d8] sm:$0xff] }
 0x27e   :  { %7842 = vmatprep.subr.mxu1 %v9153_v3 }
 0x27f   :  { %7843 = vmatpush3.msra.mxu1 %v9153_v3  ;;  %v7896_v6 = vpop.f32.mrf.mxu0 }
 0x280   :  { %7790 = vmatmul.mubr.f32.gmra.mxu1 %v1555_v34  ;;  %7844 = vmatprep.subr.mxu1 %v9143_v19  ;;  %v1881_v34 = vld [vmem:[#allocation2 + $0x2e0] sm:$0xff] }
 0x281   :  { %7845 = vmatpush3.msra.mxu1 %v9143_v19  ;;  %v9195_v7 = vpop.f32.mrf.mxu0  ;;  %7792 = vmatprep.mubr.f32.mxu1 %v1556_v37  ;;  %v1869_v19 = vld [vmem:[#allocation2 + $0x280] sm:$0xff] }
 0x282   :  { %7846 = vmatprep.subr.mxu1 %v9145_v25 }
 0x283   :  { %7847 = vmatpush3.msra.mxu1 %v9145_v25  ;;  %v7899_v9 = vpop.f32.mrf.mxu0 }
 0x284   :  { %7793 = vmatmul.mubr.f32.gmra.mxu1 %v1557_v8  ;;  %7848 = vmatprep.subr.mxu1 %v9139_v57 }
 0x285   :  { %7849 = vmatpush3.msra.mxu1 %v9139_v57  ;;  %v2164_v3 = vpop.f32.mrf.mxu0  ;;  %7795 = vmatprep.mubr.f32.mxu1 %v1558_v35  ;;  %v1871_v57 = vld [vmem:[#allocation2 + $0x290] sm:$0xff]  ;;  %v1884_v35 = vld [vmem:[#allocation2 + $0x2f8] sm:$0xff] }
 0x286   :  { %7850 = vmatprep.subr.mxu1 %v9141_v58 }
 0x287   :  { %7851 = vmatpush3.msra.mxu1 %v9141_v58  ;;  %v7902_v10 = vpop.f32.mrf.mxu0  ;;  %v1872_v58 = vld [vmem:[#allocation2 + $0x298] sm:$0xff] }
 0x288   :  { %7796 = vmatmul.mubr.f32.gmra.mxu1 %v1559_v4  ;;  %7852 = vmatprep.subr.mxu1 %v9135_v52 }
 0x289   :  { %7853 = vmatpush3.msra.mxu1 %v9135_v52  ;;  %v2174_v25 = vpop.f32.mrf.mxu0  ;;  %7856 = vmatprep.mubr.f32.mxu1 %v1869_v19 }
 0x28a   :  { %7854 = vmatprep.subr.mxu1 %v9137_v13 }
 0x28b   :  { %7855 = vmatpush3.msra.mxu1 %v9137_v13  ;;  %v7905_v11 = vpop.f32.mrf.mxu0  ;;  %v1875_v13 = vld [vmem:[#allocation2 + $0x2b0] sm:$0xff] }
 0x28c   :  { %7857 = vmatmul.mubr.f32.vlgmr.msra.gmra.mxu1 %v1870_v5  ;;  %7906 = vmatprep.subr.mxu1 %v7905_v11  ;;  %v2199_v5 = vld [vmem:[#allocation2 + $0x328] sm:$0xff] }
 0x28d   :  { %v2184_v2 = vpop.f32.mrf.mxu0  ;;  %7907 = vmatpush3.msra.mxu1 %v7905_v11  ;;  %7859 = vmatprep.mubr.f32.mxu1 %v1871_v57 }
 0x28e   :  { %7908 = vmatprep.subr.mxu1 %v2184_v2 }
 0x28f   :  { %7909 = vmatpush3.msra.mxu1 %v2184_v2  ;;  %v9207_v36 = vpop.f32.mrf.mxu0  ;;  %v2201_v2 = vld [vmem:[#allocation2 + $0x338] sm:$0xff] }
 0x290   :  { %7860 = vmatmul.mubr.f32.gmra.mxu1 %v1872_v58  ;;  %7910 = vmatprep.subr.mxu1 %v7902_v10  ;;  %v2202_v58 = vld [vmem:[#allocation2 + $0x340] sm:$0xff] }
 0x291   :  { %7911 = vmatpush3.msra.mxu1 %v7902_v10  ;;  %v9209_v52 = vpop.f32.mrf.mxu0  ;;  %7862 = vmatprep.mubr.f32.mxu1 %v1873_v12  ;;  %v2198_v10 = vld [vmem:[#allocation2 + $0x320] sm:$0xff] }
 0x292   :  { %7912 = vmatprep.subr.mxu1 %v2174_v25 }
 0x293   :  { %7913 = vmatpush3.msra.mxu1 %v2174_v25  ;;  %v9211_v30 = vpop.f32.mrf.mxu0 }
 0x294   :  { %7863 = vmatmul.mubr.f32.gmra.mxu1 %v1874_v39  ;;  %7914 = vmatprep.subr.mxu1 %v7899_v9 }
 0x295   :  { %7915 = vmatpush3.msra.mxu1 %v7899_v9  ;;  %v9213_v40 = vpop.f32.mrf.mxu0  ;;  %7865 = vmatprep.mubr.f32.mxu1 %v1875_v13  ;;  %v2203_v13 = vld [vmem:[#allocation2 + $0x348] sm:$0xff] }
 0x296   :  { %7916 = vmatprep.subr.mxu1 %v2164_v3 }
 0x297   :  { %7917 = vmatpush3.msra.mxu1 %v2164_v3  ;;  %v9215_v41 = vpop.f32.mrf.mxu0  ;;  %v2195_v3 = vld [vmem:[#allocation2 + $0x308] sm:$0xff] }
 0x298   :  { %7866 = vmatmul.mubr.f32.gmra.mxu1 %v1876_v17  ;;  %7918 = vmatprep.subr.mxu1 %v7896_v6  ;;  %v2204_v17 = vld [vmem:[#allocation2 + $0x350] sm:$0xff] }
 0x299   :  { %7919 = vmatpush3.msra.mxu1 %v7896_v6  ;;  %v9217_v42 = vpop.f32.mrf.mxu0  ;;  %7868 = vmatprep.mubr.f32.mxu1 %v1877_v33 }
 0x29a   :  { %7920 = vmatprep.subr.mxu1 %v9195_v7 }
 0x29b   :  { %7921 = vmatpush3.msra.mxu1 %v9195_v7  ;;  %v9221_v16 = vpop.f32.mrf.mxu0  ;;  %v1882_v7 = vld [vmem:[#allocation2 + $0x2e8] sm:$0xff] }
 0x29c   :  { %7869 = vmatmul.mubr.f32.gmra.mxu1 %v1878_v24  ;;  %7922 = vmatprep.subr.mxu1 %v9185_v63 }
 0x29d   :  { %7923 = vmatpush3.msra.mxu1 %v9185_v63  ;;  %v9225_v14 = vpop.f32.mrf.mxu0  ;;  %7871 = vmatprep.mubr.f32.mxu1 %v1879_v47  ;;  %v1883_v63 = vld [vmem:[#allocation2 + $0x2f0] sm:$0xff]  ;;  %v2205_v47 = vld [vmem:[#allocation2 + $0x358] sm:$0xff] }
 0x29e   :  { %7924 = vmatprep.subr.mxu1 %v9189_v29 }
 0x29f   :  { %7925 = vmatpush3.msra.mxu1 %v9189_v29  ;;  %v7978_v37 = vpop.f32.mrf.mxu0 }
 0x2a0   :  { %7872 = vmatmul.mubr.f32.gmra.mxu1 %v1880_v62  ;;  %7926 = vmatprep.subr.mxu1 %v9179_v48  ;;  %v2206_v62 = vld [vmem:[#allocation2 + $0x360] sm:$0xff] }
 0x2a1   :  { %7927 = vmatpush3.msra.mxu1 %v9179_v48  ;;  %v9231_v6 = vpop.f32.mrf.mxu0  ;;  %7874 = vmatprep.mubr.f32.mxu1 %v1881_v34  ;;  %v2194_v48 = vld [vmem:[#allocation2 + $0x300] sm:$0xff] }
 0x2a2   :  { %7928 = vmatprep.subr.mxu1 %v9181_v53 }
 0x2a3   :  { %7929 = vmatpush3.msra.mxu1 %v9181_v53  ;;  %v7981_v8 = vpop.f32.mrf.mxu0 }
 0x2a4   :  { %7875 = vmatmul.mubr.f32.gmra.mxu1 %v1882_v7  ;;  %7930 = vmatprep.subr.mxu1 %v9175_v15 }
 0x2a5   :  { %7931 = vmatpush3.msra.mxu1 %v9175_v15  ;;  %v2489_v29 = vpop.f32.mrf.mxu0  ;;  %7877 = vmatprep.mubr.f32.mxu1 %v1883_v63  ;;  %v2196_v15 = vld [vmem:[#allocation2 + $0x310] sm:$0xff]  ;;  %v2209_v63 = vld [vmem:[#allocation2 + $0x378] sm:$0xff] }
 0x2a6   :  { %7932 = vmatprep.subr.mxu1 %v9177_v43 }
 0x2a7   :  { %7933 = vmatpush3.msra.mxu1 %v9177_v43  ;;  %v7984_v9 = vpop.f32.mrf.mxu0  ;;  %v2197_v43 = vld [vmem:[#allocation2 + $0x318] sm:$0xff] }
 0x2a8   :  { %7878 = vmatmul.mubr.f32.gmra.mxu1 %v1884_v35  ;;  %7934 = vmatprep.subr.mxu1 %v9171_v38 }
 0x2a9   :  { %7935 = vmatpush3.msra.mxu1 %v9171_v38  ;;  %v2499_v53 = vpop.f32.mrf.mxu0  ;;  %7938 = vmatprep.mubr.f32.mxu1 %v2194_v48 }
 0x2aa   :  { %7936 = vmatprep.subr.mxu1 %v9173_v20 }
 0x2ab   :  { %7937 = vmatpush3.msra.mxu1 %v9173_v20  ;;  %v7987_v4 = vpop.f32.mrf.mxu0  ;;  %v2200_v20 = vld [vmem:[#allocation2 + $0x330] sm:$0xff] }
 0x2ac   :  { %7939 = vmatmul.mubr.f32.vlgmr.msra.gmra.mxu1 %v2195_v3  ;;  %7988 = vmatprep.subr.mxu1 %v7987_v4  ;;  %v2527_v3 = vld [vmem:[#allocation2 + $0x3c0] sm:$0xff] }
 0x2ad   :  { %v2509_v19 = vpop.f32.mrf.mxu0  ;;  %7989 = vmatpush3.msra.mxu1 %v7987_v4  ;;  %7941 = vmatprep.mubr.f32.mxu1 %v2196_v15  ;;  %v2528_v15 = vld [vmem:[#allocation2 + $0x3c8] sm:$0xff]  ;;  %v2529_v4 = vld [vmem:[#allocation2 + $0x3d0] sm:$0xff] }
 0x2ae   :  { %7990 = vmatprep.subr.mxu1 %v2509_v19 }
 0x2af   :  { %7991 = vmatpush3.msra.mxu1 %v2509_v19  ;;  %v9243_v25 = vpop.f32.mrf.mxu0  ;;  %v2530_v19 = vld [vmem:[#allocation2 + $0x3d8] sm:$0xff] }
 0x2b0   :  { %7942 = vmatmul.mubr.f32.gmra.mxu1 %v2197_v43  ;;  %7992 = vmatprep.subr.mxu1 %v7984_v9  ;;  %v2531_v43 = vld [vmem:[#allocation2 + $0x3e0] sm:$0xff] }
 0x2b1   :  { %7993 = vmatpush3.msra.mxu1 %v7984_v9  ;;  %v9245_v38 = vpop.f32.mrf.mxu0  ;;  %7944 = vmatprep.mubr.f32.mxu1 %v2198_v10  ;;  %v2523_v9 = vld [vmem:[#allocation2 + $0x3a0] sm:$0xff]  ;;  %v2532_v10 = vld [vmem:[#allocation2 + $0x3e8] sm:$0xff] }
 0x2b2   :  { %7994 = vmatprep.subr.mxu1 %v2499_v53 }
 0x2b3   :  { %7995 = vmatpush3.msra.mxu1 %v2499_v53  ;;  %v9247_v57 = vpop.f32.mrf.mxu0  ;;  %v2525_v53 = vld [vmem:[#allocation2 + $0x3b0] sm:$0xff] }
 0x2b4   :  { %7945 = vmatmul.mubr.f32.gmra.mxu1 %v2199_v5  ;;  %7996 = vmatprep.subr.mxu1 %v7981_v8  ;;  %v2533_v5 = vld [vmem:[#allocation2 + $0x3f0] sm:$0xff] }
 0x2b5   :  { %7997 = vmatpush3.msra.mxu1 %v7981_v8  ;;  %v9249_v11 = vpop.f32.mrf.mxu0  ;;  %7947 = vmatprep.mubr.f32.mxu1 %v2200_v20  ;;  %v2534_v20 = vld [vmem:[#allocation2 + $0x3f8] sm:$0xff] }
 0x2b6   :  { %7998 = vmatprep.subr.mxu1 %v2489_v29 }
 0x2b7   :  { %7999 = vmatpush3.msra.mxu1 %v2489_v29  ;;  %v9251_v12 = vpop.f32.mrf.mxu0  ;;  %v2520_v29 = vld [vmem:[#allocation2 + $0x388] sm:$0xff] }
 0x2b8   :  { %7948 = vmatmul.mubr.f32.gmra.mxu1 %v2201_v2  ;;  %8000 = vmatprep.subr.mxu1 %v7978_v37  ;;  %v2844_v2 = vld [vmem:[#allocation2 + $0x400] sm:$0xff] }
 0x2b9   :  { %8001 = vmatpush3.msra.mxu1 %v7978_v37  ;;  %v9253_v39 = vpop.f32.mrf.mxu0  ;;  %7950 = vmatprep.mubr.f32.mxu1 %v2202_v58  ;;  %v2845_v58 = vld [vmem:[#allocation2 + $0x408] sm:$0xff] }
 0x2ba   :  { %8002 = vmatprep.subr.mxu1 %v9231_v6 }
 0x2bb   :  { %8003 = vmatpush3.msra.mxu1 %v9231_v6  ;;  %v9257_v33 = vpop.f32.mrf.mxu0  ;;  %v2207_v6 = vld [vmem:[#allocation2 + $0x368] sm:$0xff] }
 0x2bc   :  { %7951 = vmatmul.mubr.f32.gmra.mxu1 %v2203_v13  ;;  %8004 = vmatprep.subr.mxu1 %v9221_v16 }
 0x2bd   :  { %8005 = vmatpush3.msra.mxu1 %v9221_v16  ;;  %v9261_v24 = vpop.f32.mrf.mxu0  ;;  %7953 = vmatprep.mubr.f32.mxu1 %v2204_v17  ;;  %v2208_v16 = vld [vmem:[#allocation2 + $0x370] sm:$0xff] }
 0x2be   :  { %8006 = vmatprep.subr.mxu1 %v9225_v14 }
 0x2bf   :  { %8007 = vmatpush3.msra.mxu1 %v9225_v14  ;;  %v8060_v34 = vpop.f32.mrf.mxu0 }
 0x2c0   :  { %7954 = vmatmul.mubr.f32.gmra.mxu1 %v2205_v47  ;;  %8008 = vmatprep.subr.mxu1 %v9215_v41  ;;  %v2849_v47 = vld [vmem:[#allocation2 + $0x428] sm:$0xff] }
 0x2c1   :  { %8009 = vmatpush3.msra.mxu1 %v9215_v41  ;;  %v2804_v37 = vpop.f32.mrf.mxu0  ;;  %7956 = vmatprep.mubr.f32.mxu1 %v2206_v62  ;;  %v2519_v41 = vld [vmem:[#allocation2 + $0x380] sm:$0xff] }
 0x2c2   :  { %8010 = vmatprep.subr.mxu1 %v9217_v42 }
 0x2c3   :  { %8011 = vmatpush3.msra.mxu1 %v9217_v42  ;;  %v8063_v7 = vpop.f32.mrf.mxu0 }
 0x2c4   :  { %7957 = vmatmul.mubr.f32.gmra.mxu1 %v2207_v6  ;;  %8012 = vmatprep.subr.mxu1 %v9211_v30 }
 0x2c5   :  { %8013 = vmatpush3.msra.mxu1 %v9211_v30  ;;  %v2814_v14 = vpop.f32.mrf.mxu0  ;;  %7959 = vmatprep.mubr.f32.mxu1 %v2208_v16  ;;  %v2521_v30 = vld [vmem:[#allocation2 + $0x390] sm:$0xff]  ;;  %v2852_v16 = vld [vmem:[#allocation2 + $0x440] sm:$0xff] }
 0x2c6   :  { %8014 = vmatprep.subr.mxu1 %v9213_v40 }
 0x2c7   :  { %8015 = vmatpush3.msra.mxu1 %v9213_v40  ;;  %v8066_v8 = vpop.f32.mrf.mxu0  ;;  %v2522_v40 = vld [vmem:[#allocation2 + $0x398] sm:$0xff] }
 0x2c8   :  { %7960 = vmatmul.mubr.f32.gmra.mxu1 %v2209_v63  ;;  %8016 = vmatprep.subr.mxu1 %v9207_v36 }
 0x2c9   :  { %8017 = vmatpush3.msra.mxu1 %v9207_v36  ;;  %v2824_v42 = vpop.f32.mrf.mxu0  ;;  %8020 = vmatprep.mubr.f32.mxu1 %v2519_v41  ;;  %v2524_v36 = vld [vmem:[#allocation2 + $0x3a8] sm:$0xff]  ;;  %v2854_v41 = vld [vmem:[#allocation2 + $0x450] sm:$0xff] }
 0x2ca   :  { %8018 = vmatprep.subr.mxu1 %v9209_v52 }
 0x2cb   :  { %8019 = vmatpush3.msra.mxu1 %v9209_v52  ;;  %v8069_v35 = vpop.f32.mrf.mxu0  ;;  %v2526_v52 = vld [vmem:[#allocation2 + $0x3b8] sm:$0xff] }
 0x2cc   :  { %8021 = vmatmul.mubr.f32.vlgmr.msra.gmra.mxu1 %v2520_v29  ;;  %8070 = vmatprep.subr.mxu1 %v8069_v35 }
 0x2cd   :  { %v2834_v48 = vpop.f32.mrf.mxu0  ;;  %8071 = vmatpush3.msra.mxu1 %v8069_v35  ;;  %8023 = vmatprep.mubr.f32.mxu1 %v2521_v30  ;;  %v2856_v30 = vld [vmem:[#allocation2 + $0x460] sm:$0xff] }
 0x2ce   :  { %8072 = vmatprep.subr.mxu1 %v2834_v48 }
 0x2cf   :  { %8073 = vmatpush3.msra.mxu1 %v2834_v48 }
 0x2d0   :  { %8024 = vmatmul.mubr.f32.gmra.mxu1 %v2522_v40  ;;  %8074 = vmatprep.subr.mxu1 %v8066_v8 }
 0x2d1   :  { %8075 = vmatpush3.msra.mxu1 %v8066_v8  ;;  %8026 = vmatprep.mubr.f32.mxu1 %v2523_v9  ;;  %v2858_v9 = vld [vmem:[#allocation2 + $0x470] sm:$0xff] }
 0x2d2   :  { %8076 = vmatprep.subr.mxu1 %v2824_v42 }
 0x2d3   :  { %8077 = vmatpush3.msra.mxu1 %v2824_v42 }
 0x2d4   :  { %8027 = vmatmul.mubr.f32.gmra.mxu1 %v2524_v36  ;;  %8078 = vmatprep.subr.mxu1 %v8063_v7 }
 0x2d5   :  { %8079 = vmatpush3.msra.mxu1 %v8063_v7  ;;  %8029 = vmatprep.mubr.f32.mxu1 %v2525_v53 }
 0x2d6   :  { %8080 = vmatprep.subr.mxu1 %v2814_v14 }
 0x2d7   :  { %8081 = vmatpush3.msra.mxu1 %v2814_v14 }
 0x2d8   :  { %8030 = vmatmul.mubr.f32.gmra.mxu1 %v2526_v52  ;;  %8082 = vmatprep.subr.mxu1 %v8060_v34 }
 0x2d9   :  { %8083 = vmatpush3.msra.mxu1 %v8060_v34  ;;  %8032 = vmatprep.mubr.f32.mxu1 %v2527_v3  ;;  %v2850_v34 = vld [vmem:[#allocation2 + $0x430] sm:$0xff] }
 0x2da   :  { %8084 = vmatprep.subr.mxu1 %v2804_v37 }
 0x2db   :  { %8085 = vmatpush3.msra.mxu1 %v2804_v37 }
 0x2dc   :  { %8033 = vmatmul.mubr.f32.gmra.mxu1 %v2528_v15  ;;  %8086 = vmatprep.subr.mxu1 %v9257_v33 }
 0x2dd   :  { %8087 = vmatpush3.msra.mxu1 %v9257_v33  ;;  %8035 = vmatprep.mubr.f32.mxu1 %v2529_v4  ;;  %v2848_v33 = vld [vmem:[#allocation2 + $0x420] sm:$0xff] }
 0x2de   :  { %8088 = vmatprep.subr.mxu1 %v9261_v24 }
 0x2df   :  { %8089 = vmatpush3.msra.mxu1 %v9261_v24 }
 0x2e0   :  { %8036 = vmatmul.mubr.f32.gmra.mxu1 %v2530_v19  ;;  %8090 = vmatprep.subr.mxu1 %v9251_v12 }
 0x2e1   :  { %8091 = vmatpush3.msra.mxu1 %v9251_v12  ;;  %8038 = vmatprep.mubr.f32.mxu1 %v2531_v43  ;;  %v9291_v12 = vpop.f32.mrf.mxu1 }
 0x2e2   :  { %8092 = vmatprep.subr.mxu1 %v9253_v39 }
 0x2e3   :  { %8093 = vmatpush3.msra.mxu1 %v9253_v39  ;;  %v2846_v39 = vld [vmem:[#allocation2 + $0x410] sm:$0xff] }
 0x2e4   :  { %8039 = vmatmul.mubr.f32.gmra.mxu1 %v2532_v10  ;;  %8094 = vmatprep.subr.mxu1 %v9247_v57 }
 0x2e5   :  { %8095 = vmatpush3.msra.mxu1 %v9247_v57  ;;  %8041 = vmatprep.mubr.f32.mxu1 %v2533_v5 }
 0x2e6   :  { %8096 = vmatprep.subr.mxu1 %v9249_v11 }
 0x2e7   :  { %8097 = vmatpush3.msra.mxu1 %v9249_v11  ;;  %v2847_v11 = vld [vmem:[#allocation2 + $0x418] sm:$0xff] }
 0x2e8   :  { %8042 = vmatmul.mubr.f32.gmra.mxu1 %v2534_v20  ;;  %8098 = vmatprep.subr.mxu1 %v9243_v25 }
 0x2e9   :  { %8099 = vmatpush3.msra.mxu1 %v9243_v25  ;;  %8102 = vmatprep.mubr.f32.mxu1 %v2844_v2 }
 0x2ea   :  { %8100 = vmatprep.subr.mxu1 %v9245_v38 }
 0x2eb   :  { %8101 = vmatpush3.msra.mxu1 %v9245_v38 }
 0x2ec   :  { %v7612_v57 = vpop.f32.mrf.mxu1  ;;  %8103 = vmatmul.mubr.f32.vlgmr.msra.gmra.mxu1 %v2845_v58 }
 0x2ed   :  { %v1056_v13 = vadd.f32 %v7612_v57, %v8971_v44  ;;  %8105 = vmatprep.mubr.f32.mxu1 %v2846_v39  ;;  %v2851_v44 = vld [vmem:[#allocation2 + $0x438] sm:$0xff] }
 0x2ee   :  { %v9296_v17 = vpop.f32.mrf.mxu1 }
 0x2f0   :  { %v7615_v24 = vpop.f32.mrf.mxu1  ;;  %8106 = vmatmul.mubr.f32.gmra.mxu1 %v2847_v11 }
 0x2f1   :  { %v1058_v25 = vadd.f32 %v7615_v24, %v8981_v49  ;;  %8108 = vmatprep.mubr.f32.mxu1 %v2848_v33  ;;  %v2853_v49 = vld [vmem:[#allocation2 + $0x448] sm:$0xff] }
 0x2f2   :  { %v9299_v62 = vpop.f32.mrf.mxu1 }
 0x2f4   :  { %v7618_v37 = vpop.f32.mrf.mxu1  ;;  %8109 = vmatmul.mubr.f32.gmra.mxu1 %v2849_v47 }
 0x2f5   :  { %v1060_v38 = vadd.f32 %v7618_v37, %v8991_v54  ;;  %8111 = vmatprep.mubr.f32.mxu1 %v2850_v34  ;;  %v2855_v54 = vld [vmem:[#allocation2 + $0x458] sm:$0xff] }
 0x2f6   :  { %v9302_v6 = vpop.f32.mrf.mxu1 }
 0x2f8   :  { %v7621_v7 = vpop.f32.mrf.mxu1  ;;  %8112 = vmatmul.mubr.f32.gmra.mxu1 %v2851_v44 }
 0x2f9   :  { %v1062_v14 = vadd.f32 %v7621_v7, %v9001_v59  ;;  %8114 = vmatprep.mubr.f32.mxu1 %v2852_v16  ;;  %v2857_v59 = vld [vmem:[#allocation2 + $0x468] sm:$0xff] }
 0x2fa   :  { %v9305_v63 = vpop.f32.mrf.mxu1 }
 0x2fc   :  { %v7624_v8 = vpop.f32.mrf.mxu1  ;;  %8115 = vmatmul.mubr.f32.gmra.mxu1 %v2853_v49 }
 0x2fd   :  { %v1064_v42 = vadd.f32 %v7624_v8, %v9011_v0  ;;  %8117 = vmatprep.mubr.f32.mxu1 %v2854_v41  ;;  %v2859_v0 = vld [vmem:[#allocation2 + $0x478] sm:$0xff] }
 0x2fe   :  { %v9308_v29 = vpop.f32.mrf.mxu1 }
 0x300   :  { %v7627_v35 = vpop.f32.mrf.mxu1  ;;  %8118 = vmatmul.mubr.f32.gmra.mxu1 %v2855_v54 }
 0x301   :  { %v1066_v48 = vadd.f32 %v7627_v35, %v9021_v21  ;;  %8120 = vmatprep.mubr.f32.mxu1 %v2856_v30 }
 0x302   :  { %v9311_v40 = vpop.f32.mrf.mxu1 }
 0x304   :  { %v7630_v36 = vpop.f32.mrf.mxu1  ;;  %8121 = vmatmul.mubr.f32.gmra.mxu1 %v2857_v59 }
 0x305   :  { %v1068_v53 = vadd.f32 %v7630_v36, %v9031_v26  ;;  %8123 = vmatprep.mubr.f32.mxu1 %v2858_v9 }
 0x306   :  { %v9314_v52 = vpop.f32.mrf.mxu1 }
 0x308   :  { %v7633_v3 = vpop.f32.mrf.mxu1  ;;  %8124 = vmatmul.mubr.f32.gmra.mxu1 %v2859_v0 }
 0x309   :  { %v1070_v15 = vadd.f32 %v7633_v3, %v9041_v31 }
 0x30a   :  { %v9317_v4 = vpop.f32.mrf.mxu1 }
 0x30c   :  { %v7694_v21 = vpop.f32.mrf.mxu1 }
 0x30d   :  { %v1381_v19 = vadd.f32 %v7694_v21, %v1056_v13 }
 0x30e   :  { %v9319_v43 = vpop.f32.mrf.mxu1 }
 0x310   :  { %v7697_v10 = vpop.f32.mrf.mxu1 }
 0x311   :  { %v1383_v5 = vadd.f32 %v7697_v10, %v1058_v25 }
 0x312   :  { %v9321_v20 = vpop.f32.mrf.mxu1 }
 0x314   :  { %v7700_v2 = vpop.f32.mrf.mxu1 }
 0x315   :  { %v1385_v26 = vadd.f32 %v7700_v2, %v1060_v38 }
 0x316   :  { %v9323_v58 = vpop.f32.mrf.mxu1 }
 0x318   :  { %v7703_v39 = vpop.f32.mrf.mxu1 }
 0x319   :  { %v1387_v57 = vadd.f32 %v7703_v39, %v1062_v14 }
 0x31a   :  { %v9325_v11 = vpop.f32.mrf.mxu1 }
 0x31c   :  { %v7706_v33 = vpop.f32.mrf.mxu1 }
 0x31d   :  { %v1389_v31 = vadd.f32 %v7706_v33, %v1064_v42 }
 0x31e   :  { %v1341_v24 = vpop.f32.mrf.mxu1 }
 0x320   :  { %v7709_v47 = vpop.f32.mrf.mxu1 }
 0x321   :  { %v1391_v34 = vadd.f32 %v7709_v47, %v1066_v48 }
 0x322   :  { %v1351_v13 = vpop.f32.mrf.mxu1 }
 0x324   :  { %v7712_v37 = vpop.f32.mrf.mxu1 }
 0x325   :  { %v1393_v44 = vadd.f32 %v7712_v37, %v1068_v53 }
 0x326   :  { %v1361_v16 = vpop.f32.mrf.mxu1 }
 0x328   :  { %v7715_v25 = vpop.f32.mrf.mxu1 }
 0x329   :  { %v1395_v7 = vadd.f32 %v7715_v25, %v1070_v15 }
 0x32a   :  { %v1371_v49 = vpop.f32.mrf.mxu1 }
 0x32c   :  { %v7776_v41 = vpop.f32.mrf.mxu1 }
 0x32d   :  { %v1706_v38 = vadd.f32 %v7776_v41, %v1381_v19 }
 0x32e   :  { %v9327_v8 = vpop.f32.mrf.mxu1 }
 0x330   :  { %v7779_v54 = vpop.f32.mrf.mxu1 }
 0x331   :  { %v1708_v14 = vadd.f32 %v7779_v54, %v1383_v5 }
 0x332   :  { %v9329_v30 = vpop.f32.mrf.mxu1 }
 0x334   :  { %v7782_v35 = vpop.f32.mrf.mxu1 }
 0x335   :  { %v1710_v42 = vadd.f32 %v7782_v35, %v1385_v26 }
 0x336   :  { %v9331_v59 = vpop.f32.mrf.mxu1 }
 0x338   :  { %v7785_v48 = vpop.f32.mrf.mxu1 }
 0x339   :  { %v1712_v9 = vadd.f32 %v7785_v48, %v1387_v57 }
 0x33a   :  { %v9333_v36 = vpop.f32.mrf.mxu1 }
 0x33c   :  { %v7788_v53 = vpop.f32.mrf.mxu1 }
 0x33d   :  { %v1714_v0 = vadd.f32 %v7788_v53, %v1389_v31 }
 0x33e   :  { %v1666_v3 = vpop.f32.mrf.mxu1 }
 0x340   :  { %v7791_v15 = vpop.f32.mrf.mxu1 }
 0x341   :  { %v1716_v21 = vadd.f32 %v7791_v15, %v1391_v34  ;;  %v708_v34 = vadd.f32 %v9017_v18, %v9015_v1 }
 0x342   :  { %v1676_v19 = vpop.f32.mrf.mxu1 }
 0x343   :  { %v1063_v53 = vadd.f32 %v9308_v29, %v708_v34 }
 0x344   :  { %v7794_v10 = vpop.f32.mrf.mxu1 }
 0x345   :  { %v1718_v2 = vadd.f32 %v7794_v10, %v1393_v44  ;;  %v1388_v10 = vadd.f32 %v1341_v24, %v1063_v53 }
 0x346   :  { %v1686_v39 = vpop.f32.mrf.mxu1 }
 0x348   :  { %v7797_v5 = vpop.f32.mrf.mxu1 }
 0x349   :  { %v1720_v33 = vadd.f32 %v7797_v5, %v1395_v7 }
 0x34a   :  { %v1696_v47 = vpop.f32.mrf.mxu1 }
 0x34c   :  { %v7858_v37 = vpop.f32.mrf.mxu1 }
 0x34d   :  { %v2031_v26 = vadd.f32 %v7858_v37, %v1706_v38  ;;  %v718_v38 = vadd.f32 %v9027_v23, %v9025_v22  ;;  %v1713_v37 = vadd.f32 %v1666_v3, %v1388_v10  ;;  %v738_v22 = vadd.f32 %v9291_v12, %v9045_v32 }
 0x34e   :  { %v9335_v25 = vpop.f32.mrf.mxu1 }
 0x34f   :  { %v1065_v5 = vadd.f32 %v9311_v40, %v718_v38 }
 0x350   :  { %v7861_v41 = vpop.f32.mrf.mxu1 }
 0x351   :  { %v2033_v57 = vadd.f32 %v7861_v41, %v1708_v14  ;;  %v1390_v1 = vadd.f32 %v1351_v13, %v1065_v5 }
 0x352   :  { %v9337_v54 = vpop.f32.mrf.mxu1 }
 0x353   :  { %v1715_v34 = vadd.f32 %v1676_v19, %v1390_v1 }
 0x354   :  { %v7864_v35 = vpop.f32.mrf.mxu1 }
 0x355   :  { %v2035_v31 = vadd.f32 %v7864_v35, %v1710_v42  ;;  %v728_v35 = vadd.f32 %v9037_v28, %v9035_v27 }
 0x356   :  { %v9339_v48 = vpop.f32.mrf.mxu1 }
 0x358   :  { %v7867_v44 = vpop.f32.mrf.mxu1 }
 0x359   :  { %v2037_v7 = vadd.f32 %v7867_v44, %v1712_v9  ;;  %v1067_v9 = vadd.f32 %v9314_v52, %v728_v35 }
 0x35a   :  { %v9344_v15 = vpop.f32.mrf.mxu1 }
 0x35b   :  { %10098 = vst [vmem:[#allocation8_spill] sm:$0xff] %v9344_v15  ;;  %v1392_v23 = vadd.f32 %v1361_v16, %v1067_v9 }
 0x35c   :  { %v7870_v14 = vpop.f32.mrf.mxu1 }
 0x35d   :  { %v2039_v42 = vadd.f32 %v7870_v14, %v1714_v0  ;;  %v1069_v0 = vadd.f32 %v9317_v4, %v738_v22  ;;  %v1717_v3 = vadd.f32 %v1686_v39, %v1392_v23 }
 0x35e   :  { %v1991_v41 = vpop.f32.mrf.mxu1 }
 0x35f   :  { %v9351_v18 = vadd.f32 %v1991_v41, %v1713_v37  ;;  %v1394_v13 = vadd.f32 %v1371_v49, %v1069_v0 }
 0x360   :  { %v7873_v29 = vpop.f32.mrf.mxu1 }
 0x361   :  { %v2041_v44 = vadd.f32 %v7873_v29, %v1716_v21  ;;  %v1719_v52 = vadd.f32 %v1696_v47, %v1394_v13 }
 0x362   :  { %v2001_v15 = vpop.f32.mrf.mxu1 }
 0x363   :  { %v9356_v40 = vadd.f32 %v2001_v15, %v1715_v34 }
 0x364   :  { %v7876_v24 = vpop.f32.mrf.mxu1 }
 0x365   :  { %v2043_v27 = vadd.f32 %v7876_v24, %v1718_v2 }
 0x366   :  { %v2011_v28 = vpop.f32.mrf.mxu1 }
 0x367   :  { %v9359_v53 = vadd.f32 %v2011_v28, %v1717_v3 }
 0x368   :  { %v7879_v38 = vpop.f32.mrf.mxu1 }
 0x369   :  { %v2045_v19 = vadd.f32 %v7879_v38, %v1720_v33 }
 0x36a   :  { %v2021_v21 = vpop.f32.mrf.mxu1 }
 0x36b   :  { %v9361_v10 = vadd.f32 %v2021_v21, %v1719_v52 }
 0x36c   :  { %v7940_v14 = vpop.f32.mrf.mxu1 }
 0x36d   :  { %v2356_v32 = vadd.f32 %v7940_v14, %v2031_v26 }
 0x36e   :  { %v2276_v12 = vpop.f32.mrf.mxu1 }
 0x370   :  { %v7943_v16 = vpop.f32.mrf.mxu1 }
 0x371   :  { %v9363_v15 = vadd.f32 %v7943_v16, %v2033_v57 }
 0x372   :  { %v2286_v5 = vpop.f32.mrf.mxu1 }
 0x374   :  { %v7946_v4 = vpop.f32.mrf.mxu1 }
 0x375   :  { %v9365_v39 = vadd.f32 %v7946_v4, %v2035_v31  ;;  %v6628_v31 = vld [vmem:[%s10087_s5 + $0x8] sm:$0xff] }
 0x376   :  { %v9367_v2 = vpop.f32.mrf.mxu1  ;;  %8134 = vmatprep.subr.mxu1 %v6628_v31 }
 0x377   :  { %8135 = vmatpush3.msra.mxu1 %v6628_v31 }
 0x378   :  { %v7949_v49 = vpop.f32.mrf.mxu1 }
 0x379   :  { %v9369_v37 = vadd.f32 %v7949_v49, %v2037_v7  ;;  %v3180_v7 = vld [vmem:[%s10087_s5] sm:$0xff]  ;;  %v678_v49 = vadd.f32 %v8987_v51, %v8985_v50 }
 0x37a   :  { %v9371_v47 = vpop.f32.mrf.mxu1  ;;  %8126 = vmatprep.subr.mxu0 %v3180_v7 }
 0x37b   :  { %8127 = vmatpush3.msra.mxu0 %v3180_v7  ;;  %v1057_v31 = vadd.f32 %v9299_v62, %v678_v49 }
 0x37c   :  { %v7952_v33 = vpop.f32.mrf.mxu1 }
 0x37d   :  { %v9373_v41 = vadd.f32 %v7952_v33, %v2039_v42 }
 0x37e   :  { %v9375_v35 = vpop.f32.mrf.mxu1 }
 0x380   :  { %v7955_v26 = vpop.f32.mrf.mxu1 }
 0x381   :  { %v9377_v1 = vadd.f32 %v7955_v26, %v2041_v44 }
 0x382   :  { %v9379_v57 = vpop.f32.mrf.mxu1 }
 0x384   :  { %v7958_v29 = vpop.f32.mrf.mxu1 }
 0x385   :  { %v9387_v42 = vadd.f32 %v7958_v29, %v2043_v27 }
 0x386   :  { %v9389_v9 = vpop.f32.mrf.mxu1 }
 0x388   :  { %v7961_v34 = vpop.f32.mrf.mxu1 }
 0x389   :  { %v9391_v44 = vadd.f32 %v7961_v34, %v2045_v19  ;;  %v668_v19 = vadd.f32 %v8977_v46, %v8975_v45  ;;  %v688_v45 = vadd.f32 %v8997_v56, %v8995_v55  ;;  %v1382_v46 = vadd.f32 %v9321_v20, %v1057_v31 }
 0x38a   :  { %v9393_v22 = vpop.f32.mrf.mxu1 }
 0x38b   :  { %v1055_v4 = vadd.f32 %v9296_v17, %v668_v19  ;;  %v1059_v50 = vadd.f32 %v9302_v6, %v688_v45  ;;  %v1707_v51 = vadd.f32 %v9329_v30, %v1382_v46 }
 0x38c   :  { %v8022_v23 = vpop.f32.mrf.mxu1 }
 0x38d   :  { %v1380_v26 = vadd.f32 %v9319_v43, %v1055_v4  ;;  %v2681_v19 = vadd.f32 %v8022_v23, %v2356_v32  ;;  %v1384_v4 = vadd.f32 %v9323_v58, %v1059_v50  ;;  %v2032_v55 = vadd.f32 %v9337_v54, %v1707_v51 }
 0x38e   :  { %v2601_v24 = vpop.f32.mrf.mxu1 }
 0x38f   :  { %v1705_v29 = vadd.f32 %v9327_v8, %v1380_v26  ;;  %v698_v8 = vadd.f32 %v9007_v61, %v9005_v60  ;;  %v1709_v6 = vadd.f32 %v9331_v59, %v1384_v4  ;;  %v2357_v30 = vadd.f32 %v2286_v5, %v2032_v55 }
 0x390   :  { %v8025_v0 = vpop.f32.mrf.mxu1 }
 0x391   :  { %v2030_v17 = vadd.f32 %v9335_v25, %v1705_v29  ;;  %v1061_v25 = vadd.f32 %v9305_v63, %v698_v8  ;;  %v2034_v61 = vadd.f32 %v9339_v48, %v1709_v6  ;;  %v10099_v29 = vld [vmem:[#allocation8_spill] sm:$0xff] }
 0x392   :  { %v2611_v3 = vpop.f32.mrf.mxu1 }
 0x393   :  { %v2355_v62 = vadd.f32 %v2276_v12, %v2030_v17  ;;  %v2683_v12 = vadd.f32 %v8025_v0, %v9363_v15  ;;  %v1386_v60 = vadd.f32 %v9325_v11, %v1061_v25  ;;  %v2682_v58 = vadd.f32 %v2611_v3, %v2357_v30 }
 0x394   :  { %v8028_v28 = vpop.f32.mrf.mxu1 }
 0x395   :  { %v2680_v20 = vadd.f32 %v2601_v24, %v2355_v62  ;;  %v1711_v15 = vadd.f32 %v9333_v36, %v1386_v60  ;;  %v2359_v24 = vadd.f32 %v9367_v2, %v2034_v61  ;;  %v2685_v48 = vadd.f32 %v8028_v28, %v9365_v39 }
 0x396   :  { %v2621_v13 = vpop.f32.mrf.mxu1  ;;  %v2363_v61 = vadd.f32 %v9375_v35, %v9351_v18 }
 0x397   :  { %v2036_v45 = vadd.f32 %v10099_v29, %v1711_v15  ;;  %v2684_v46 = vadd.f32 %v2621_v13, %v2359_v24  ;;  %v2365_v29 = vadd.f32 %v9379_v57, %v9356_v40 }
 0x398   :  { %v9395_v38 = vpop.f32.mrf.mxu1 }
 0x399   :  { %v2361_v62 = vadd.f32 %v9371_v47, %v2036_v45  ;;  %v2687_v4 = vadd.f32 %v9395_v38, %v9369_v37 }
 0x39a   :  { %v9397_v52 = vpop.f32.mrf.mxu1 }
 0x39b   :  { %v2686_v25 = vadd.f32 %v9397_v52, %v2361_v62 }
 0x39c   :  { %v9399_v21 = vpop.f32.mrf.mxu1 }
 0x39e   :  { %v9401_v27 = vpop.f32.mrf.mxu1 }
 0x39f   :  { %v2688_v24 = vadd.f32 %v9401_v27, %v2363_v61  ;;  %v2369_v61 = vadd.f32 %v9393_v22, %v9361_v10 }
 0x3a0   :  { %v9403_v14 = vpop.f32.mrf.mxu1 }
 0x3a2   :  { %v9407_v16 = vpop.f32.mrf.mxu1 }
 0x3a4   :  { %v9412_v33 = vpop.f32.mrf.mxu1 }
 0x3a6   :  { %v9416_v7 = vpop.f32.mrf.mxu1 }
 0x3a8   :  { %v9422_v34 = vpop.f32.mrf.mxu1 }
 0x3aa   :  { %v9427_v43 = vpop.f32.mrf.mxu1 }
 0x3ac   :  { %v8104_v56 = vpop.f32.mrf.mxu1 }
 0x3ad   :  { %v9433_v49 = vadd.f32 %v8104_v56, %v2681_v19 }
 0x3ae   :  { %v2926_v26 = vpop.f32.mrf.mxu1 }
 0x3af   :  { %v9438_v32 = vadd.f32 %v2926_v26, %v2680_v20  ;;  %v3059_v23 = vmul.f32 %v9433_v49, %v9433_v49  ;;  %v3022_v0 = vsel %vm82_vm0, %v9433_v49, 0.0 }
 0x3b0   :  { %v8107_v54 = vpop.f32.mrf.mxu1 }
 0x3b1   :  { %v3021_v63 = vsel %vm82_vm0, %v9438_v32, 0.0  ;;  %v3058_v59 = vmul.f32 %v9438_v32, %v9438_v32  ;;  %v9448_v5 = vadd.f32 %v8107_v54, %v2683_v12  ;;  %v3075_v2 = vsel %vm82_vm0, %v3059_v23, 0.0 }
 0x3b2   :  { %v2936_v11 = vpop.f32.mrf.mxu1  ;;  %v3023_v17 = vadd.f32 %v3022_v0, %v3021_v63  ;;  %v2689_v23 = vadd.f32 %v9399_v21, %v9373_v41 }
 0x3b3   :  { %v3074_v3 = vsel %vm82_vm0, %v3058_v59, 0.0  ;;  %v9456_v31 = vadd.f32 %v2936_v11, %v2682_v58  ;;  %v3061_v50 = vmul.f32 %v9448_v5, %v9448_v5  ;;  %v3026_v55 = vsel %vm82_vm0, %v9448_v5, 0.0 }
 0x3b4   :  { %v8110_v36 = vpop.f32.mrf.mxu1  ;;  %v3076_v19 = vadd.f32 %v3075_v2, %v3074_v3 }
 0x3b5   :  { %v3024_v39 = vsel %vm82_vm0, %v9456_v31, 0.0  ;;  %v3060_v28 = vmul.f32 %v9456_v31, %v9456_v31  ;;  %v9466_v51 = vadd.f32 %v8110_v36, %v2685_v48  ;;  %v3079_v6 = vsel %vm82_vm0, %v3061_v50, 0.0 }
 0x3b6   :  { %v3025_v8 = vadd.f32 %v3024_v39, %v3023_v17  ;;  %v2946_v13 = vpop.f32.mrf.mxu1  ;;  %v2691_v17 = vadd.f32 %v9403_v14, %v9377_v1  ;;  %v2690_v39 = vadd.f32 %v9407_v16, %v2365_v29 }
 0x3b7   :  { %v3077_v56 = vsel %vm82_vm0, %v3060_v28, 0.0  ;;  %v9474_v20 = vadd.f32 %v2946_v13, %v2684_v46  ;;  %v3063_v12 = vmul.f32 %v9466_v51, %v9466_v51  ;;  %v3030_v63 = vsel %vm82_vm0, %v9466_v51, 0.0 }
 0x3b8   :  { %v3078_v30 = vadd.f32 %v3077_v56, %v3076_v19  ;;  %v3027_v26 = vadd.f32 %v3026_v55, %v3025_v8  ;;  %v8113_v47 = vpop.f32.mrf.mxu1  ;;  %v2367_v13 = vadd.f32 %v9389_v9, %v9359_v53  ;;  %v2693_v56 = vadd.f32 %v9412_v33, %v9387_v42 }
 0x3b9   :  { %v3028_v37 = vsel %vm82_vm0, %v9474_v20, 0.0  ;;  %v3062_v38 = vmul.f32 %v9474_v20, %v9474_v20  ;;  %v9484_v60 = vadd.f32 %v8113_v47, %v2687_v4  ;;  %v3083_v0 = vsel %vm82_vm0, %v3063_v12, 0.0 }
 0x3ba   :  { %v3029_v52 = vadd.f32 %v3028_v37, %v3027_v26  ;;  %v3080_v58 = vadd.f32 %v3079_v6, %v3078_v30  ;;  %v2956_v54 = vpop.f32.mrf.mxu1  ;;  %v2692_v26 = vadd.f32 %v9416_v7, %v2367_v13 }
 0x3bb   :  { %v3081_v59 = vsel %vm82_vm0, %v3062_v38, 0.0  ;;  %v9493_v15 = vadd.f32 %v2956_v54, %v2686_v25  ;;  %v3065_v48 = vmul.f32 %v9484_v60, %v9484_v60  ;;  %v3034_v50 = vsel %vm82_vm0, %v9484_v60, 0.0 }
 0x3bc   :  { %v3082_v11 = vadd.f32 %v3081_v59, %v3080_v58  ;;  %v3031_v18 = vadd.f32 %v3030_v63, %v3029_v52  ;;  %v8116_v35 = vpop.f32.mrf.mxu1  ;;  %v2695_v54 = vadd.f32 %v9422_v34, %v9391_v44 }
 0x3bd   :  { %v3032_v41 = vsel %vm82_vm0, %v9493_v15, 0.0  ;;  %v3064_v21 = vmul.f32 %v9493_v15, %v9493_v15  ;;  %v9503_v3 = vadd.f32 %v8116_v35, %v2689_v23  ;;  %v3087_v28 = vsel %vm82_vm0, %v3065_v48, 0.0 }
 0x3be   :  { %v3033_v27 = vadd.f32 %v3032_v41, %v3031_v18  ;;  %v3084_v45 = vadd.f32 %v3083_v0, %v3082_v11  ;;  %v2966_v46 = vpop.f32.mrf.mxu1 }
 0x3bf   :  { %v3085_v36 = vsel %vm82_vm0, %v3064_v21, 0.0  ;;  %v9512_v2 = vadd.f32 %v2966_v46, %v2688_v24  ;;  %v3067_v57 = vmul.f32 %v9503_v3, %v9503_v3  ;;  %v3038_v25 = vsel %vm82_vm0, %v9503_v3, 0.0 }
 0x3c0   :  { %v3086_v62 = vadd.f32 %v3085_v36, %v3084_v45  ;;  %v3035_v19 = vadd.f32 %v3034_v50, %v3033_v27  ;;  %v8119_v40 = vpop.f32.mrf.mxu1  ;;  %v2694_v24 = vadd.f32 %v9427_v43, %v2369_v61 }
 0x3c1   :  { %v3036_v1 = vsel %vm82_vm0, %v9512_v2, 0.0  ;;  %v3066_v14 = vmul.f32 %v9512_v2, %v9512_v2  ;;  %v9522_v8 = vadd.f32 %v8119_v40, %v2691_v17  ;;  %v3091_v37 = vsel %vm82_vm0, %v3067_v57, 0.0 }
 0x3c2   :  { %v3037_v16 = vadd.f32 %v3036_v1, %v3035_v19  ;;  %v3088_v4 = vadd.f32 %v3087_v28, %v3086_v62  ;;  %v2976_v55 = vpop.f32.mrf.mxu1 }
 0x3c3   :  { %v3089_v6 = vsel %vm82_vm0, %v3066_v14, 0.0  ;;  %v9531_v30 = vadd.f32 %v2976_v55, %v2690_v39  ;;  %v3069_v12 = vmul.f32 %v9522_v8, %v9522_v8  ;;  %v3042_v23 = vsel %vm82_vm0, %v9522_v8, 0.0 }
 0x3c4   :  { %v3090_v47 = vadd.f32 %v3089_v6, %v3088_v4  ;;  %v3039_v53 = vadd.f32 %v3038_v25, %v3037_v16  ;;  %v8122_v9 = vpop.f32.mrf.mxu1 }
 0x3c5   :  { %v3040_v42 = vsel %vm82_vm0, %v9531_v30, 0.0  ;;  %v3068_v33 = vmul.f32 %v9531_v30, %v9531_v30  ;;  %v9541_v38 = vadd.f32 %v8122_v9, %v2693_v56  ;;  %v3095_v11 = vsel %vm82_vm0, %v3069_v12, 0.0 }
 0x3c6   :  { %v3041_v7 = vadd.f32 %v3040_v42, %v3039_v53  ;;  %v3092_v52 = vadd.f32 %v3091_v37, %v3090_v47  ;;  %v2986_v58 = vpop.f32.mrf.mxu1 }
 0x3c7   :  { %v3093_v63 = vsel %vm82_vm0, %v3068_v33, 0.0  ;;  %v9550_v59 = vadd.f32 %v2986_v58, %v2692_v26  ;;  %v3071_v22 = vmul.f32 %v9541_v38, %v9541_v38  ;;  %v3046_v43 = vsel %vm82_vm0, %v9541_v38, 0.0 }
 0x3c8   :  { %v3094_v48 = vadd.f32 %v3093_v63, %v3092_v52  ;;  %v3043_v18 = vadd.f32 %v3042_v23, %v3041_v7  ;;  %v8125_v10 = vpop.f32.mrf.mxu1  ;;  %v3122_v58 = vlaneseq  ;;  %v3117_v23 = vld [vmem:[%s10084_s2] sm:$0x1] }
 0x3c9   :  { %v3044_v44 = vsel %vm82_vm0, %v9550_v59, 0.0  ;;  %v3070_v34 = vmul.f32 %v9550_v59, %v9550_v59  ;;  %v9560_v35 = vadd.f32 %v8125_v10, %v2695_v54  ;;  %v3099_v17 = vsel %vm82_vm0, %v3071_v22, 0.0 }
 0x3ca   :  { %v3045_v0 = vadd.f32 %v3044_v44, %v3043_v18  ;;  %v3096_v41 = vadd.f32 %v3095_v11, %v3094_v48  ;;  %v2996_v21 = vpop.f32.mrf.mxu1  ;;  %v3123_v54 = vshrl.u32 %v3122_v58, 7  ;;  %v3119_v48 = vld [vmem:[%s10085_s3] sm:$0x1] }
 0x3cb   :  { %v3097_v29 = vsel %vm82_vm0, %v3070_v34, 0.0  ;;  %v3019_v27 = vadd.f32 %v2996_v21, %v2694_v24  ;;  %v3073_v50 = vmul.f32 %v9560_v35, %v9560_v35  ;;  %v3050_v19 = vsel %vm82_vm0, %v9560_v35, 0.0 }
 0x3cc   :  { %v3098_v45 = vadd.f32 %v3097_v29, %v3096_v41  ;;  %v3047_v46 = vadd.f32 %v3046_v43, %v3045_v0  ;;  %v9576_v63 = vsub.s32 0, %v3123_v54 }
 0x3cd   :  { %v3048_v36 = vsel %vm82_vm0, %v3019_v27, 0.0  ;;  %v3072_v39 = vmul.f32 %v3019_v27, %v3019_v27  ;;  %v3103_v14 = vsel %vm82_vm0, %v3073_v50, 0.0 }
 0x3ce   :  { %v3049_v28 = vadd.f32 %v3048_v36, %v3047_v46  ;;  %v3100_v62 = vadd.f32 %v3099_v17, %v3098_v45 }
 0x3cf   :  { %v3101_v40 = vsel %vm82_vm0, %v3072_v39, 0.0 }
 0x3d0   :  { %v3051_v57 = vadd.f32 %v3050_v19, %v3049_v28  ;;  %v3102_v1 = vadd.f32 %v3101_v40, %v3100_v62 }
 0x3d2   :  { %v3052_v13 = vrot.slane %v3051_v57, 4  ;;  %v3104_v16 = vadd.f32 %v3103_v14, %v3102_v1 }
 0x3d4   :  { %v3053_v4 = vadd.f32 %v3052_v13, %v3051_v57  ;;  %v3105_v55 = vrot.slane %v3104_v16, 4 }
 0x3d6   :  { %v3054_v56 = vrot.slane %v3053_v4, 2  ;;  %v3106_v25 = vadd.f32 %v3105_v55, %v3104_v16 }
 0x3d8   :  { %v3055_v6 = vadd.f32 %v3054_v56, %v3053_v4  ;;  %v3107_v26 = vrot.slane %v3106_v25, 2 }
 0x3da   :  { %v3056_v47 = vrot.slane %v3055_v6, 1  ;;  %v3108_v12 = vadd.f32 %v3107_v26, %v3106_v25 }
 0x3dc   :  { %v3057_v53 = vadd.f32 %v3056_v47, %v3055_v6  ;;  %v3109_v9 = vrot.slane %v3108_v12, 1 }
 0x3de   :  { %v3110_v37 = vadd.f32 %v3109_v9, %v3108_v12  ;;  %v3111_v42 = vmul.f32 0.0078125, %v3057_v53 }
 0x3e0   :  { %v3112_v33 = vmul.f32 0.0078125, %v3110_v37  ;;  %v3113_v61 = vmul.f32 %v3111_v42, %v3111_v42 }
 0x3e2   :  { %v3114_v7 = vsub.f32 %v3112_v33, %v3113_v61  ;;  %v3278_v33 = vld [vmem:[%s10090_s8] sm:$0xff] }
 0x3e4   :  { %v3115_v52 = vadd.f32 1e-05, %v3114_v7 }
 0x3e6   :  { %8449 = vrsqrt.f32 %v3115_v52 }
 0x3f3   :  { %v8450_v24 = vpop.eup %8449 }
 0x3f4   :  { %v3118_v11 = vmul.f32 %v8450_v24, %v3117_v23 }
 0x3f6   :  { %v3120_v18 = vmul.f32 %v3118_v11, %v3111_v42  ;;  %v3125_v10 = vrot.slane %v3118_v11, %v9576_v63  ;;  %v6633_v42 = vld [vmem:[%s10090_s8 + $0x20] sm:$0xff] }
 0x3f8   :  { %v3121_v22 = vsub.f32 %v3119_v48, %v3120_v18  ;;  %v3128_v44 = vmul.f32 %v3125_v10, %v9456_v31  ;;  %v3132_v34 = vmul.f32 %v3125_v10, %v9493_v15  ;;  %v3136_v0 = vmul.f32 %v3125_v10, %v9531_v30  ;;  %v6634_v48 = vld [vmem:[%s10090_s8 + $0x28] sm:$0xff] }
 0x3f9   :  { %v3140_v41 = vmul.f32 %v3125_v10, %v3019_v27  ;;  %v3126_v21 = vmul.f32 %v3125_v10, %v9438_v32  ;;  %v3130_v43 = vmul.f32 %v3125_v10, %v9474_v20  ;;  %v3134_v29 = vmul.f32 %v3125_v10, %v9512_v2  ;;  %v3279_v18 = vld [vmem:[%s10090_s8 + $0x8] sm:$0xff] }
 0x3fa   :  { %v3146_v45 = vrot.slane %v3121_v22, %v9576_v63  ;;  %v3138_v46 = vmul.f32 %v3125_v10, %v9550_v59  ;;  %v3127_v17 = vmul.f32 %v3125_v10, %v9433_v49  ;;  %v3131_v50 = vmul.f32 %v3125_v10, %v9466_v51  ;;  %v3280_v22 = vld [vmem:[%s10090_s8 + $0x10] sm:$0xff] }
 0x3fb   :  { %v3135_v31 = vmul.f32 %v3125_v10, %v9503_v3  ;;  %v3139_v15 = vmul.f32 %v3125_v10, %v9541_v38  ;;  %v3129_v30 = vmul.f32 %v3125_v10, %v9448_v5  ;;  %v3133_v32 = vmul.f32 %v3125_v10, %v9484_v60 }
 0x3fc   :  { %v3150_v27 = vadd.f32 %v3146_v45, %v3128_v44  ;;  %v3154_v20 = vadd.f32 %v3146_v45, %v3132_v34  ;;  %v3158_v36 = vadd.f32 %v3146_v45, %v3136_v0  ;;  %v3162_v2 = vadd.f32 %v3146_v45, %v3140_v41  ;;  %v6645_v44 = vld [vmem:[%s10087_s5 + $0x10] sm:$0xff]  ;;  %v6636_v34 = vld [vmem:[%s10090_s8 + $0x38] sm:$0xff] }
 0x3fd   :  { %v3148_v39 = vadd.f32 %v3146_v45, %v3126_v21  ;;  %v3152_v28 = vadd.f32 %v3146_v45, %v3130_v43  ;;  %v3156_v62 = vadd.f32 %v3146_v45, %v3134_v29  ;;  %v3160_v59 = vadd.f32 %v3146_v45, %v3138_v46  ;;  %v3281_v0 = vld [vmem:[%s10090_s8 + $0x18] sm:$0xff]  ;;  %v6671_v21 = vld [vmem:[%s10087_s5 + $0x20] sm:$0xff]  ;;  %v6684_v43 = vld [vmem:[%s10087_s5 + $0x28] sm:$0xff] }
 0x3fe   :  { %v3166_v19 = vmax.f32 %v3150_v27, %v3154_v20  ;;  %v3170_v49 = vmax.f32 %v3158_v36, %v3162_v2  ;;  %v3149_v40 = vadd.f32 %v3146_v45, %v3127_v17  ;;  %v3153_v51 = vadd.f32 %v3146_v45, %v3131_v50  ;;  %v6658_v41 = vld [vmem:[%s10087_s5 + $0x18] sm:$0xff]  ;;  %v6697_v29 = vld [vmem:[%s10087_s5 + $0x30] sm:$0xff]  ;;  %v6723_v46 = vld [vmem:[%s10087_s5 + $0x40] sm:$0xff] }
 0x3ff   :  { %v3164_v57 = vmax.f32 %v3148_v39, %v3152_v28  ;;  %v3168_v3 = vmax.f32 %v3156_v62, %v3160_v59  ;;  %v3157_v1 = vadd.f32 %v3146_v45, %v3135_v31  ;;  %v3161_v38 = vadd.f32 %v3146_v45, %v3139_v15  ;;  %v6650_v17 = vld [vmem:[%s10090_s8 + $0x40] sm:$0xff]  ;;  %v6651_v28 = vld [vmem:[%s10090_s8 + $0x48] sm:$0xff]  ;;  %v6652_v62 = vld [vmem:[%s10090_s8 + $0x50] sm:$0xff] }
 0x400   :  { %v3174_v14 = vmax.f32 %v3166_v19, %v3170_v49  ;;  %v3165_v5 = vmax.f32 %v3149_v40, %v3153_v51  ;;  %v3137_v60 = vmul.f32 %v3125_v10, %v9522_v8  ;;  %v3141_v13 = vmul.f32 %v3125_v10, %v9560_v35  ;;  %v6635_v10 = vld [vmem:[%s10090_s8 + $0x30] sm:$0xff]  ;;  %v6653_v49 = vld [vmem:[%s10090_s8 + $0x58] sm:$0xff]  ;;  %v6663_v40 = vld [vmem:[%s10090_s8 + $0x60] sm:$0xff] }
 0x401   :  { %v3172_v16 = vmax.f32 %v3164_v57, %v3168_v3  ;;  %v3169_v4 = vmax.f32 %v3157_v1, %v3161_v38  ;;  %v3151_v55 = vadd.f32 %v3146_v45, %v3129_v30  ;;  %v3155_v56 = vadd.f32 %v3146_v45, %v3133_v32  ;;  %v6664_v3 = vld [vmem:[%s10090_s8 + $0x68] sm:$0xff]  ;;  %v6665_v1 = vld [vmem:[%s10090_s8 + $0x70] sm:$0xff] }
 0x402   :  { %v3159_v25 = vadd.f32 %v3146_v45, %v3137_v60  ;;  %v3163_v6 = vadd.f32 %v3146_v45, %v3141_v13  ;;  %v9606_v35 = vmax.f32 %v3174_v14, 0.0  ;;  %v6710_v45 = vld [vmem:[%s10087_s5 + $0x38] sm:$0xff]  ;;  %v6676_v60 = vld [vmem:[%s10090_s8 + $0x80] sm:$0xff] }
 0x403   :  { %v9598_v26 = vmax.f32 %v3172_v16, 0.0  ;;  %v3173_v47 = vmax.f32 %v3165_v5, %v3169_v4  ;;  %v3167_v12 = vmax.f32 %v3151_v55, %v3155_v56  ;;  %v6666_v5 = vld [vmem:[%s10090_s8 + $0x78] sm:$0xff]  ;;  %v6677_v4 = vld [vmem:[%s10090_s8 + $0x88] sm:$0xff]  ;;  %v6678_v55 = vld [vmem:[%s10090_s8 + $0x90] sm:$0xff] }
 0x404   :  { %v3171_v53 = vmax.f32 %v3159_v25, %v3163_v6  ;;  %v6679_v6 = vld [vmem:[%s10090_s8 + $0x98] sm:$0xff] }
 0x405   :  { %8128 = vmatprep.mubr.msk.f32.mxu0 %vm82_vm0, %v9598_v26  ;;  %8136 = vmatprep.mubr.msk.f32.mxu1 %vm82_vm0, %v9598_v26  ;;  %v9604_v8 = vmax.f32 %v3173_v47, 0.0 }
 0x406   :  { %v3175_v9 = vmax.f32 %v3167_v12, %v3171_v53  ;;  %v6690_v53 = vld [vmem:[%s10090_s8 + $0xa8] sm:$0xff] }
 0x407   :  { %8129 = vmatmul.mubr.msk.f32.vlgmr.msra.gmra.mxu0 %vm82_vm0, %v9604_v8  ;;  %8137 = vmatmul.mubr.msk.f32.vlgmr.msra.gmra.mxu1 %vm82_vm0, %v9604_v8 }
 0x408   :  { %8131 = vmatprep.mubr.msk.f32.mxu0 %vm82_vm0, %v9606_v35  ;;  %8139 = vmatprep.mubr.msk.f32.mxu1 %vm82_vm0, %v9606_v35  ;;  %v9616_v37 = vmax.f32 %v3175_v9, 0.0 }
 0x40b   :  { %8132 = vmatmul.mubr.msk.f32.gmra.mxu0 %vm82_vm0, %v9616_v37  ;;  %8140 = vmatmul.mubr.msk.f32.gmra.mxu1 %vm82_vm0, %v9616_v37 }
 0x40c   :  { %8150 = vmatprep.mubr.msk.f32.mxu0 %vm3374_vm1, %v6633_v42  ;;  %8164 = vmatprep.mubr.msk.f32.mxu1 %vm3374_vm1, %v3278_v33  ;;  %v6702_v42 = vld [vmem:[%s10090_s8 + $0xc0] sm:$0xff] }
 0x4c7   :  { %v8130_v61 = vpop.f32.mrf.mxu0  ;;  %v8138_v7 = vpop.f32.mrf.mxu1 }
 0x4c9   :  { %v3259_v52 = vpop.f32.mrf.mxu0  ;;  %v3350_v58 = vpop.f32.mrf.mxu1 }
 0x4cb   :  { %v8133_v54 = vpop.f32.mrf.mxu0  ;;  %v8141_v23 = vpop.f32.mrf.mxu1 }
 0x4cc   :  { %8142 = vmatprep.subr.mxu0 %v8141_v23  ;;  %8156 = vmatprep.subr.mxu1 %v8133_v54 }
 0x4cd   :  { %v3269_v24 = vpop.f32.mrf.mxu0  ;;  %v3360_v11 = vpop.f32.mrf.mxu1  ;;  %8143 = vmatpush3.msra.mxu0 %v8141_v23  ;;  %8157 = vmatpush3.msra.mxu1 %v8133_v54  ;;  %v6705_v23 = vld [vmem:[%s10090_s8 + $0xd8] sm:$0xff] }
 0x4ce   :  { %8144 = vmatprep.subr.mxu0 %v3360_v11  ;;  %8158 = vmatprep.subr.mxu1 %v3269_v24 }
 0x4cf   :  { %8145 = vmatpush3.msra.mxu0 %v3360_v11  ;;  %8159 = vmatpush3.msra.mxu1 %v3269_v24  ;;  %v6715_v24 = vld [vmem:[%s10090_s8 + $0xe0] sm:$0xff] }
 0x4d0   :  { %8146 = vmatprep.subr.mxu0 %v8138_v7  ;;  %8160 = vmatprep.subr.mxu1 %v8130_v61 }
 0x4d1   :  { %8147 = vmatpush3.msra.mxu0 %v8138_v7  ;;  %8161 = vmatpush3.msra.mxu1 %v8130_v61  ;;  %v6703_v7 = vld [vmem:[%s10090_s8 + $0xc8] sm:$0xff] }
 0x4d2   :  { %8148 = vmatprep.subr.mxu0 %v3350_v58  ;;  %8162 = vmatprep.subr.mxu1 %v3259_v52 }
 0x4d3   :  { %8149 = vmatpush3.msra.mxu0 %v3350_v58  ;;  %8163 = vmatpush3.msra.mxu1 %v3259_v52  ;;  %v6704_v52 = vld [vmem:[%s10090_s8 + $0xd0] sm:$0xff] }
 0x4d4   :  { %8151 = vmatmul.mubr.msk.f32.vlgmr.msra.gmra.mxu0 %vm3374_vm1, %v6634_v48  ;;  %8165 = vmatmul.mubr.msk.f32.vlgmr.msra.gmra.mxu1 %vm3374_vm1, %v3279_v18  ;;  %v6716_v18 = vld [vmem:[%s10090_s8 + $0xe8] sm:$0xff] }
 0x4d5   :  { %8153 = vmatprep.mubr.msk.f32.mxu0 %vm3374_vm1, %v6635_v10  ;;  %8167 = vmatprep.mubr.msk.f32.mxu1 %vm3374_vm1, %v3280_v22  ;;  %v6717_v10 = vld [vmem:[%s10090_s8 + $0xf0] sm:$0xff] }
 0x4d6   :  { %8170 = vmatprep.subr.mxu0 %v6645_v44 }
 0x4d7   :  { %8171 = vmatpush3.msra.mxu0 %v6645_v44 }
 0x4d8   :  { %8154 = vmatmul.mubr.msk.f32.gmra.mxu0 %vm3374_vm1, %v6636_v34  ;;  %8168 = vmatmul.mubr.msk.f32.gmra.mxu1 %vm3374_vm1, %v3281_v0  ;;  %v6718_v34 = vld [vmem:[%s10090_s8 + $0xf8] sm:$0xff]  ;;  %v6728_v0 = vld [vmem:[%s10090_s8 + $0x100] sm:$0xff] }
 0x4d9   :  { %8172 = vmatprep.mubr.msk.f32.mxu0 %vm82_vm0, %v9598_v26  ;;  %8192 = vmatprep.subr.mxu0 %v6658_v41 }
 0x4da   :  { %8186 = vmatprep.mubr.msk.f32.mxu1 %vm3374_vm1, %v6650_v17 }
 0x4dc   :  { %8173 = vmatmul.mubr.msk.f32.vlgmr.msra.gmra.mxu0 %vm82_vm0, %v9604_v8 }
 0x4dd   :  { %8175 = vmatprep.mubr.msk.f32.mxu0 %vm82_vm0, %v9606_v35  ;;  %8193 = vmatpush3.msra.mxu0 %v6658_v41  ;;  %v6729_v41 = vld [vmem:[%s10090_s8 + $0x108] sm:$0xff] }
 0x4de   :  { %8214 = vmatprep.subr.mxu0 %v6671_v21 }
 0x4e0   :  { %8176 = vmatmul.mubr.msk.f32.gmra.mxu0 %vm82_vm0, %v9616_v37 }
 0x4e1   :  { %8194 = vmatprep.mubr.msk.f32.mxu0 %vm82_vm0, %v9598_v26 }
 0x4e4   :  { %8195 = vmatmul.mubr.msk.f32.vlgmr.msra.gmra.mxu0 %vm82_vm0, %v9604_v8 }
 0x4e5   :  { %8197 = vmatprep.mubr.msk.f32.mxu0 %vm82_vm0, %v9606_v35  ;;  %8215 = vmatpush3.msra.mxu0 %v6671_v21  ;;  %v6730_v21 = vld [vmem:[%s10090_s8 + $0x110] sm:$0xff] }
 0x4e6   :  { %8236 = vmatprep.subr.mxu0 %v6684_v43 }
 0x4e8   :  { %8198 = vmatmul.mubr.msk.f32.gmra.mxu0 %vm82_vm0, %v9616_v37 }
 0x4e9   :  { %8216 = vmatprep.mubr.msk.f32.mxu0 %vm82_vm0, %v9598_v26 }
 0x4ec   :  { %8217 = vmatmul.mubr.msk.f32.vlgmr.msra.gmra.mxu0 %vm82_vm0, %v9604_v8 }
 0x4ed   :  { %8219 = vmatprep.mubr.msk.f32.mxu0 %vm82_vm0, %v9606_v35  ;;  %8237 = vmatpush3.msra.mxu0 %v6684_v43  ;;  %v6731_v43 = vld [vmem:[%s10090_s8 + $0x118] sm:$0xff] }
 0x4ee   :  { %8258 = vmatprep.subr.mxu0 %v6697_v29 }
 0x4f0   :  { %8220 = vmatmul.mubr.msk.f32.gmra.mxu0 %vm82_vm0, %v9616_v37 }
 0x4f1   :  { %8238 = vmatprep.mubr.msk.f32.mxu0 %vm82_vm0, %v9598_v26 }
 0x4f4   :  { %8239 = vmatmul.mubr.msk.f32.vlgmr.msra.gmra.mxu0 %vm82_vm0, %v9604_v8 }
 0x4f5   :  { %8241 = vmatprep.mubr.msk.f32.mxu0 %vm82_vm0, %v9606_v35  ;;  %8259 = vmatpush3.msra.mxu0 %v6697_v29  ;;  %v4985_v29 = vld [vmem:[%s10091_s9 + $0x8] sm:$0xff] }
 0x4f6   :  { %8280 = vmatprep.subr.mxu0 %v6710_v45 }
 0x4f8   :  { %8242 = vmatmul.mubr.msk.f32.gmra.mxu0 %vm82_vm0, %v9616_v37 }
 0x4f9   :  { %8260 = vmatprep.mubr.msk.f32.mxu0 %vm82_vm0, %v9598_v26 }
 0x4fc   :  { %8261 = vmatmul.mubr.msk.f32.vlgmr.msra.gmra.mxu0 %vm82_vm0, %v9604_v8 }
 0x4fd   :  { %8263 = vmatprep.mubr.msk.f32.mxu0 %vm82_vm0, %v9606_v35  ;;  %8281 = vmatpush3.msra.mxu0 %v6710_v45  ;;  %v8502_v45 = vmov 0.0  }
 0x4fe   :  { %8302 = vmatprep.subr.mxu0 %v6723_v46 }
 0x500   :  { %8264 = vmatmul.mubr.msk.f32.gmra.mxu0 %vm82_vm0, %v9616_v37 }
 0x501   :  { %8282 = vmatprep.mubr.msk.f32.mxu0 %vm82_vm0, %v9598_v26 }
 0x504   :  { %8283 = vmatmul.mubr.msk.f32.vlgmr.msra.gmra.mxu0 %vm82_vm0, %v9604_v8 }
 0x505   :  { %8285 = vmatprep.mubr.msk.f32.mxu0 %vm82_vm0, %v9606_v35  ;;  %8303 = vmatpush3.msra.mxu0 %v6723_v46  ;;  %v4984_v46 = vld [vmem:[%s10091_s9] sm:$0xff] }
 0x506   :  { %8338 = vmatprep.subr.mxu0 %v8502_v45 }
 0x508   :  { %8286 = vmatmul.mubr.msk.f32.gmra.mxu0 %vm82_vm0, %v9616_v37 }
 0x509   :  { %8304 = vmatprep.mubr.msk.f32.mxu0 %vm82_vm0, %v9598_v26  ;;  %v6689_v26 = vld [vmem:[%s10090_s8 + $0xa0] sm:$0xff] }
 0x50c   :  { %8305 = vmatmul.mubr.msk.f32.vlgmr.msra.gmra.mxu0 %vm82_vm0, %v9604_v8  ;;  %v6691_v8 = vld [vmem:[%s10090_s8 + $0xb0] sm:$0xff] }
 0x50d   :  { %8307 = vmatprep.mubr.msk.f32.mxu0 %vm82_vm0, %v9606_v35 }
 0x510   :  { %8308 = vmatmul.mubr.msk.f32.gmra.mxu0 %vm82_vm0, %v9616_v37  ;;  %v6692_v37 = vld [vmem:[%s10090_s8 + $0xb8] sm:$0xff] }
 0x511   :  { %8340 = vmatprep.mubr.msk.f32.mxu0 %vm8503_vm2, %v8502_v45 }
 0x594   :  { %v9735_v50 = vpop.f32.mrf.mxu0  ;;  %v8166_v17 = vpop.f32.mrf.mxu1 }
 0x596   :  { %v9737_v31 = vpop.f32.mrf.mxu0 }
 0x598   :  { %v9739_v15 = vpop.f32.mrf.mxu0 }
 0x59a   :  { %v9741_v30 = vpop.f32.mrf.mxu0 }
 0x59c   :  { %v8174_v32 = vpop.f32.mrf.mxu0 }
 0x59e   :  { %v3637_v27 = vpop.f32.mrf.mxu0 }
 0x5a0   :  { %v8177_v20 = vpop.f32.mrf.mxu0 }
 0x5a1   :  { %8178 = vmatprep.subr.mxu1 %v8177_v20 }
 0x5a2   :  { %v3647_v36 = vpop.f32.mrf.mxu0  ;;  %8179 = vmatpush3.msra.mxu1 %v8177_v20 }
 0x5a3   :  { %8180 = vmatprep.subr.mxu1 %v3647_v36 }
 0x5a4   :  { %8181 = vmatpush3.msra.mxu1 %v3647_v36  ;;  %v8196_v2 = vpop.f32.mrf.mxu0 }
 0x5a5   :  { %8182 = vmatprep.subr.mxu1 %v8174_v32 }
 0x5a6   :  { %8183 = vmatpush3.msra.mxu1 %v8174_v32  ;;  %v3830_v39 = vpop.f32.mrf.mxu0  ;;  %v3550_v32 = vpop.f32.mrf.mxu1 }
 0x5a7   :  { %8184 = vmatprep.subr.mxu1 %v3637_v27 }
 0x5a8   :  { %8185 = vmatpush3.msra.mxu1 %v3637_v27  ;;  %v8199_v59 = vpop.f32.mrf.mxu0  ;;  %v8169_v27 = vpop.f32.mrf.mxu1 }
 0x5a9   :  { %8187 = vmatmul.mubr.msk.f32.vlgmr.msra.gmra.mxu1 %vm3374_vm1, %v6651_v28  ;;  %8200 = vmatprep.subr.mxu1 %v8199_v59 }
 0x5aa   :  { %v3840_v19 = vpop.f32.mrf.mxu0  ;;  %8201 = vmatpush3.msra.mxu1 %v8199_v59  ;;  %8189 = vmatprep.mubr.msk.f32.mxu1 %vm3374_vm1, %v6652_v62  ;;  %v3560_v20 = vpop.f32.mrf.mxu1 }
 0x5ab   :  { %8202 = vmatprep.subr.mxu1 %v3840_v19 }
 0x5ac   :  { %8203 = vmatpush3.msra.mxu1 %v3840_v19  ;;  %v8218_v51 = vpop.f32.mrf.mxu0 }
 0x5ad   :  { %8190 = vmatmul.mubr.msk.f32.gmra.mxu1 %vm3374_vm1, %v6653_v49  ;;  %8204 = vmatprep.subr.mxu1 %v8196_v2 }
 0x5ae   :  { %8205 = vmatpush3.msra.mxu1 %v8196_v2  ;;  %v4023_v57 = vpop.f32.mrf.mxu0  ;;  %8208 = vmatprep.mubr.msk.f32.mxu1 %vm3374_vm1, %v6663_v40 }
 0x5af   :  { %8206 = vmatprep.subr.mxu1 %v3830_v39 }
 0x5b0   :  { %8207 = vmatpush3.msra.mxu1 %v3830_v39  ;;  %v8221_v38 = vpop.f32.mrf.mxu0 }
 0x5b1   :  { %8209 = vmatmul.mubr.msk.f32.vlgmr.msra.gmra.mxu1 %vm3374_vm1, %v6664_v3  ;;  %8222 = vmatprep.subr.mxu1 %v8221_v38 }
 0x5b2   :  { %v4033_v14 = vpop.f32.mrf.mxu0  ;;  %8223 = vmatpush3.msra.mxu1 %v8221_v38  ;;  %8211 = vmatprep.mubr.msk.f32.mxu1 %vm3374_vm1, %v6665_v1 }
 0x5b3   :  { %8224 = vmatprep.subr.mxu1 %v4033_v14 }
 0x5b4   :  { %8225 = vmatpush3.msra.mxu1 %v4033_v14  ;;  %v8240_v13 = vpop.f32.mrf.mxu0 }
 0x5b5   :  { %8212 = vmatmul.mubr.msk.f32.gmra.mxu1 %vm3374_vm1, %v6666_v5  ;;  %8226 = vmatprep.subr.mxu1 %v8218_v51 }
 0x5b6   :  { %8227 = vmatpush3.msra.mxu1 %v8218_v51  ;;  %v4216_v16 = vpop.f32.mrf.mxu0  ;;  %8230 = vmatprep.mubr.msk.f32.mxu1 %vm3374_vm1, %v6676_v60 }
 0x5b7   :  { %8228 = vmatprep.subr.mxu1 %v4023_v57 }
 0x5b8   :  { %8229 = vmatpush3.msra.mxu1 %v4023_v57  ;;  %v8243_v56 = vpop.f32.mrf.mxu0 }
 0x5b9   :  { %8231 = vmatmul.mubr.msk.f32.vlgmr.msra.gmra.mxu1 %vm3374_vm1, %v6677_v4  ;;  %8244 = vmatprep.subr.mxu1 %v8243_v56 }
 0x5ba   :  { %v4226_v25 = vpop.f32.mrf.mxu0  ;;  %8245 = vmatpush3.msra.mxu1 %v8243_v56  ;;  %8233 = vmatprep.mubr.msk.f32.mxu1 %vm3374_vm1, %v6678_v55  ;;  %v3551_v55 = vadd.f32 %v3550_v32, %v9737_v31 }
 0x5bb   :  { %8246 = vmatprep.subr.mxu1 %v4226_v25 }
 0x5bc   :  { %8247 = vmatpush3.msra.mxu1 %v4226_v25  ;;  %v8262_v47 = vpop.f32.mrf.mxu0 }
 0x5bd   :  { %8234 = vmatmul.mubr.msk.f32.gmra.mxu1 %vm3374_vm1, %v6679_v6  ;;  %8248 = vmatprep.subr.mxu1 %v8240_v13  ;;  %v3566_v6 = vadd.f32 %v8169_v27, %v9739_v15 }
 0x5be   :  { %8249 = vmatpush3.msra.mxu1 %v8240_v13  ;;  %v4409_v12 = vpop.f32.mrf.mxu0  ;;  %8252 = vmatprep.mubr.msk.f32.mxu1 %vm3374_vm1, %v6689_v26 }
 0x5bf   :  { %8250 = vmatprep.subr.mxu1 %v4216_v16 }
 0x5c0   :  { %8251 = vmatpush3.msra.mxu1 %v4216_v16  ;;  %v8265_v35 = vpop.f32.mrf.mxu0  ;;  %v3556_v16 = vadd.f32 %v8166_v17, %v9735_v50 }
 0x5c1   :  { %8253 = vmatmul.mubr.msk.f32.vlgmr.msra.gmra.mxu1 %vm3374_vm1, %v6690_v53  ;;  %8266 = vmatprep.subr.mxu1 %v8265_v35 }
 0x5c2   :  { %v4419_v9 = vpop.f32.mrf.mxu0  ;;  %8267 = vmatpush3.msra.mxu1 %v8265_v35  ;;  %8255 = vmatprep.mubr.msk.f32.mxu1 %vm3374_vm1, %v6691_v8 }
 0x5c3   :  { %8268 = vmatprep.subr.mxu1 %v4419_v9 }
 0x5c4   :  { %8269 = vmatpush3.msra.mxu1 %v4419_v9  ;;  %v8284_v33 = vpop.f32.mrf.mxu0 }
 0x5c5   :  { %8256 = vmatmul.mubr.msk.f32.gmra.mxu1 %vm3374_vm1, %v6692_v37  ;;  %8270 = vmatprep.subr.mxu1 %v8262_v47 }
 0x5c6   :  { %8271 = vmatpush3.msra.mxu1 %v8262_v47  ;;  %v4602_v61 = vpop.f32.mrf.mxu0  ;;  %8274 = vmatprep.mubr.msk.f32.mxu1 %vm3374_vm1, %v6702_v42 }
 0x5c7   :  { %8272 = vmatprep.subr.mxu1 %v4409_v12 }
 0x5c8   :  { %8273 = vmatpush3.msra.mxu1 %v4409_v12  ;;  %v8287_v58 = vpop.f32.mrf.mxu0  ;;  %v3561_v12 = vadd.f32 %v3560_v20, %v9741_v30 }
 0x5c9   :  { %8275 = vmatmul.mubr.msk.f32.vlgmr.msra.gmra.mxu1 %vm3374_vm1, %v6703_v7  ;;  %8288 = vmatprep.subr.mxu1 %v8287_v58 }
 0x5ca   :  { %v4612_v54 = vpop.f32.mrf.mxu0  ;;  %8289 = vmatpush3.msra.mxu1 %v8287_v58  ;;  %8277 = vmatprep.mubr.msk.f32.mxu1 %vm3374_vm1, %v6704_v52 }
 0x5cb   :  { %8290 = vmatprep.subr.mxu1 %v4612_v54 }
 0x5cc   :  { %8291 = vmatpush3.msra.mxu1 %v4612_v54  ;;  %v8306_v11 = vpop.f32.mrf.mxu0 }
 0x5cd   :  { %8278 = vmatmul.mubr.msk.f32.gmra.mxu1 %vm3374_vm1, %v6705_v23  ;;  %8292 = vmatprep.subr.mxu1 %v8284_v33 }
 0x5ce   :  { %8293 = vmatpush3.msra.mxu1 %v8284_v33  ;;  %v4795_v48 = vpop.f32.mrf.mxu0  ;;  %8296 = vmatprep.mubr.msk.f32.mxu1 %vm3374_vm1, %v6715_v24 }
 0x5cf   :  { %8294 = vmatprep.subr.mxu1 %v4602_v61 }
 0x5d0   :  { %8295 = vmatpush3.msra.mxu1 %v4602_v61  ;;  %v8309_v22 = vpop.f32.mrf.mxu0 }
 0x5d1   :  { %8297 = vmatmul.mubr.msk.f32.vlgmr.msra.gmra.mxu1 %vm3374_vm1, %v6716_v18  ;;  %8310 = vmatprep.subr.mxu1 %v8309_v22 }
 0x5d2   :  { %v4805_v44 = vpop.f32.mrf.mxu0  ;;  %8311 = vmatpush3.msra.mxu1 %v8309_v22  ;;  %8299 = vmatprep.mubr.msk.f32.mxu1 %vm3374_vm1, %v6717_v10 }
 0x5d3   :  { %8312 = vmatprep.subr.mxu1 %v4805_v44 }
 0x5d4   :  { %8313 = vmatpush3.msra.mxu1 %v4805_v44 }
 0x5d5   :  { %8300 = vmatmul.mubr.msk.f32.gmra.mxu1 %vm3374_vm1, %v6718_v34  ;;  %8314 = vmatprep.subr.mxu1 %v8306_v11 }
 0x5d6   :  { %8315 = vmatpush3.msra.mxu1 %v8306_v11  ;;  %8318 = vmatprep.mubr.msk.f32.mxu1 %vm3374_vm1, %v6728_v0 }
 0x5d7   :  { %8316 = vmatprep.subr.mxu1 %v4795_v48 }
 0x5d8   :  { %8317 = vmatpush3.msra.mxu1 %v4795_v48 }
 0x5d9   :  { %8319 = vmatmul.mubr.msk.f32.vlgmr.msra.gmra.mxu1 %vm3374_vm1, %v6729_v41  ;;  %8324 = vmatprep.subr.mxu1 %v8502_v45 }
 0x5da   :  { %8321 = vmatprep.mubr.msk.f32.mxu1 %vm3374_vm1, %v6730_v21  ;;  %8325 = vmatpush3.msra.mxu1 %v4985_v29 }
 0x5db   :  { %8326 = vmatprep.subr.mxu1 %v8502_v45 }
 0x5dc   :  { %8327 = vmatpush3.msra.mxu1 %v4984_v46 }
 0x5dd   :  { %8322 = vmatmul.mubr.msk.f32.gmra.mxu1 %vm3374_vm1, %v6731_v43  ;;  %8331 = vmatprep.subr.mxu1 %v8502_v45 }
 0x5de   :  { %8328 = vmatprep.mubr.msk.f32.mxu1 %vm8503_vm2, %v8502_v45 }
 0x669   :  { %v8188_v36 = vpop.f32.mrf.mxu1 }
 0x66a   :  { %v3759_v56 = vadd.f32 %v8188_v36, %v3556_v16 }
 0x66b   :  { %v3739_v2 = vpop.f32.mrf.mxu1 }
 0x66c   :  { %v3758_v26 = vadd.f32 %v3739_v2, %v3551_v55 }
 0x66d   :  { %v8191_v39 = vpop.f32.mrf.mxu1 }
 0x66e   :  { %v3761_v8 = vadd.f32 %v8191_v39, %v3566_v6 }
 0x66f   :  { %v3749_v28 = vpop.f32.mrf.mxu1 }
 0x670   :  { %v3760_v37 = vadd.f32 %v3749_v28, %v3561_v12 }
 0x671   :  { %v8210_v62 = vpop.f32.mrf.mxu1 }
 0x672   :  { %v3952_v47 = vadd.f32 %v8210_v62, %v3759_v56 }
 0x673   :  { %v3932_v59 = vpop.f32.mrf.mxu1 }
 0x674   :  { %v3951_v35 = vadd.f32 %v3932_v59, %v3758_v26 }
 0x675   :  { %v8213_v19 = vpop.f32.mrf.mxu1 }
 0x676   :  { %v3954_v33 = vadd.f32 %v8213_v19, %v3761_v8 }
 0x677   :  { %v3942_v49 = vpop.f32.mrf.mxu1 }
 0x678   :  { %v3953_v7 = vadd.f32 %v3942_v49, %v3760_v37 }
 0x679   :  { %v8232_v40 = vpop.f32.mrf.mxu1 }
 0x67a   :  { %v4145_v9 = vadd.f32 %v8232_v40, %v3952_v47 }
 0x67b   :  { %v4125_v51 = vpop.f32.mrf.mxu1 }
 0x67c   :  { %v4144_v61 = vadd.f32 %v4125_v51, %v3951_v35 }
 0x67d   :  { %v8235_v57 = vpop.f32.mrf.mxu1 }
 0x67e   :  { %v4147_v31 = vadd.f32 %v8235_v57, %v3954_v33  ;;  %v4957_v33 = vld [vmem:[%s10088_s6] sm:$0x1] }
 0x67f   :  { %v4135_v3 = vpop.f32.mrf.mxu1 }
 0x680   :  { %v4146_v23 = vadd.f32 %v4135_v3, %v3953_v7  ;;  %v4959_v7 = vld [vmem:[%s10089_s7] sm:$0x1] }
 0x681   :  { %v8254_v1 = vpop.f32.mrf.mxu1 }
 0x682   :  { %v4338_v50 = vadd.f32 %v8254_v1, %v4145_v9 }
 0x683   :  { %v4318_v38 = vpop.f32.mrf.mxu1 }
 0x684   :  { %v4337_v58 = vadd.f32 %v4318_v38, %v4144_v61 }
 0x685   :  { %v8257_v14 = vpop.f32.mrf.mxu1 }
 0x686   :  { %v4340_v24 = vadd.f32 %v8257_v14, %v4147_v31 }
 0x687   :  { %v4328_v5 = vpop.f32.mrf.mxu1 }
 0x688   :  { %v4339_v30 = vadd.f32 %v4328_v5, %v4146_v23 }
 0x689   :  { %v8276_v60 = vpop.f32.mrf.mxu1 }
 0x68a   :  { %v4531_v54 = vadd.f32 %v8276_v60, %v4338_v50 }
 0x68b   :  { %v4511_v13 = vpop.f32.mrf.mxu1 }
 0x68c   :  { %v4530_v11 = vadd.f32 %v4511_v13, %v4337_v58 }
 0x68d   :  { %v8279_v4 = vpop.f32.mrf.mxu1 }
 0x68e   :  { %v4533_v10 = vadd.f32 %v8279_v4, %v4340_v24 }
 0x68f   :  { %v4521_v25 = vpop.f32.mrf.mxu1 }
 0x690   :  { %v4532_v34 = vadd.f32 %v4521_v25, %v4339_v30 }
 0x691   :  { %v8298_v53 = vpop.f32.mrf.mxu1 }
 0x692   :  { %v4724_v48 = vadd.f32 %v8298_v53, %v4531_v54 }
 0x693   :  { %v4704_v42 = vpop.f32.mrf.mxu1 }
 0x694   :  { %v4723_v22 = vadd.f32 %v4704_v42, %v4530_v11 }
 0x695   :  { %v8301_v52 = vpop.f32.mrf.mxu1 }
 0x696   :  { %v4726_v41 = vadd.f32 %v8301_v52, %v4533_v10 }
 0x697   :  { %v4714_v15 = vpop.f32.mrf.mxu1 }
 0x698   :  { %v4725_v29 = vadd.f32 %v4714_v15, %v4532_v34 }
 0x699   :  { %v8320_v18 = vpop.f32.mrf.mxu1 }
 0x69a   :  { %v4917_v44 = vadd.f32 %v8320_v18, %v4724_v48 }
 0x69b   :  { %v4897_v0 = vpop.f32.mrf.mxu1 }
 0x69c   :  { %v4935_v21 = vmul.f32 %v4917_v44, %v4917_v44  ;;  %v4916_v43 = vadd.f32 %v4897_v0, %v4723_v22  ;;  %v4922_v17 = vsel %vm4920_vm3, %v4917_v44, 0.0 }
 0x69d   :  { %v8323_v46 = vpop.f32.mrf.mxu1 }
 0x69e   :  { %v4921_v32 = vsel %vm4920_vm3, %v4916_v43, 0.0  ;;  %v4934_v27 = vmul.f32 %v4916_v43, %v4916_v43  ;;  %v4919_v20 = vadd.f32 %v8323_v46, %v4726_v41  ;;  %v4939_v39 = vsel %vm4920_vm3, %v4935_v21, 0.0  ;;  %v6738_v21 = vld [vmem:[%s10091_s9 + $0x18] sm:$0xff] }
 0x69f   :  { %v4923_v36 = vadd.f32 %v4922_v17, %v4921_v32  ;;  %v4907_v2 = vpop.f32.mrf.mxu1  ;;  %v6740_v17 = vld [vmem:[%s10094_s12 + $0x8] sm:$0xff] }
 0x6a0   :  { %v4938_v28 = vsel %vm4920_vm3, %v4934_v27, 0.0  ;;  %v4918_v62 = vadd.f32 %v4907_v2, %v4725_v29  ;;  %v4937_v19 = vmul.f32 %v4919_v20, %v4919_v20  ;;  %v4926_v57 = vsel %vm4920_vm3, %v4919_v20, 0.0  ;;  %v6744_v27 = vld [vmem:[%s10091_s9 + $0x28] sm:$0xff]  ;;  %v6749_v2 = vld [vmem:[%s10091_s9 + $0x38] sm:$0xff] }
 0x6a1   :  { %v4940_v59 = vadd.f32 %v4939_v39, %v4938_v28  ;;  %v6748_v39 = vld [vmem:[%s10091_s9 + $0x30] sm:$0xff]  ;;  %v6754_v28 = vld [vmem:[%s10091_s9 + $0x48] sm:$0xff] }
 0x6a2   :  { %v4924_v49 = vsel %vm4920_vm3, %v4918_v62, 0.0  ;;  %v4936_v40 = vmul.f32 %v4918_v62, %v4918_v62  ;;  %v4943_v14 = vsel %vm4920_vm3, %v4937_v19, 0.0  ;;  %v6758_v19 = vld [vmem:[%s10091_s9 + $0x50] sm:$0xff] }
 0x6a3   :  { %v4925_v51 = vadd.f32 %v4924_v49, %v4923_v36  ;;  %v6743_v36 = vld [vmem:[%s10091_s9 + $0x20] sm:$0xff]  ;;  %v6764_v49 = vld [vmem:[%s10091_s9 + $0x68] sm:$0xff] }
 0x6a4   :  { %v4941_v3 = vsel %vm4920_vm3, %v4936_v40, 0.0  ;;  %v6763_v40 = vld [vmem:[%s10091_s9 + $0x60] sm:$0xff] }
 0x6a5   :  { %v4927_v1 = vadd.f32 %v4926_v57, %v4925_v51  ;;  %v4942_v38 = vadd.f32 %v4941_v3, %v4940_v59  ;;  %v6759_v59 = vld [vmem:[%s10091_s9 + $0x58] sm:$0xff]  ;;  %v6768_v57 = vld [vmem:[%s10091_s9 + $0x70] sm:$0xff]  ;;  %v6774_v3 = vld [vmem:[%s10091_s9 + $0x88] sm:$0xff] }
 0x6a6   :  { %v6769_v51 = vld [vmem:[%s10091_s9 + $0x78] sm:$0xff] }
 0x6a7   :  { %v4928_v5 = vrot.slane %v4927_v1, 4  ;;  %v4944_v60 = vadd.f32 %v4943_v14, %v4942_v38 }
 0x6a9   :  { %v4929_v13 = vadd.f32 %v4928_v5, %v4927_v1  ;;  %v4945_v16 = vrot.slane %v4944_v60, 4  ;;  %v6773_v1 = vld [vmem:[%s10091_s9 + $0x80] sm:$0xff] }
 0x6ab   :  { %v4930_v4 = vrot.slane %v4929_v13, 2  ;;  %v4946_v55 = vadd.f32 %v4945_v16, %v4944_v60  ;;  %v6746_v16 = vld [vmem:[%s10094_s12 + $0x10] sm:$0xff] }
 0x6ad   :  { %v4931_v56 = vadd.f32 %v4930_v4, %v4929_v13  ;;  %v4947_v25 = vrot.slane %v4946_v55, 2 }
 0x6af   :  { %v4932_v6 = vrot.slane %v4931_v56, 1  ;;  %v4948_v26 = vadd.f32 %v4947_v25, %v4946_v55 }
 0x6b1   :  { %v4933_v47 = vadd.f32 %v4932_v6, %v4931_v56  ;;  %v4949_v12 = vrot.slane %v4948_v26, 1  ;;  %v6751_v56 = vld [vmem:[%s10094_s12 + $0x18] sm:$0xff] }
 0x6b3   :  { %v4950_v53 = vadd.f32 %v4949_v12, %v4948_v26  ;;  %v4951_v8 = vmul.f32 0.03125, %v4933_v47  ;;  %v6756_v26 = vld [vmem:[%s10094_s12 + $0x20] sm:$0xff] }
 0x6b5   :  { %v4952_v35 = vmul.f32 0.03125, %v4950_v53  ;;  %v4953_v9 = vmul.f32 %v4951_v8, %v4951_v8  ;;  %v6761_v53 = vld [vmem:[%s10094_s12 + $0x28] sm:$0xff] }
 0x6b7   :  { %v4954_v37 = vsub.f32 %v4952_v35, %v4953_v9  ;;  %v6766_v9 = vld [vmem:[%s10094_s12 + $0x30] sm:$0xff] }
 0x6b9   :  { %v4955_v42 = vadd.f32 1e-05, %v4954_v37 }
 0x6bb   :  { %8451 = vrsqrt.f32 %v4955_v42 }
 0x6c8   :  { %v8452_v61 = vpop.eup %8451 }
 0x6c9   :  { %v4958_v50 = vmul.f32 %v8452_v61, %v4957_v33  ;;  %v6771_v33 = vld [vmem:[%s10094_s12 + $0x38] sm:$0xff] }
 0x6cb   :  { %v4960_v52 = vmul.f32 %v4958_v50, %v4951_v8  ;;  %v4965_v31 = vrot.slane %v4958_v50, %v9576_v63 }
 0x6cd   :  { %v4961_v58 = vsub.f32 %v4959_v7, %v4960_v52  ;;  %v4966_v54 = vmul.f32 %v4965_v31, %v4916_v43  ;;  %v4967_v23 = vmul.f32 %v4965_v31, %v4917_v44  ;;  %v4968_v15 = vmul.f32 %v4965_v31, %v4918_v62  ;;  %v6737_v44 = vld [vmem:[%s10091_s9 + $0x10] sm:$0xff]  ;;  %v5059_v43 = vld [vmem:[%s10094_s12] sm:$0xff] }
 0x6ce   :  { %v4969_v24 = vmul.f32 %v4965_v31, %v4919_v20  ;;  %v6753_v62 = vld [vmem:[%s10091_s9 + $0x40] sm:$0xff] }
 0x6cf   :  { %v4974_v11 = vrot.slane %v4961_v58, %v9576_v63  ;;  %v6776_v7 = vld [vmem:[%s10094_s12 + $0x40] sm:$0xff]  ;;  %v6374_v58 = vld [vmem:[%s10095_s13 + $0x18] sm:$0xff] }
 0x6d1   :  { %v4976_v48 = vadd.f32 %v4974_v11, %v4966_v54  ;;  %v4977_v30 = vadd.f32 %v4974_v11, %v4967_v23  ;;  %v4978_v18 = vadd.f32 %v4974_v11, %v4968_v15  ;;  %v4979_v10 = vadd.f32 %v4974_v11, %v4969_v24  ;;  %v6373_v54 = vld [vmem:[%s10095_s13 + $0x10] sm:$0xff]  ;;  %v6372_v23 = vld [vmem:[%s10095_s13 + $0x8] sm:$0xff]  ;;  %v6371_v15 = vld [vmem:[%s10095_s13] sm:$0xff] }
 0x6d3   :  { %v4980_v22 = vmax.f32 %v4976_v48, %v4977_v30  ;;  %v4981_v34 = vmax.f32 %v4978_v18, %v4979_v10 }
 0x6d5   :  { %v4982_v0 = vmax.f32 %v4980_v22, %v4981_v34 }
 0x6d7   :  { %v9885_v41 = vmax.f32 %v4982_v0, 0.0 }
 0x6d9   :  { %8329 = vmatmul.mubr.msk.f32.vlgmr.msra.gmra.mxu1 %vm4920_vm3, %v9885_v41 }
 0x6da   :  { %8332 = vmatpush3.msra.mxu1 %v6738_v21  ;;  %8335 = vmatprep.mubr.msk.f32.mxu1 %vm8503_vm2, %v8502_v45 }
 0x6db   :  { %8333 = vmatprep.subr.mxu1 %v8502_v45 }
 0x6dc   :  { %8334 = vmatpush3.msra.mxu1 %v6737_v44 }
 0x6dd   :  { %8336 = vmatmul.mubr.msk.f32.vlgmr.msra.gmra.mxu1 %vm4920_vm3, %v9885_v41  ;;  %8343 = vmatprep.subr.mxu1 %v8502_v45 }
 0x6de   :  { %8345 = vmatprep.mubr.msk.f32.mxu1 %vm8503_vm2, %v8502_v45 }
 0x799   :  { %v5055_v29 = vpop.f32.mrf.mxu1 }
 0x79a   :  { %8344 = vmatpush3.msra.mxu1 %v5055_v29 }
 0x79b   :  { %v8330_v46 = vpop.f32.mrf.mxu1  ;;  %8346 = vmatmul.mubr.msk.f32.vlgmr.msra.gmra.mxu1 %vm82_vm0, %v5059_v43  ;;  %8355 = vmatprep.subr.mxu1 %v8502_v45 }
 0x79c   :  { %8357 = vmatprep.mubr.msk.f32.mxu1 %vm8503_vm2, %v8502_v45 }
 0x79d   :  { %v5129_v32 = vpop.f32.mrf.mxu1 }
 0x79e   :  { %8339 = vmatpush3.msra.mxu0 %v5129_v32 }
 0x79f   :  { %v8337_v20 = vpop.f32.mrf.mxu1  ;;  %8341 = vmatmul.mubr.msk.f32.vlgmr.msra.gmra.mxu0 %vm82_vm0, %v6740_v17  ;;  %8348 = vmatprep.subr.mxu0 %v8502_v45 }
 0x7a0   :  { %8349 = vmatpush3.msra.mxu0 %v6744_v27  ;;  %8352 = vmatprep.mubr.msk.f32.mxu0 %vm8503_vm2, %v8502_v45 }
 0x7a1   :  { %8350 = vmatprep.subr.mxu0 %v8502_v45 }
 0x7a2   :  { %8351 = vmatpush3.msra.mxu0 %v6743_v36 }
 0x7a3   :  { %8353 = vmatmul.mubr.msk.f32.vlgmr.msra.gmra.mxu0 %vm4920_vm3, %v9885_v41  ;;  %8360 = vmatprep.subr.mxu0 %v8502_v45 }
 0x7a4   :  { %8361 = vmatpush3.msra.mxu0 %v6749_v2  ;;  %8364 = vmatprep.mubr.msk.f32.mxu0 %vm8503_vm2, %v8502_v45 }
 0x7a5   :  { %8362 = vmatprep.subr.mxu0 %v8502_v45 }
 0x7a6   :  { %8363 = vmatpush3.msra.mxu0 %v6748_v39 }
 0x7a7   :  { %8365 = vmatmul.mubr.msk.f32.vlgmr.msra.gmra.mxu0 %vm4920_vm3, %v9885_v41  ;;  %8372 = vmatprep.subr.mxu0 %v8502_v45 }
 0x7a8   :  { %8373 = vmatpush3.msra.mxu0 %v6754_v28  ;;  %8376 = vmatprep.mubr.msk.f32.mxu0 %vm8503_vm2, %v8502_v45 }
 0x7a9   :  { %8374 = vmatprep.subr.mxu0 %v8502_v45 }
 0x7aa   :  { %8375 = vmatpush3.msra.mxu0 %v6753_v62 }
 0x7ab   :  { %8377 = vmatmul.mubr.msk.f32.vlgmr.msra.gmra.mxu0 %vm4920_vm3, %v9885_v41  ;;  %8384 = vmatprep.subr.mxu0 %v8502_v45 }
 0x7ac   :  { %8385 = vmatpush3.msra.mxu0 %v6759_v59  ;;  %8388 = vmatprep.mubr.msk.f32.mxu0 %vm8503_vm2, %v8502_v45 }
 0x7ad   :  { %8386 = vmatprep.subr.mxu0 %v8502_v45 }
 0x7ae   :  { %8387 = vmatpush3.msra.mxu0 %v6758_v19 }
 0x7af   :  { %8389 = vmatmul.mubr.msk.f32.vlgmr.msra.gmra.mxu0 %vm4920_vm3, %v9885_v41  ;;  %8396 = vmatprep.subr.mxu0 %v8502_v45 }
 0x7b0   :  { %8397 = vmatpush3.msra.mxu0 %v6764_v49  ;;  %8400 = vmatprep.mubr.msk.f32.mxu0 %vm8503_vm2, %v8502_v45 }
 0x7b1   :  { %8398 = vmatprep.subr.mxu0 %v8502_v45 }
 0x7b2   :  { %8399 = vmatpush3.msra.mxu0 %v6763_v40 }
 0x7b3   :  { %8401 = vmatmul.mubr.msk.f32.vlgmr.msra.gmra.mxu0 %vm4920_vm3, %v9885_v41  ;;  %8408 = vmatprep.subr.mxu0 %v8502_v45 }
 0x7b4   :  { %8409 = vmatpush3.msra.mxu0 %v6769_v51  ;;  %8412 = vmatprep.mubr.msk.f32.mxu0 %vm8503_vm2, %v8502_v45 }
 0x7b5   :  { %8410 = vmatprep.subr.mxu0 %v8502_v45 }
 0x7b6   :  { %8411 = vmatpush3.msra.mxu0 %v6768_v57 }
 0x7b7   :  { %8413 = vmatmul.mubr.msk.f32.vlgmr.msra.gmra.mxu0 %vm4920_vm3, %v9885_v41  ;;  %8420 = vmatprep.subr.mxu0 %v8502_v45 }
 0x7b8   :  { %8421 = vmatpush3.msra.mxu0 %v6774_v3  ;;  %8424 = vmatprep.mubr.msk.f32.mxu0 %vm8503_vm2, %v8502_v45 }
 0x7b9   :  { %8422 = vmatprep.subr.mxu0 %v8502_v45 }
 0x7ba   :  { %8423 = vmatpush3.msra.mxu0 %v6773_v1 }
 0x7bb   :  { %8425 = vmatmul.mubr.msk.f32.vlgmr.msra.gmra.mxu0 %vm4920_vm3, %v9885_v41  ;;  %8432 = vmatprep.subr.mxu0 %v8502_v45 }
 0x7bc   :  { %8440 = vmatprep.mubr.msk.f32.mxu0 %vm8503_vm2, %v8502_v45  ;;  %8433 = vmatpush3.msra.mxu0 %v6374_v58 }
 0x7bd   :  { %8434 = vmatprep.subr.mxu0 %v8502_v45 }
 0x7be   :  { %8435 = vmatpush3.msra.mxu0 %v6373_v54 }
 0x7bf   :  { %8436 = vmatprep.subr.mxu0 %v8502_v45 }
 0x7c0   :  { %8437 = vmatpush3.msra.mxu0 %v6372_v23 }
 0x7c1   :  { %8438 = vmatprep.subr.mxu0 %v8502_v45 }
 0x7c2   :  { %8439 = vmatpush3.msra.mxu0 %v6371_v15 }
 0x85b   :  { %v5277_v38 = vpop.f32.mrf.mxu1 }
 0x85d   :  { %v8347_v14 = vpop.f32.mrf.mxu1 }
 0x85f   :  { %v5204_v5 = vpop.f32.mrf.mxu0 }
 0x860   :  { %v10001_v60 = vadd.f32 %v5277_v38, %v5204_v5 }
 0x861   :  { %v8342_v13 = vpop.f32.mrf.mxu0 }
 0x863   :  { %v5350_v4 = vpop.f32.mrf.mxu0 }
 0x864   :  { %8356 = vmatpush3.msra.mxu1 %v5350_v4 }
 0x865   :  { %v8354_v55 = vpop.f32.mrf.mxu0  ;;  %8358 = vmatmul.mubr.msk.f32.vlgmr.msra.gmra.mxu1 %vm82_vm0, %v6746_v16  ;;  %8367 = vmatprep.subr.mxu1 %v8502_v45 }
 0x866   :  { %8369 = vmatprep.mubr.msk.f32.mxu1 %vm8503_vm2, %v8502_v45 }
 0x867   :  { %v5499_v25 = vpop.f32.mrf.mxu0 }
 0x868   :  { %8368 = vmatpush3.msra.mxu1 %v5499_v25 }
 0x869   :  { %v8366_v6 = vpop.f32.mrf.mxu0  ;;  %8370 = vmatmul.mubr.msk.f32.vlgmr.msra.gmra.mxu1 %vm82_vm0, %v6751_v56  ;;  %8379 = vmatprep.subr.mxu1 %v8502_v45  ;;  %v6345_v56 = vld [vmem:[%s10092_s10] sm:$0x1] }
 0x86a   :  { %8381 = vmatprep.mubr.msk.f32.mxu1 %vm8503_vm2, %v8502_v45 }
 0x86b   :  { %v5648_v47 = vpop.f32.mrf.mxu0 }
 0x86c   :  { %8380 = vmatpush3.msra.mxu1 %v5648_v47 }
 0x86d   :  { %v8378_v12 = vpop.f32.mrf.mxu0  ;;  %8382 = vmatmul.mubr.msk.f32.vlgmr.msra.gmra.mxu1 %vm82_vm0, %v6756_v26  ;;  %8391 = vmatprep.subr.mxu1 %v8502_v45  ;;  %v6347_v26 = vld [vmem:[%s10093_s11] sm:$0x1]  ;;  %s8504_s11 = smov [#allocation5]  }
 0x86e   :  { %8393 = vmatprep.mubr.msk.f32.mxu1 %vm8503_vm2, %v8502_v45  ;;  %s6463_s9 = sshll.u32 %s8504_s11, 4  ;;  %s6464_s9 = int_to_ptr.vmem [resolvable:$true] %s6463_s9 }
 0x86f   :  { %v5797_v8 = vpop.f32.mrf.mxu0  ;;  %s8475_s16 = scalar_lea.vmem %s6464_s9, 32  ;;  %p8480_p6 = scmp.lt.s32.totalorder %s6464_s9, %s6464_s9 }
 0x870   :  { %8392 = vmatpush3.msra.mxu1 %v5797_v8  ;;  %p8476_p5 = scmp.ne.s32.totalorder %s6464_s9, %s8475_s16  ;;  %p8481_p7 = scmp.lt.s32.totalorder %s8475_s16, %s8475_s16 }
 0x871   :  { %v8390_v35 = vpop.f32.mrf.mxu0  ;;  %8394 = vmatmul.mubr.msk.f32.vlgmr.msra.gmra.mxu1 %vm82_vm0, %v6761_v53  ;;  %8403 = vmatprep.subr.mxu1 %v8502_v45 }
 0x872   :  { %8405 = vmatprep.mubr.msk.f32.mxu1 %vm8503_vm2, %v8502_v45  ;;  %p8482_p8 = por %p8481_p7, %p8480_p6 }
 0x873   :  { %v5946_v37 = vpop.f32.mrf.mxu0 }
 0x874   :  { %8404 = vmatpush3.msra.mxu1 %v5946_v37  ;;  %p8483_p9 = pnand %p8482_p8, %p8476_p5 }
 0x875   :  { %v8402_v42 = vpop.f32.mrf.mxu0  ;;  %8406 = vmatmul.mubr.msk.f32.vlgmr.msra.gmra.mxu1 %vm82_vm0, %v6766_v9  ;;  %8415 = vmatprep.subr.mxu1 %v8502_v45 }
 0x876   :  { %8417 = vmatprep.mubr.msk.f32.mxu1 %vm8503_vm2, %v8502_v45 }
 0x877   :  { %v6095_v61 = vpop.f32.mrf.mxu0 }
 0x878   :  { %8416 = vmatpush3.msra.mxu1 %v6095_v61 }
 0x879   :  { %v8414_v50 = vpop.f32.mrf.mxu0  ;;  %8418 = vmatmul.mubr.msk.f32.vlgmr.msra.gmra.mxu1 %vm82_vm0, %v6771_v33  ;;  %8427 = vmatprep.subr.mxu1 %v8502_v45 }
 0x87a   :  { %8429 = vmatprep.mubr.msk.f32.mxu1 %vm8503_vm2, %v8502_v45 }
 0x87b   :  { %v6244_v52 = vpop.f32.mrf.mxu0 }
 0x87c   :  { %8428 = vmatpush3.msra.mxu1 %v6244_v52 }
 0x87d   :  { %v8426_v31 = vpop.f32.mrf.mxu0  ;;  %8430 = vmatmul.mubr.msk.f32.vlgmr.msra.gmra.mxu1 %vm82_vm0, %v6776_v7  ;;  %v6778_v7 = vld [vmem:[%s10096_s14] ss:$0 sm:$0xff] }
 0x925   :  { %v5425_v24 = vpop.f32.mrf.mxu1 }
 0x926   :  { %v5429_v34 = vadd.f32 %v5425_v24, %v10001_v60 }
 0x927   :  { %v8359_v11 = vpop.f32.mrf.mxu1 }
 0x929   :  { %v5574_v48 = vpop.f32.mrf.mxu1 }
 0x92a   :  { %v5578_v41 = vadd.f32 %v5574_v48, %v5429_v34 }
 0x92b   :  { %v8371_v30 = vpop.f32.mrf.mxu1 }
 0x92d   :  { %v5723_v18 = vpop.f32.mrf.mxu1 }
 0x92e   :  { %v5727_v44 = vadd.f32 %v5723_v18, %v5578_v41 }
 0x92f   :  { %v8383_v10 = vpop.f32.mrf.mxu1 }
 0x931   :  { %v5872_v22 = vpop.f32.mrf.mxu1 }
 0x932   :  { %v5876_v29 = vadd.f32 %v5872_v22, %v5727_v44 }
 0x933   :  { %v8395_v0 = vpop.f32.mrf.mxu1 }
 0x935   :  { %v6021_v21 = vpop.f32.mrf.mxu1 }
 0x936   :  { %v6025_v17 = vadd.f32 %v6021_v21, %v5876_v29 }
 0x937   :  { %v8407_v43 = vpop.f32.mrf.mxu1 }
 0x939   :  { %v6170_v46 = vpop.f32.mrf.mxu1 }
 0x93a   :  { %v6174_v45 = vadd.f32 %v6170_v46, %v6025_v17 }
 0x93b   :  { %v8419_v32 = vpop.f32.mrf.mxu1 }
 0x93d   :  { %v6319_v27 = vpop.f32.mrf.mxu1 }
 0x93e   :  { %v6323_v20 = vadd.f32 %v6319_v27, %v6174_v45 }
 0x93f   :  { %v8431_v36 = vpop.f32.mrf.mxu1 }
 0x940   :  { %v6324_v2 = vsel %vm3374_vm1, %v6323_v20, 0.0  ;;  %v6331_v39 = vmul.f32 %v6323_v20, %v6323_v20 }
 0x941   :  { %v6325_v28 = vrot.slane %v6324_v2, 4 }
 0x942   :  { %v6332_v62 = vsel %vm3374_vm1, %v6331_v39, 0.0 }
 0x943   :  { %v6326_v59 = vadd.f32 %v6325_v28, %v6324_v2  ;;  %v6333_v19 = vrot.slane %v6332_v62, 4 }
 0x945   :  { %v6327_v49 = vrot.slane %v6326_v59, 2  ;;  %v6334_v40 = vadd.f32 %v6333_v19, %v6332_v62 }
 0x947   :  { %v6328_v51 = vadd.f32 %v6327_v49, %v6326_v59  ;;  %v6335_v57 = vrot.slane %v6334_v40, 2 }
 0x949   :  { %v6329_v3 = vrot.slane %v6328_v51, 1  ;;  %v6336_v1 = vadd.f32 %v6335_v57, %v6334_v40 }
 0x94b   :  { %v6330_v38 = vadd.f32 %v6329_v3, %v6328_v51  ;;  %v6337_v14 = vrot.slane %v6336_v1, 1 }
 0x94d   :  { %v6338_v5 = vadd.f32 %v6337_v14, %v6336_v1  ;;  %v6339_v60 = vmul.f32 0.125, %v6330_v38 }
 0x94f   :  { %v6340_v13 = vmul.f32 0.125, %v6338_v5  ;;  %v6341_v16 = vmul.f32 %v6339_v60, %v6339_v60 }
 0x951   :  { %v6342_v4 = vsub.f32 %v6340_v13, %v6341_v16 }
 0x953   :  { %v6343_v55 = vadd.f32 1e-05, %v6342_v4 }
 0x955   :  { %8453 = vrsqrt.f32 %v6343_v55 }
 0x962   :  { %v8454_v25 = vpop.eup %8453 }
 0x963   :  { %v6346_v6 = vmul.f32 %v8454_v25, %v6345_v56 }
 0x965   :  { %v6348_v47 = vmul.f32 %v6346_v6, %v6339_v60  ;;  %v6353_v12 = vrot.slane %v6346_v6, %v9576_v63 }
 0x967   :  { %v6349_v53 = vsub.f32 %v6347_v26, %v6348_v47  ;;  %v6354_v8 = vmul.f32 %v6353_v12, %v6323_v20 }
 0x969   :  { %v6359_v35 = vrot.slane %v6349_v53, %v9576_v63 }
 0x96b   :  { %v6361_v9 = vadd.f32 %v6359_v35, %v6354_v8 }
 0x96d   :  { %v6363_v37 = vrot.slane %v6361_v9, 2 }
 0x96f   :  { %v6365_v42 = vmax.f32 %v6361_v9, %v6363_v37 }
 0x971   :  { %v6367_v33 = vrot.slane %v6365_v42, 4 }
 0x973   :  { %v6369_v61 = vmax.f32 %v6365_v42, %v6367_v33 }
 0x975   :  { %v6370_v50 = vmax.f32 %v6369_v61, 0.0 }
 0x977   :  { %8441 = vmatmul.mubr.msk.f32.vlgmr.msra.gmra.mxu0 %vm3374_vm1, %v6370_v50 }
 0xa37   :  { %v6451_v52 = vpop.f32.mrf.mxu0 }
 0xa38   :  { %v6452_v31 = vadd.f32 %v6778_v7, %v6451_v52 }
 0xa39   :  { %v8442_v58 = vpop.f32.mrf.mxu0 }
 0xa3a   :  { %6456 = vst.msk [vmem:[#allocation5] sm:$0x3] %vm6455_vm4, %v6452_v31 }
 0xa3b   :  { %8486 = shalt.err (!%p8483_p9)
}
 0xa3c   :  { %6466 = dma.vmem_to_hbm [thread:$0]  %s6464_s9, 32, %s10097_s15, [#allocation4]  }
 0xa3d   :  { %8497 = dma.done.wait [#allocation4], 32  }
 0xa3e   :  { %8498 = vsyncadd [#allocation4], 4294967264 }
 0xa3f   :  { %6470 = vsyncpa [#allocation3], 1 }
 0xa40   :  { %6471 = vsyncpa [#allocation4], 1 }

</bundles_post_ra>
